<compile_context>
chip_gen: v5e
topology: v5e:2x2
jax: 0.10.0
libtpu: 0.0.40
codegen_flags: <defaults>
</compile_context>

<pallas_src>
import functools

import jax
import jax.numpy as jnp
from jax.experimental import pallas as pl
from jax.experimental.pallas import tpu as pltpu


# ----------------------------- Pallas kernel -----------------------------

def _conv_mm_kernel(w_ref, cols_ref, b_ref, o_ref, *, layernorm, relu):
    """(OC, K) @ (K, Mblk) + bias, optional fused per-sample LayerNorm (no affine) + ReLU.

    Output lane axis = Mblk (large multiple of 128) -> lane-dense stores.
    When `layernorm` is True the caller guarantees this block is exactly one sample's
    full (C, H, W) activation, so normalizing over the whole block matches
    nn.LayerNorm([C, H, W], elementwise_affine=False).
    """
    acc = jnp.dot(w_ref[...], cols_ref[...], preferred_element_type=jnp.float32)
    acc = acc + b_ref[...]                                   # bias (OC, 1) broadcasts over M
    if layernorm:
        d = float(acc.shape[0] * acc.shape[1])
        s = jnp.sum(acc, axis=1, keepdims=True)              # lane reduce  -> (OC, 1)
        mean = jnp.sum(s, axis=0, keepdims=True) / d         # sublane reduce -> (1, 1)
        xc = acc - mean
        s2 = jnp.sum(xc * xc, axis=1, keepdims=True)
        var = jnp.sum(s2, axis=0, keepdims=True) / d         # biased variance (PyTorch)
        acc = xc * jax.lax.rsqrt(var + 1e-5)
    if relu:
        acc = jnp.maximum(acc, 0.0)
    o_ref[...] = acc.astype(o_ref.dtype)


def conv_mm(w2d, cols, bias, *, layernorm, relu, n_blocks):
    """Pallas call: (OC, K) @ (K, M) + bias (+ fused LN/ReLU), tiled over M in n_blocks."""
    OC, K = w2d.shape
    K2, M = cols.shape
    assert K == K2 and M % n_blocks == 0
    mb = M // n_blocks                                       # 4096 / 1024 / 256 / 128 here
    bias2d = bias.reshape(OC, 1).astype(jnp.float32)
    kernel = functools.partial(_conv_mm_kernel, layernorm=layernorm, relu=relu)
    return pl.pallas_call(
        kernel,
        out_shape=jax.ShapeDtypeStruct((OC, M), jnp.float32),
        grid=(n_blocks,),
        in_specs=[
            pl.BlockSpec((OC, K), lambda i: (0, 0)),         # weights, resident
            pl.BlockSpec((K, mb), lambda i: (0, i)),         # im2col columns (lane-dense)
            pl.BlockSpec((OC, 1), lambda i: (0, 0)),         # bias
        ],
        out_specs=pl.BlockSpec((OC, mb), lambda i: (0, i)),
        compiler_params=pltpu.CompilerParams(dimension_semantics=("parallel",)),
        cost_estimate=pl.CostEstimate(
            flops=2 * OC * K * M,
            transcendentals=0,
            bytes_accessed=4 * (K * M + OC * K + OC + OC * M)),
    )(w2d, cols, bias2d)


# ------------------------------ JAX glue ------------------------------

def im2col_T(x_nhwc, kh=4, kw=4, stride=2, pad=1):
    """NHWC -> (K, M) = (kh*kw*C, N*OH*OW); K ordered (kh, kw, ic), M ordered (n, oh, ow)."""
    N, H, W, C = x_nhwc.shape
    OH = (H + 2 * pad - kh) // stride + 1
    OW = (W + 2 * pad - kw) // stride + 1
    xp = jnp.pad(x_nhwc, ((0, 0), (pad, pad), (pad, pad), (0, 0)))
    taps = [xp[:, i:i + stride * OH:stride, j:j + stride * OW:stride, :]
            for i in range(kh) for j in range(kw)]
    p = jnp.stack(taps, axis=0)                  # (kh*kw, N, OH, OW, C)
    p = jnp.transpose(p, (0, 4, 1, 2, 3))        # (kh*kw, C, N, OH, OW)
    return p.reshape(kh * kw * C, N * OH * OW), OH, OW


def conv4x4_s2(x_nhwc, weight, bias, *, layernorm, relu, single_block=False):
    """Conv2d(k=4, s=2, p=1) + bias (+ fused LN/ReLU). NHWC in, NHWC out."""
    OC, IC, KH, KW = weight.shape
    N = x_nhwc.shape[0]
    cols, OH, OW = im2col_T(x_nhwc)
    # Match K ordering (kh, kw, ic): (OC, IC, 4, 4) -> (OC, 4, 4, IC) -> (OC, K)
    w2d = jnp.transpose(weight, (0, 2, 3, 1)).reshape(OC, KH * KW * IC)
    n_blocks = 1 if single_block else N          # one block per sample (required when LN fused)
    y = conv_mm(w2d, cols, bias, layernorm=layernorm, relu=relu, n_blocks=n_blocks)
    return jnp.transpose(y.reshape(OC, N, OH, OW), (1, 2, 3, 0))   # -> NHWC


def discriminator_forward(x_nchw, params):
    """Matches nn.Sequential(conv, ReLU, conv, LN, ReLU, conv, LN, ReLU, conv)."""
    (w1, b1), (w2, b2), (w3, b3), (w4, b4) = params
    h = jnp.transpose(x_nchw, (0, 2, 3, 1))                          # NHWC end-to-end
    h = conv4x4_s2(h, w1, b1, layernorm=False, relu=True)            # (N, 64, 64, 16)
    h = conv4x4_s2(h, w2, b2, layernorm=True,  relu=True)            # (N, 32, 32, 32)  conv+LN+ReLU fused
    h = conv4x4_s2(h, w3, b3, layernorm=True,  relu=True)            # (N, 16, 16, 64)  conv+LN+ReLU fused
    # Final conv: per-sample M = 64 (< 128 lanes), so use one full lane-dense block.
    h = conv4x4_s2(h, w4, b4, layernorm=False, relu=False, single_block=True)  # (N, 8, 8, 1)
    return jnp.transpose(h, (0, 3, 1, 2))                            # NCHW, matches PyTorch


# ------------------------------ main ------------------------------

if __name__ == "__main__":
    input_nc, ndf = 1, 16

    key = jax.random.PRNGKey(0)
    keys = jax.random.split(key, 5)

    def init_conv(k, oc, ic):
        kw_, kb_ = jax.random.split(k)
        w = jax.random.normal(kw_, (oc, ic, 4, 4), dtype=jnp.float32) * 0.05
        b = jax.random.normal(kb_, (oc,), dtype=jnp.float32) * 0.05
        return w, b

    params = (
        init_conv(keys[1], ndf, input_nc),        # Conv2d(1, 16)
        init_conv(keys[2], ndf * 2, ndf),         # Conv2d(16, 32)
        init_conv(keys[3], ndf * 4, ndf * 2),     # Conv2d(32, 64)
        init_conv(keys[4], 1, ndf * 4),           # Conv2d(64, 1)
    )

    # Module's LayerNorm shapes hardcode a 128x128 input.
    x = jax.random.normal(keys[0], (2, input_nc, 128, 128), dtype=jnp.float32)

    out = jax.jit(discriminator_forward)(x, params)
    jax.block_until_ready(out)
    assert out.shape == (2, 1, 8, 8), out.shape
    print("KERNEL_OK")
</pallas_src>

<mosaic_0001>
module attributes {stable_mosaic.version = 11 : i64} {
  func.func @_conv_mm_kernel(%arg0: i32, %arg1: memref<16x16xf32, #tpu.memory_space<vmem>>, %arg2: memref<16x4096xf32, #tpu.memory_space<vmem>>, %arg3: memref<16x1xf32, #tpu.memory_space<vmem>>, %arg4: memref<16x4096xf32, #tpu.memory_space<vmem>>) attributes {dimension_semantics = [#tpu.dimension_semantics<parallel>], iteration_bounds = array<i64: 2>, scalar_prefetch = 0 : i64, scratch_operands = 0 : i64, tpu.core_type = #tpu.core_type<tc>, window_params = [{pipeline_mode = #tpu.pipeline_mode<synchronous>, transform_indices = @transform_0, window_bounds = array<i64: 16, 16>}, {transform_indices = @transform_1, window_bounds = array<i64: 16, 4096>}, {pipeline_mode = #tpu.pipeline_mode<synchronous>, transform_indices = @transform_2, window_bounds = array<i64: 16, 1>}, {transform_indices = @transform_3, window_bounds = array<i64: 16, 4096>}]} {
    %c0 = arith.constant 0 : index
    %c0_0 = arith.constant 0 : index
    %0 = vector.load %arg1[%c0, %c0_0] : memref<16x16xf32, #tpu.memory_space<vmem>>, vector<16x16xf32>
    %c0_1 = arith.constant 0 : index
    %c0_2 = arith.constant 0 : index
    %1 = vector.load %arg2[%c0_1, %c0_2] : memref<16x4096xf32, #tpu.memory_space<vmem>>, vector<16x4096xf32>
    %cst = arith.constant dense<0.000000e+00> : vector<16x4096xf32>
    %2 = tpu.matmul %0, %1, %cst {dimension_numbers = #tpu.dot_dimension_numbers<[1], [0], [0], [1], [0, 0, 1, 1], [], []>} : vector<16x16xf32>, vector<16x4096xf32>, vector<16x4096xf32> -> vector<16x4096xf32>
    %c0_3 = arith.constant 0 : index
    %c0_4 = arith.constant 0 : index
    %3 = vector.load %arg3[%c0_3, %c0_4] : memref<16x1xf32, #tpu.memory_space<vmem>>, vector<16x1xf32>
    %4 = vector.broadcast %3 : vector<16x1xf32> to vector<16x4096xf32>
    %5 = arith.addf %2, %4 : vector<16x4096xf32>
    %cst_5 = arith.constant 0.000000e+00 : f32
    %6 = vector.broadcast %cst_5 : f32 to vector<16x4096xf32>
    %7 = arith.maximumf %5, %6 : vector<16x4096xf32>
    %c0_6 = arith.constant 0 : index
    %c0_7 = arith.constant 0 : index
    %8 = vector.load %arg4[%c0_6, %c0_7] : memref<16x4096xf32, #tpu.memory_space<vmem>>, vector<16x4096xf32>
    tpu.vector_store %arg4[%c0_6, %c0_7], %7 {strides = array<i32>} : memref<16x4096xf32, #tpu.memory_space<vmem>>, vector<16x4096xf32>,
    return
  }
  func.func @transform_0(%arg0: i32) -> (i32, i32) {
    %c0_i32 = arith.constant 0 : i32
    %c0_i32_0 = arith.constant 0 : i32
    %c0_i32_1 = arith.constant 0 : i32
    return %c0_i32, %c0_i32_0 : i32, i32
  }
  func.func @transform_1(%arg0: i32) -> (i32, i32) {
    %c0_i32 = arith.constant 0 : i32
    %c0_i32_0 = arith.constant 0 : i32
    return %c0_i32, %arg0 : i32, i32
  }
  func.func @transform_2(%arg0: i32) -> (i32, i32) {
    %c0_i32 = arith.constant 0 : i32
    %c0_i32_0 = arith.constant 0 : i32
    %c0_i32_1 = arith.constant 0 : i32
    return %c0_i32, %c0_i32_0 : i32, i32
  }
  func.func @transform_3(%arg0: i32) -> (i32, i32) {
    %c0_i32 = arith.constant 0 : i32
    %c0_i32_0 = arith.constant 0 : i32
    return %c0_i32, %arg0 : i32, i32
  }
}

module attributes {stable_mosaic.version = 11 : i64} {
  func.func @_conv_mm_kernel(%arg0: i32, %arg1: memref<32x256xf32, #tpu.memory_space<vmem>>, %arg2: memref<256x1024xf32, #tpu.memory_space<vmem>>, %arg3: memref<32x1xf32, #tpu.memory_space<vmem>>, %arg4: memref<32x1024xf32, #tpu.memory_space<vmem>>) attributes {dimension_semantics = [#tpu.dimension_semantics<parallel>], iteration_bounds = array<i64: 2>, scalar_prefetch = 0 : i64, scratch_operands = 0 : i64, tpu.core_type = #tpu.core_type<tc>, window_params = [{pipeline_mode = #tpu.pipeline_mode<synchronous>, transform_indices = @transform_0, window_bounds = array<i64: 32, 256>}, {transform_indices = @transform_1, window_bounds = array<i64: 256, 1024>}, {pipeline_mode = #tpu.pipeline_mode<synchronous>, transform_indices = @transform_2, window_bounds = array<i64: 32, 1>}, {transform_indices = @transform_3, window_bounds = array<i64: 32, 1024>}]} {
    %c0 = arith.constant 0 : index
    %c0_0 = arith.constant 0 : index
    %0 = vector.load %arg1[%c0, %c0_0] : memref<32x256xf32, #tpu.memory_space<vmem>>, vector<32x256xf32>
    %c0_1 = arith.constant 0 : index
    %c0_2 = arith.constant 0 : index
    %1 = vector.load %arg2[%c0_1, %c0_2] : memref<256x1024xf32, #tpu.memory_space<vmem>>, vector<256x1024xf32>
    %cst = arith.constant dense<0.000000e+00> : vector<32x1024xf32>
    %2 = tpu.matmul %0, %1, %cst {dimension_numbers = #tpu.dot_dimension_numbers<[1], [0], [0], [1], [0, 0, 1, 1], [], []>} : vector<32x256xf32>, vector<256x1024xf32>, vector<32x1024xf32> -> vector<32x1024xf32>
    %c0_3 = arith.constant 0 : index
    %c0_4 = arith.constant 0 : index
    %3 = vector.load %arg3[%c0_3, %c0_4] : memref<32x1xf32, #tpu.memory_space<vmem>>, vector<32x1xf32>
    %4 = vector.broadcast %3 : vector<32x1xf32> to vector<32x1024xf32>
    %5 = arith.addf %2, %4 : vector<32x1024xf32>
    %cst_5 = arith.constant dense<0.000000e+00> : vector<32xf32>
    %6 = vector.multi_reduction <add>, %5, %cst_5 [1] : vector<32x1024xf32> to vector<32xf32>
    %7 = vector.shape_cast %6 : vector<32xf32> to vector<32x1xf32>
    %cst_6 = arith.constant dense<0.000000e+00> : vector<1xf32>
    %8 = vector.multi_reduction <add>, %7, %cst_6 [0] : vector<32x1xf32> to vector<1xf32>
    %9 = vector.shape_cast %8 : vector<1xf32> to vector<1x1xf32>
    %cst_7 = arith.constant 3.276800e+04 : f32
    %10 = vector.broadcast %cst_7 : f32 to vector<1x1xf32>
    %11 = arith.divf %9, %10 : vector<1x1xf32>
    %12 = vector.broadcast %11 : vector<1x1xf32> to vector<32x1024xf32>
    %13 = arith.subf %5, %12 : vector<32x1024xf32>
    %14 = arith.mulf %13, %13 : vector<32x1024xf32>
    %cst_8 = arith.constant dense<0.000000e+00> : vector<32xf32>
    %15 = vector.multi_reduction <add>, %14, %cst_8 [1] : vector<32x1024xf32> to vector<32xf32>
    %16 = vector.shape_cast %15 : vector<32xf32> to vector<32x1xf32>
    %cst_9 = arith.constant dense<0.000000e+00> : vector<1xf32>
    %17 = vector.multi_reduction <add>, %16, %cst_9 [0] : vector<32x1xf32> to vector<1xf32>
    %18 = vector.shape_cast %17 : vector<1xf32> to vector<1x1xf32>
    %cst_10 = arith.constant 3.276800e+04 : f32
    %19 = vector.broadcast %cst_10 : f32 to vector<1x1xf32>
    %20 = arith.divf %18, %19 : vector<1x1xf32>
    %cst_11 = arith.constant 9.99999974E-6 : f32
    %21 = vector.broadcast %cst_11 : f32 to vector<1x1xf32>
    %22 = arith.addf %20, %21 : vector<1x1xf32>
    %23 = math.rsqrt %22 : vector<1x1xf32>
    %24 = vector.broadcast %23 : vector<1x1xf32> to vector<32x1024xf32>
    %25 = arith.mulf %13, %24 : vector<32x1024xf32>
    %cst_12 = arith.constant 0.000000e+00 : f32
    %26 = vector.broadcast %cst_12 : f32 to vector<32x1024xf32>
    %27 = arith.maximumf %25, %26 : vector<32x1024xf32>
    %c0_13 = arith.constant 0 : index
    %c0_14 = arith.constant 0 : index
    %28 = vector.load %arg4[%c0_13, %c0_14] : memref<32x1024xf32, #tpu.memory_space<vmem>>, vector<32x1024xf32>
    tpu.vector_store %arg4[%c0_13, %c0_14], %27 {strides = array<i32>} : memref<32x1024xf32, #tpu.memory_space<vmem>>, vector<32x1024xf32>,
    return
  }
  func.func @transform_0(%arg0: i32) -> (i32, i32) {
    %c0_i32 = arith.constant 0 : i32
    %c0_i32_0 = arith.constant 0 : i32
    %c0_i32_1 = arith.constant 0 : i32
    return %c0_i32, %c0_i32_0 : i32, i32
  }
  func.func @transform_1(%arg0: i32) -> (i32, i32) {
    %c0_i32 = arith.constant 0 : i32
    %c0_i32_0 = arith.constant 0 : i32
    return %c0_i32, %arg0 : i32, i32
  }
  func.func @transform_2(%arg0: i32) -> (i32, i32) {
    %c0_i32 = arith.constant 0 : i32
    %c0_i32_0 = arith.constant 0 : i32
    %c0_i32_1 = arith.constant 0 : i32
    return %c0_i32, %c0_i32_0 : i32, i32
  }
  func.func @transform_3(%arg0: i32) -> (i32, i32) {
    %c0_i32 = arith.constant 0 : i32
    %c0_i32_0 = arith.constant 0 : i32
    return %c0_i32, %arg0 : i32, i32
  }
}

module attributes {stable_mosaic.version = 11 : i64} {
  func.func @_conv_mm_kernel(%arg0: i32, %arg1: memref<64x512xf32, #tpu.memory_space<vmem>>, %arg2: memref<512x256xf32, #tpu.memory_space<vmem>>, %arg3: memref<64x1xf32, #tpu.memory_space<vmem>>, %arg4: memref<64x256xf32, #tpu.memory_space<vmem>>) attributes {dimension_semantics = [#tpu.dimension_semantics<parallel>], iteration_bounds = array<i64: 2>, scalar_prefetch = 0 : i64, scratch_operands = 0 : i64, tpu.core_type = #tpu.core_type<tc>, window_params = [{pipeline_mode = #tpu.pipeline_mode<synchronous>, transform_indices = @transform_0, window_bounds = array<i64: 64, 512>}, {transform_indices = @transform_1, window_bounds = array<i64: 512, 256>}, {pipeline_mode = #tpu.pipeline_mode<synchronous>, transform_indices = @transform_2, window_bounds = array<i64: 64, 1>}, {transform_indices = @transform_3, window_bounds = array<i64: 64, 256>}]} {
    %c0 = arith.constant 0 : index
    %c0_0 = arith.constant 0 : index
    %0 = vector.load %arg1[%c0, %c0_0] : memref<64x512xf32, #tpu.memory_space<vmem>>, vector<64x512xf32>
    %c0_1 = arith.constant 0 : index
    %c0_2 = arith.constant 0 : index
    %1 = vector.load %arg2[%c0_1, %c0_2] : memref<512x256xf32, #tpu.memory_space<vmem>>, vector<512x256xf32>
    %cst = arith.constant dense<0.000000e+00> : vector<64x256xf32>
    %2 = tpu.matmul %0, %1, %cst {dimension_numbers = #tpu.dot_dimension_numbers<[1], [0], [0], [1], [0, 0, 1, 1], [], []>} : vector<64x512xf32>, vector<512x256xf32>, vector<64x256xf32> -> vector<64x256xf32>
    %c0_3 = arith.constant 0 : index
    %c0_4 = arith.constant 0 : index
    %3 = vector.load %arg3[%c0_3, %c0_4] : memref<64x1xf32, #tpu.memory_space<vmem>>, vector<64x1xf32>
    %4 = vector.broadcast %3 : vector<64x1xf32> to vector<64x256xf32>
    %5 = arith.addf %2, %4 : vector<64x256xf32>
    %cst_5 = arith.constant dense<0.000000e+00> : vector<64xf32>
    %6 = vector.multi_reduction <add>, %5, %cst_5 [1] : vector<64x256xf32> to vector<64xf32>
    %7 = vector.shape_cast %6 : vector<64xf32> to vector<64x1xf32>
    %cst_6 = arith.constant dense<0.000000e+00> : vector<1xf32>
    %8 = vector.multi_reduction <add>, %7, %cst_6 [0] : vector<64x1xf32> to vector<1xf32>
    %9 = vector.shape_cast %8 : vector<1xf32> to vector<1x1xf32>
    %cst_7 = arith.constant 1.638400e+04 : f32
    %10 = vector.broadcast %cst_7 : f32 to vector<1x1xf32>
    %11 = arith.divf %9, %10 : vector<1x1xf32>
    %12 = vector.broadcast %11 : vector<1x1xf32> to vector<64x256xf32>
    %13 = arith.subf %5, %12 : vector<64x256xf32>
    %14 = arith.mulf %13, %13 : vector<64x256xf32>
    %cst_8 = arith.constant dense<0.000000e+00> : vector<64xf32>
    %15 = vector.multi_reduction <add>, %14, %cst_8 [1] : vector<64x256xf32> to vector<64xf32>
    %16 = vector.shape_cast %15 : vector<64xf32> to vector<64x1xf32>
    %cst_9 = arith.constant dense<0.000000e+00> : vector<1xf32>
    %17 = vector.multi_reduction <add>, %16, %cst_9 [0] : vector<64x1xf32> to vector<1xf32>
    %18 = vector.shape_cast %17 : vector<1xf32> to vector<1x1xf32>
    %cst_10 = arith.constant 1.638400e+04 : f32
    %19 = vector.broadcast %cst_10 : f32 to vector<1x1xf32>
    %20 = arith.divf %18, %19 : vector<1x1xf32>
    %cst_11 = arith.constant 9.99999974E-6 : f32
    %21 = vector.broadcast %cst_11 : f32 to vector<1x1xf32>
    %22 = arith.addf %20, %21 : vector<1x1xf32>
    %23 = math.rsqrt %22 : vector<1x1xf32>
    %24 = vector.broadcast %23 : vector<1x1xf32> to vector<64x256xf32>
    %25 = arith.mulf %13, %24 : vector<64x256xf32>
    %cst_12 = arith.constant 0.000000e+00 : f32
    %26 = vector.broadcast %cst_12 : f32 to vector<64x256xf32>
    %27 = arith.maximumf %25, %26 : vector<64x256xf32>
    %c0_13 = arith.constant 0 : index
    %c0_14 = arith.constant 0 : index
    %28 = vector.load %arg4[%c0_13, %c0_14] : memref<64x256xf32, #tpu.memory_space<vmem>>, vector<64x256xf32>
    tpu.vector_store %arg4[%c0_13, %c0_14], %27 {strides = array<i32>} : memref<64x256xf32, #tpu.memory_space<vmem>>, vector<64x256xf32>,
    return
  }
  func.func @transform_0(%arg0: i32) -> (i32, i32) {
    %c0_i32 = arith.constant 0 : i32
    %c0_i32_0 = arith.constant 0 : i32
    %c0_i32_1 = arith.constant 0 : i32
    return %c0_i32, %c0_i32_0 : i32, i32
  }
  func.func @transform_1(%arg0: i32) -> (i32, i32) {
    %c0_i32 = arith.constant 0 : i32
    %c0_i32_0 = arith.constant 0 : i32
    return %c0_i32, %arg0 : i32, i32
  }
  func.func @transform_2(%arg0: i32) -> (i32, i32) {
    %c0_i32 = arith.constant 0 : i32
    %c0_i32_0 = arith.constant 0 : i32
    %c0_i32_1 = arith.constant 0 : i32
    return %c0_i32, %c0_i32_0 : i32, i32
  }
  func.func @transform_3(%arg0: i32) -> (i32, i32) {
    %c0_i32 = arith.constant 0 : i32
    %c0_i32_0 = arith.constant 0 : i32
    return %c0_i32, %arg0 : i32, i32
  }
}

module attributes {stable_mosaic.version = 11 : i64} {
  func.func @_conv_mm_kernel(%arg0: i32, %arg1: memref<1x1024xf32, #tpu.memory_space<vmem>>, %arg2: memref<1024x128xf32, #tpu.memory_space<vmem>>, %arg3: memref<1x1xf32, #tpu.memory_space<vmem>>, %arg4: memref<1x128xf32, #tpu.memory_space<vmem>>) attributes {dimension_semantics = [#tpu.dimension_semantics<parallel>], iteration_bounds = array<i64: 1>, scalar_prefetch = 0 : i64, scratch_operands = 0 : i64, tpu.core_type = #tpu.core_type<tc>, window_params = [{pipeline_mode = #tpu.pipeline_mode<synchronous>, transform_indices = @transform_0, window_bounds = array<i64: 1, 1024>}, {transform_indices = @transform_1, window_bounds = array<i64: 1024, 128>}, {pipeline_mode = #tpu.pipeline_mode<synchronous>, transform_indices = @transform_2, window_bounds = array<i64: 1, 1>}, {transform_indices = @transform_3, window_bounds = array<i64: 1, 128>}]} {
    %c0 = arith.constant 0 : index
    %c0_0 = arith.constant 0 : index
    %0 = vector.load %arg1[%c0, %c0_0] : memref<1x1024xf32, #tpu.memory_space<vmem>>, vector<1x1024xf32>
    %c0_1 = arith.constant 0 : index
    %c0_2 = arith.constant 0 : index
    %1 = vector.load %arg2[%c0_1, %c0_2] : memref<1024x128xf32, #tpu.memory_space<vmem>>, vector<1024x128xf32>
    %cst = arith.constant dense<0.000000e+00> : vector<1x128xf32>
    %2 = tpu.matmul %0, %1, %cst {dimension_numbers = #tpu.dot_dimension_numbers<[1], [0], [0], [1], [0, 0, 1, 1], [], []>} : vector<1x1024xf32>, vector<1024x128xf32>, vector<1x128xf32> -> vector<1x128xf32>
    %c0_3 = arith.constant 0 : index
    %c0_4 = arith.constant 0 : index
    %3 = vector.load %arg3[%c0_3, %c0_4] : memref<1x1xf32, #tpu.memory_space<vmem>>, vector<1x1xf32>
    %4 = vector.broadcast %3 : vector<1x1xf32> to vector<1x128xf32>
    %5 = arith.addf %2, %4 : vector<1x128xf32>
    %c0_5 = arith.constant 0 : index
    %c0_6 = arith.constant 0 : index
    %6 = vector.load %arg4[%c0_5, %c0_6] : memref<1x128xf32, #tpu.memory_space<vmem>>, vector<1x128xf32>
    tpu.vector_store %arg4[%c0_5, %c0_6], %5 {strides = array<i32>} : memref<1x128xf32, #tpu.memory_space<vmem>>, vector<1x128xf32>,
    return
  }
  func.func @transform_0(%arg0: i32) -> (i32, i32) {
    %c0_i32 = arith.constant 0 : i32
    %c0_i32_0 = arith.constant 0 : i32
    %c0_i32_1 = arith.constant 0 : i32
    return %c0_i32, %c0_i32_0 : i32, i32
  }
  func.func @transform_1(%arg0: i32) -> (i32, i32) {
    %c0_i32 = arith.constant 0 : i32
    %c0_i32_0 = arith.constant 0 : i32
    return %c0_i32, %arg0 : i32, i32
  }
  func.func @transform_2(%arg0: i32) -> (i32, i32) {
    %c0_i32 = arith.constant 0 : i32
    %c0_i32_0 = arith.constant 0 : i32
    %c0_i32_1 = arith.constant 0 : i32
    return %c0_i32, %c0_i32_0 : i32, i32
  }
  func.func @transform_3(%arg0: i32) -> (i32, i32) {
    %c0_i32 = arith.constant 0 : i32
    %c0_i32_0 = arith.constant 0 : i32
    return %c0_i32, %arg0 : i32, i32
  }
}

</mosaic_0001>

<bundles_post_ra>
// kernel: discriminator_forward.4
= control target key start
LH: loop header
LB: loop body
LE: loop exit
PB: predicated region body
PF: predicated region fallthrough
CT: control target
= control target key end

     0   :  { %s1623_s12 = smov 0   ;;  %s1625_s13 = smov 0   ;;  %s2293_s0 = inlined_call_operand.vmem [shape: f32[16,16], index: 0, kind: input, shape index: {}]   ;;  %s2294_s1 = inlined_call_operand.vmem [shape: f32[16,8192], index: 1, kind: input, shape index: {}]   ;;  %s2295_s2 = inlined_call_operand.vmem [shape: f32[16,1], index: 2, kind: input, shape index: {}]   ;;  %s2296_s3 = inlined_call_operand.vmem [shape: f32[16,8192], index: 3, kind: output, shape index: {}]  }
   0x1   :  { %s1627_s14 = smov 0  }
   0x2 LB: > { %s1471_s15 = sadd.s32 4294967295, %s1600_s14   ;;  %s1640_s16 = sadd.s32 1, %s1600_s14   ;;  %s1600_s14 = sphi %s1627_s14, %s2300_s14   ;;  %s1596_s13 = sphi %s1625_s13, %s2299_s13   ;;  %s1592_s12 = sphi %s1623_s12, %s2298_s12  }
   0x3   : > { %s38_s17 = ssub.s32 %s1600_s14, %s1640_s16  ;;  %s41_s18 = sadd.s32 1, %s1596_s13 }
   0x4   : > { %p39_p0 = scmp.eq.s32.totalorder %s38_s17, 0  ;;  %p48_p1 = scmp.ne.s32.totalorder %s1596_s13, %s1592_s12 }
   0x5   : > { %p49_p2 = scmp.eq.s32.totalorder %s1600_s14, 0  ;;  %p99_p3 = scmp.eq.s32.totalorder %s1471_s15, 1 }
   0x6   : > { %s1651_s19 = scalar_select %p39_p0, %s1596_s13, %s41_s18  }
   0x7   : > { %p50_p4 = por %p49_p2, %p48_p1  ;;  %p1653_p5 = por %p99_p3, %p48_p1 }
   0x8   : > { %p1474_p6 = scmp.ge.s32.totalorder %s1600_s14, 2 }
   0xa   : > { %127 = sbr.rel (%p1474_p6) target bundleno = 83 (0x53), region = 24 }
   0xf   : > { %130 = sbr.rel (!%p50_p4) target bundleno = 83 (0x53), region = 28  ;;  %s132_s21 = sand.u32 (%p50_p4), 1, %s1596_s13  }
  0x10   : > { %s1550_s22 = sshll.u32 (%p50_p4), %s1600_s14, 8  ;;  %s1475_s23 = sshll.u32 (%p50_p4), %s132_s21, 9 }
  0x11   : > { %s1663_s26 = scalar_lea.vmem (%p50_p4), %s2294_s1, %s1550_s22  ;;  %s1668_s27 = scalar_lea.vmem (%p50_p4), [#allocation2], %s1475_s23 }
  0x12   : > { %v150_v0 = vld [vmem:[%s1663_s26] sm:$0xff] (%p50_p4)  ;;  %v152_v1 = vld [vmem:[%s1663_s26 + $0x8] sm:$0xff] (%p50_p4)  ;;  %v154_v2 = vld [vmem:[%s1663_s26 + $0x10] sm:$0xff] (%p50_p4) }
  0x13   : > { %151 = vst [vmem:[%s1668_s27] sm:$0xff] (%p50_p4), %v150_v0  ;;  %v156_v3 = vld [vmem:[%s1663_s26 + $0x18] sm:$0xff] (%p50_p4)  ;;  %v158_v4 = vld [vmem:[%s1663_s26 + $0x20] sm:$0xff] (%p50_p4)  ;;  %v160_v5 = vld [vmem:[%s1663_s26 + $0x28] sm:$0xff] (%p50_p4) }
  0x14   : > { %153 = vst [vmem:[%s1668_s27 + $0x8] sm:$0xff] %v152_v1  ;;  %v162_v6 = vld [vmem:[%s1663_s26 + $0x30] sm:$0xff]  ;;  %v164_v7 = vld [vmem:[%s1663_s26 + $0x38] sm:$0xff]  ;;  %v166_v8 = vld [vmem:[%s1663_s26 + $0x40] sm:$0xff] }
  0x15   : > { %155 = vst [vmem:[%s1668_s27 + $0x10] sm:$0xff] %v154_v2  ;;  %v168_v9 = vld [vmem:[%s1663_s26 + $0x48] sm:$0xff]  ;;  %v170_v10 = vld [vmem:[%s1663_s26 + $0x50] sm:$0xff]  ;;  %v172_v11 = vld [vmem:[%s1663_s26 + $0x58] sm:$0xff] }
  0x16   : > { %157 = vst [vmem:[%s1668_s27 + $0x18] sm:$0xff] %v156_v3  ;;  %v174_v12 = vld [vmem:[%s1663_s26 + $0x60] sm:$0xff]  ;;  %v176_v13 = vld [vmem:[%s1663_s26 + $0x68] sm:$0xff]  ;;  %v178_v14 = vld [vmem:[%s1663_s26 + $0x70] sm:$0xff] }
  0x17   : > { %159 = vst [vmem:[%s1668_s27 + $0x20] sm:$0xff] %v158_v4  ;;  %v180_v15 = vld [vmem:[%s1663_s26 + $0x78] sm:$0xff]  ;;  %v182_v16 = vld [vmem:[%s1663_s26 + $0x80] sm:$0xff]  ;;  %v184_v17 = vld [vmem:[%s1663_s26 + $0x88] sm:$0xff] }
  0x18   : > { %161 = vst [vmem:[%s1668_s27 + $0x28] sm:$0xff] %v160_v5  ;;  %v186_v18 = vld [vmem:[%s1663_s26 + $0x90] sm:$0xff]  ;;  %v188_v19 = vld [vmem:[%s1663_s26 + $0x98] sm:$0xff]  ;;  %v190_v20 = vld [vmem:[%s1663_s26 + $0xa0] sm:$0xff] }
  0x19   : > { %163 = vst [vmem:[%s1668_s27 + $0x30] sm:$0xff] %v162_v6  ;;  %v192_v21 = vld [vmem:[%s1663_s26 + $0xa8] sm:$0xff]  ;;  %v194_v22 = vld [vmem:[%s1663_s26 + $0xb0] sm:$0xff]  ;;  %v196_v23 = vld [vmem:[%s1663_s26 + $0xb8] sm:$0xff] }
  0x1a   : > { %165 = vst [vmem:[%s1668_s27 + $0x38] sm:$0xff] %v164_v7  ;;  %v198_v24 = vld [vmem:[%s1663_s26 + $0xc0] sm:$0xff]  ;;  %v200_v25 = vld [vmem:[%s1663_s26 + $0xc8] sm:$0xff]  ;;  %v202_v26 = vld [vmem:[%s1663_s26 + $0xd0] sm:$0xff] }
  0x1b   : > { %167 = vst [vmem:[%s1668_s27 + $0x40] sm:$0xff] %v166_v8  ;;  %v204_v27 = vld [vmem:[%s1663_s26 + $0xd8] sm:$0xff]  ;;  %v206_v28 = vld [vmem:[%s1663_s26 + $0xe0] sm:$0xff]  ;;  %v208_v29 = vld [vmem:[%s1663_s26 + $0xe8] sm:$0xff] }
  0x1c   : > { %169 = vst [vmem:[%s1668_s27 + $0x48] sm:$0xff] %v168_v9  ;;  %v210_v30 = vld [vmem:[%s1663_s26 + $0xf0] sm:$0xff]  ;;  %v212_v31 = vld [vmem:[%s1663_s26 + $0xf8] sm:$0xff]  ;;  %v214_v32 = vld [vmem:[%s1663_s26 + $0x200] sm:$0xff] }
  0x1d   : > { %171 = vst [vmem:[%s1668_s27 + $0x50] sm:$0xff] %v170_v10  ;;  %v216_v33 = vld [vmem:[%s1663_s26 + $0x208] sm:$0xff]  ;;  %v218_v34 = vld [vmem:[%s1663_s26 + $0x210] sm:$0xff]  ;;  %v220_v35 = vld [vmem:[%s1663_s26 + $0x218] sm:$0xff] }
  0x1e   : > { %173 = vst [vmem:[%s1668_s27 + $0x58] sm:$0xff] %v172_v11  ;;  %v222_v36 = vld [vmem:[%s1663_s26 + $0x220] sm:$0xff]  ;;  %v224_v37 = vld [vmem:[%s1663_s26 + $0x228] sm:$0xff]  ;;  %v226_v38 = vld [vmem:[%s1663_s26 + $0x230] sm:$0xff] }
  0x1f   : > { %175 = vst [vmem:[%s1668_s27 + $0x60] sm:$0xff] %v174_v12  ;;  %v228_v39 = vld [vmem:[%s1663_s26 + $0x238] sm:$0xff]  ;;  %v230_v40 = vld [vmem:[%s1663_s26 + $0x240] sm:$0xff]  ;;  %v232_v41 = vld [vmem:[%s1663_s26 + $0x248] sm:$0xff] }
  0x20   : > { %177 = vst [vmem:[%s1668_s27 + $0x68] sm:$0xff] %v176_v13  ;;  %v234_v42 = vld [vmem:[%s1663_s26 + $0x250] sm:$0xff]  ;;  %v236_v43 = vld [vmem:[%s1663_s26 + $0x258] sm:$0xff]  ;;  %v238_v44 = vld [vmem:[%s1663_s26 + $0x260] sm:$0xff] }
  0x21   : > { %179 = vst [vmem:[%s1668_s27 + $0x70] sm:$0xff] %v178_v14  ;;  %v240_v45 = vld [vmem:[%s1663_s26 + $0x268] sm:$0xff]  ;;  %v242_v46 = vld [vmem:[%s1663_s26 + $0x270] sm:$0xff]  ;;  %v244_v47 = vld [vmem:[%s1663_s26 + $0x278] sm:$0xff] }
  0x22   : > { %181 = vst [vmem:[%s1668_s27 + $0x78] sm:$0xff] %v180_v15  ;;  %v246_v48 = vld [vmem:[%s1663_s26 + $0x280] sm:$0xff]  ;;  %v248_v49 = vld [vmem:[%s1663_s26 + $0x288] sm:$0xff]  ;;  %v250_v50 = vld [vmem:[%s1663_s26 + $0x290] sm:$0xff] }
  0x23   : > { %183 = vst [vmem:[%s1668_s27 + $0x80] sm:$0xff] %v182_v16  ;;  %v252_v51 = vld [vmem:[%s1663_s26 + $0x298] sm:$0xff]  ;;  %v254_v52 = vld [vmem:[%s1663_s26 + $0x2a0] sm:$0xff]  ;;  %v256_v53 = vld [vmem:[%s1663_s26 + $0x2a8] sm:$0xff] }
  0x24   : > { %185 = vst [vmem:[%s1668_s27 + $0x88] sm:$0xff] %v184_v17  ;;  %v258_v54 = vld [vmem:[%s1663_s26 + $0x2b0] sm:$0xff]  ;;  %v260_v55 = vld [vmem:[%s1663_s26 + $0x2b8] sm:$0xff]  ;;  %v262_v56 = vld [vmem:[%s1663_s26 + $0x2c0] sm:$0xff] }
  0x25   : > { %187 = vst [vmem:[%s1668_s27 + $0x90] sm:$0xff] %v186_v18  ;;  %v264_v57 = vld [vmem:[%s1663_s26 + $0x2c8] sm:$0xff]  ;;  %v266_v58 = vld [vmem:[%s1663_s26 + $0x2d0] sm:$0xff]  ;;  %v268_v59 = vld [vmem:[%s1663_s26 + $0x2d8] sm:$0xff] }
  0x26   : > { %189 = vst [vmem:[%s1668_s27 + $0x98] sm:$0xff] %v188_v19  ;;  %v270_v60 = vld [vmem:[%s1663_s26 + $0x2e0] sm:$0xff]  ;;  %v272_v61 = vld [vmem:[%s1663_s26 + $0x2e8] sm:$0xff]  ;;  %v274_v62 = vld [vmem:[%s1663_s26 + $0x2f0] sm:$0xff] }
  0x27   : > { %191 = vst [vmem:[%s1668_s27 + $0xa0] sm:$0xff] %v190_v20  ;;  %v276_v63 = vld [vmem:[%s1663_s26 + $0x2f8] sm:$0xff] }
  0x28   : > { %193 = vst [vmem:[%s1668_s27 + $0xa8] sm:$0xff] %v192_v21 }
  0x29   : > { %195 = vst [vmem:[%s1668_s27 + $0xb0] sm:$0xff] %v194_v22 }
  0x2a   : > { %197 = vst [vmem:[%s1668_s27 + $0xb8] sm:$0xff] %v196_v23 }
  0x2b   : > { %199 = vst [vmem:[%s1668_s27 + $0xc0] sm:$0xff] %v198_v24 }
  0x2c   : > { %201 = vst [vmem:[%s1668_s27 + $0xc8] sm:$0xff] %v200_v25 }
  0x2d   : > { %203 = vst [vmem:[%s1668_s27 + $0xd0] sm:$0xff] %v202_v26 }
  0x2e   : > { %205 = vst [vmem:[%s1668_s27 + $0xd8] sm:$0xff] %v204_v27 }
  0x2f   : > { %207 = vst [vmem:[%s1668_s27 + $0xe0] sm:$0xff] %v206_v28 }
  0x30   : > { %209 = vst [vmem:[%s1668_s27 + $0xe8] sm:$0xff] %v208_v29 }
  0x31   : > { %211 = vst [vmem:[%s1668_s27 + $0xf0] sm:$0xff] %v210_v30 }
  0x32   : > { %213 = vst [vmem:[%s1668_s27 + $0xf8] sm:$0xff] %v212_v31 }
  0x33   : > { %215 = vst [vmem:[%s1668_s27 + $0x100] sm:$0xff] %v214_v32 }
  0x34   : > { %217 = vst [vmem:[%s1668_s27 + $0x108] sm:$0xff] %v216_v33 }
  0x35   : > { %219 = vst [vmem:[%s1668_s27 + $0x110] sm:$0xff] %v218_v34 }
  0x36   : > { %221 = vst [vmem:[%s1668_s27 + $0x118] sm:$0xff] %v220_v35 }
  0x37   : > { %223 = vst [vmem:[%s1668_s27 + $0x120] sm:$0xff] %v222_v36 }
  0x38   : > { %225 = vst [vmem:[%s1668_s27 + $0x128] sm:$0xff] %v224_v37 }
  0x39   : > { %227 = vst [vmem:[%s1668_s27 + $0x130] sm:$0xff] %v226_v38 }
  0x3a   : > { %229 = vst [vmem:[%s1668_s27 + $0x138] sm:$0xff] %v228_v39 }
  0x3b   : > { %231 = vst [vmem:[%s1668_s27 + $0x140] sm:$0xff] %v230_v40 }
  0x3c   : > { %233 = vst [vmem:[%s1668_s27 + $0x148] sm:$0xff] %v232_v41 }
  0x3d   : > { %235 = vst [vmem:[%s1668_s27 + $0x150] sm:$0xff] %v234_v42 }
  0x3e   : > { %237 = vst [vmem:[%s1668_s27 + $0x158] sm:$0xff] %v236_v43 }
  0x3f   : > { %239 = vst [vmem:[%s1668_s27 + $0x160] sm:$0xff] %v238_v44 }
  0x40   : > { %241 = vst [vmem:[%s1668_s27 + $0x168] sm:$0xff] %v240_v45 }
  0x41   : > { %243 = vst [vmem:[%s1668_s27 + $0x170] sm:$0xff] %v242_v46 }
  0x42   : > { %245 = vst [vmem:[%s1668_s27 + $0x178] sm:$0xff] %v244_v47 }
  0x43   : > { %247 = vst [vmem:[%s1668_s27 + $0x180] sm:$0xff] %v246_v48 }
  0x44   : > { %249 = vst [vmem:[%s1668_s27 + $0x188] sm:$0xff] %v248_v49 }
  0x45   : > { %251 = vst [vmem:[%s1668_s27 + $0x190] sm:$0xff] %v250_v50 }
  0x46   : > { %253 = vst [vmem:[%s1668_s27 + $0x198] sm:$0xff] %v252_v51 }
  0x47   : > { %255 = vst [vmem:[%s1668_s27 + $0x1a0] sm:$0xff] %v254_v52 }
  0x48   : > { %257 = vst [vmem:[%s1668_s27 + $0x1a8] sm:$0xff] %v256_v53 }
  0x49   : > { %259 = vst [vmem:[%s1668_s27 + $0x1b0] sm:$0xff] %v258_v54 }
  0x4a   : > { %261 = vst [vmem:[%s1668_s27 + $0x1b8] sm:$0xff] %v260_v55 }
  0x4b   : > { %263 = vst [vmem:[%s1668_s27 + $0x1c0] sm:$0xff] %v262_v56 }
  0x4c   : > { %265 = vst [vmem:[%s1668_s27 + $0x1c8] sm:$0xff] %v264_v57 }
  0x4d   : > { %267 = vst [vmem:[%s1668_s27 + $0x1d0] sm:$0xff] %v266_v58 }
  0x4e   : > { %269 = vst [vmem:[%s1668_s27 + $0x1d8] sm:$0xff] %v268_v59 }
  0x4f   : > { %271 = vst [vmem:[%s1668_s27 + $0x1e0] sm:$0xff] %v270_v60 }
  0x50   : > { %273 = vst [vmem:[%s1668_s27 + $0x1e8] sm:$0xff] %v272_v61 }
  0x51   : > { %275 = vst [vmem:[%s1668_s27 + $0x1f0] sm:$0xff] %v274_v62 }
  0x52   : > { %277 = vst [vmem:[%s1668_s27 + $0x1f8] sm:$0xff] %v276_v63 }
  0x53 PF: > { %p1478_p7 = scmp.ge.s32.totalorder %s1600_s14, 1  ;;  %p282_p8 = scmp.lt.s32.totalorder %s1600_s14, 3 }
  0x55   : > { %p283_p9 = pnand %p1478_p7, %p282_p8 }
  0x56   : > { %s289_s28 = sand.u32 (!%p283_p9), 1, %s1592_s12  }
  0x57   : > { %286 = sbr.rel (%p283_p9) target bundleno = 399 (0x18f), region = 51  ;;  %s1801_s4 = sshll.u32 (!%p283_p9), %s289_s28, 9 }
  0x58   : > { %s1804_s5 = scalar_lea.vmem (!%p283_p9), [#allocation2], %s1801_s4  ;;  %s2016_s12 = scalar_lea.vmem (!%p283_p9), [#allocation3], %s1801_s4 }
  0x5c   : > { %v379_v0 = vld [vmem:[%s2295_s2] sm:$0xff]  ;;  %v1602_v1 = vmov 0   ;;  %v348_v3 = vld [vmem:[%s1804_s5 + $0x108] sm:$0xff]  ;;  %v349_v4 = vld [vmem:[%s1804_s5 + $0x110] sm:$0xff]  ;;  %vm391_vm0 = vcmask 130048   ;;  %s1551_s17 = sshll.u32 (%p1653_p5), %s1471_s15, 8 }
  0x5d   : > { %1577 = vset.pattern.permute.xlu0 %v1602_v1  ;;  %v347_v2 = vld [vmem:[%s1804_s5 + $0x100] sm:$0xff]  ;;  %435 = vmatpush.msra.mxu1 %v348_v3  ;;  %v350_v5 = vld [vmem:[%s1804_s5 + $0x118] sm:$0xff]  ;;  %v316_v7 = vld [vmem:[%s1804_s5 + $0x8] sm:$0xff]  ;;  %s2155_s20 = scalar_lea.vmem (%p1653_p5), %s2296_s3, %s1551_s17 }
  0x5e   : > { %383 = vperm.xlu0 %1577, %v379_v0   ;;  %412 = vmatpush.msra.mxu0 %v347_v2  ;;  %v315_v6 = vld [vmem:[%s1804_s5] sm:$0xff]  ;;  %v317_v8 = vld [vmem:[%s1804_s5 + $0x10] sm:$0xff]  ;;  %v318_v9 = vld [vmem:[%s1804_s5 + $0x18] sm:$0xff] }
  0x5f   : > { %458 = vmatpush.msra.mxu2 %v349_v4  ;;  %481 = vmatpush.msra.mxu3 %v350_v5  ;;  %v1817_v10 = vld [vmem:[%s2293_s0] sm:$0xff]  ;;  %v353_v11 = vld [vmem:[%s1804_s5 + $0x130] sm:$0xff]  ;;  %v354_v12 = vld [vmem:[%s1804_s5 + $0x138] sm:$0xff] }
  0x60   : > { %413 = vmatpush.msra.mxu0 %v315_v6  ;;  %436 = vmatpush.msra.mxu1 %v316_v7  ;;  %v351_v13 = vld [vmem:[%s1804_s5 + $0x120] sm:$0xff]  ;;  %v352_v14 = vld [vmem:[%s1804_s5 + $0x128] sm:$0xff]  ;;  %v321_v15 = vld [vmem:[%s1804_s5 + $0x30] sm:$0xff] }
  0x61   : > { %459 = vmatpush.msra.mxu2 %v317_v8  ;;  %482 = vmatpush.msra.mxu3 %v318_v9  ;;  %v322_v16 = vld [vmem:[%s1804_s5 + $0x38] sm:$0xff]  ;;  %v319_v17 = vld [vmem:[%s1804_s5 + $0x20] sm:$0xff]  ;;  %v320_v18 = vld [vmem:[%s1804_s5 + $0x28] sm:$0xff] }
  0x62   : > { %1481 = vmatmul.msk.f32.vlgmr.msra.gmra.mxu0 %vm391_vm0, %v1817_v10  ;;  %1483 = vmatmul.msk.f32.vlgmr.msra.gmra.mxu1 %vm391_vm0, %v1817_v10  ;;  %v357_v19 = vld [vmem:[%s1804_s5 + $0x150] sm:$0xff]  ;;  %v358_v20 = vld [vmem:[%s1804_s5 + $0x158] sm:$0xff]  ;;  %v355_v21 = vld [vmem:[%s1804_s5 + $0x140] sm:$0xff] }
  0x63   : > { %1485 = vmatmul.msk.f32.vlgmr.msra.gmra.mxu2 %vm391_vm0, %v1817_v10  ;;  %1487 = vmatmul.msk.f32.vlgmr.msra.gmra.mxu3 %vm391_vm0, %v1817_v10  ;;  %v356_v22 = vld [vmem:[%s1804_s5 + $0x148] sm:$0xff]  ;;  %v325_v24 = vld [vmem:[%s1804_s5 + $0x50] sm:$0xff]  ;;  %v326_v25 = vld [vmem:[%s1804_s5 + $0x58] sm:$0xff] }
  0x64   : > { %550 = vmatpush.msrb.mxu2 %v353_v11  ;;  %573 = vmatpush.msrb.mxu3 %v354_v12  ;;  %v1842_v23 = vld [vmem:[%s2293_s0 + $0x8] sm:$0xff]  ;;  %v323_v27 = vld [vmem:[%s1804_s5 + $0x40] sm:$0xff]  ;;  %v361_v29 = vld [vmem:[%s1804_s5 + $0x170] sm:$0xff] }
  0x65   : > { %504 = vmatpush.msrb.mxu0 %v351_v13  ;;  %527 = vmatpush.msrb.mxu1 %v352_v14  ;;  %v380_v26 = vld [vmem:[%s2295_s2 + $0x8] sm:$0xff]  ;;  %v362_v30 = vld [vmem:[%s1804_s5 + $0x178] sm:$0xff]  ;;  %v359_v31 = vld [vmem:[%s1804_s5 + $0x160] sm:$0xff] }
  0x66   : > { %551 = vmatpush.msrb.mxu2 %v321_v15  ;;  %574 = vmatpush.msrb.mxu3 %v322_v16  ;;  %v324_v28 = vld [vmem:[%s1804_s5 + $0x48] sm:$0xff]  ;;  %v329_v33 = vld [vmem:[%s1804_s5 + $0x70] sm:$0xff]  ;;  %v330_v34 = vld [vmem:[%s1804_s5 + $0x78] sm:$0xff] }
  0x67   : > { %505 = vmatpush.msrb.mxu0 %v319_v17  ;;  %528 = vmatpush.msrb.mxu1 %v320_v18  ;;  %v360_v32 = vld [vmem:[%s1804_s5 + $0x168] sm:$0xff]  ;;  %v327_v35 = vld [vmem:[%s1804_s5 + $0x60] sm:$0xff]  ;;  %v365_v37 = vld [vmem:[%s1804_s5 + $0x190] sm:$0xff] }
  0x68   : > { %642 = vmatpush.msra.mxu2 %v357_v19  ;;  %665 = vmatpush.msra.mxu3 %v358_v20  ;;  %v328_v36 = vld [vmem:[%s1804_s5 + $0x68] sm:$0xff]  ;;  %v366_v38 = vld [vmem:[%s1804_s5 + $0x198] sm:$0xff]  ;;  %v363_v39 = vld [vmem:[%s1804_s5 + $0x180] sm:$0xff] }
  0x69   : > { %596 = vmatpush.msra.mxu0 %v355_v21  ;;  %619 = vmatpush.msra.mxu1 %v356_v22  ;;  %v364_v40 = vld [vmem:[%s1804_s5 + $0x188] sm:$0xff]  ;;  %v333_v41 = vld [vmem:[%s1804_s5 + $0x90] sm:$0xff]  ;;  %v334_v42 = vld [vmem:[%s1804_s5 + $0x98] sm:$0xff] }
  0x6a   : > { %1482 = vmatmul.msk.f32.gmra.mxu0 %vm391_vm0, %v1842_v23  ;;  %1484 = vmatmul.msk.f32.gmra.mxu1 %vm391_vm0, %v1842_v23  ;;  %v331_v43 = vld [vmem:[%s1804_s5 + $0x80] sm:$0xff]  ;;  %v332_v44 = vld [vmem:[%s1804_s5 + $0x88] sm:$0xff]  ;;  %v369_v45 = vld [vmem:[%s1804_s5 + $0x1b0] sm:$0xff] }
  0x6b   : > { %1486 = vmatmul.msk.f32.gmra.mxu2 %vm391_vm0, %v1842_v23  ;;  %1488 = vmatmul.msk.f32.gmra.mxu3 %vm391_vm0, %v1842_v23  ;;  %v370_v46 = vld [vmem:[%s1804_s5 + $0x1b8] sm:$0xff]  ;;  %v367_v47 = vld [vmem:[%s1804_s5 + $0x1a0] sm:$0xff]  ;;  %v368_v48 = vld [vmem:[%s1804_s5 + $0x1a8] sm:$0xff] }
  0x6c   : > { %643 = vmatpush.msra.mxu2 %v325_v24  ;;  %666 = vmatpush.msra.mxu3 %v326_v25  ;;  %v337_v49 = vld [vmem:[%s1804_s5 + $0xb0] sm:$0xff]  ;;  %v338_v50 = vld [vmem:[%s1804_s5 + $0xb8] sm:$0xff]  ;;  %v335_v51 = vld [vmem:[%s1804_s5 + $0xa0] sm:$0xff] }
  0x6d   : > { %388 = vperm.xlu0 %1577, %v380_v26   ;;  %597 = vmatpush.msra.mxu0 %v323_v27  ;;  %v336_v52 = vld [vmem:[%s1804_s5 + $0xa8] sm:$0xff]  ;;  %v373_v53 = vld [vmem:[%s1804_s5 + $0x1d0] sm:$0xff]  ;;  %v374_v54 = vld [vmem:[%s1804_s5 + $0x1d8] sm:$0xff] }
  0x6e   : > { %620 = vmatpush.msra.mxu1 %v324_v28  ;;  %v371_v55 = vld [vmem:[%s1804_s5 + $0x1c0] sm:$0xff]  ;;  %v372_v56 = vld [vmem:[%s1804_s5 + $0x1c8] sm:$0xff]  ;;  %v341_v57 = vld [vmem:[%s1804_s5 + $0xd0] sm:$0xff] }
  0x6f   : > { %v342_v58 = vld [vmem:[%s1804_s5 + $0xd8] sm:$0xff]  ;;  %v339_v59 = vld [vmem:[%s1804_s5 + $0xc0] sm:$0xff]  ;;  %v340_v60 = vld [vmem:[%s1804_s5 + $0xc8] sm:$0xff] }
  0x70   : > { %v377_v61 = vld [vmem:[%s1804_s5 + $0x1f0] sm:$0xff]  ;;  %v378_v62 = vld [vmem:[%s1804_s5 + $0x1f8] sm:$0xff]  ;;  %v375_v63 = vld [vmem:[%s1804_s5 + $0x1e0] sm:$0xff] }
  0x71   : > { %v376_v0 = vld [vmem:[%s1804_s5 + $0x1e8] sm:$0xff]  ;;  %v345_v1 = vld [vmem:[%s1804_s5 + $0xf0] sm:$0xff]  ;;  %v346_v2 = vld [vmem:[%s1804_s5 + $0xf8] sm:$0xff] }
  0x72   : > { %1489 = vmatmul.msk.f32.vlgmr.msrb.gmra.mxu0 %vm391_vm0, %v1817_v10  ;;  %1491 = vmatmul.msk.f32.vlgmr.msrb.gmra.mxu1 %vm391_vm0, %v1817_v10  ;;  %v343_v3 = vld [vmem:[%s1804_s5 + $0xe0] sm:$0xff]  ;;  %v344_v4 = vld [vmem:[%s1804_s5 + $0xe8] sm:$0xff] }
  0x73   : > { %1493 = vmatmul.msk.f32.vlgmr.msrb.gmra.mxu2 %vm391_vm0, %v1817_v10  ;;  %1495 = vmatmul.msk.f32.vlgmr.msrb.gmra.mxu3 %vm391_vm0, %v1817_v10 }
  0x74   : > { %734 = vmatpush.msrb.mxu2 %v361_v29  ;;  %757 = vmatpush.msrb.mxu3 %v362_v30 }
  0x75   : > { %688 = vmatpush.msrb.mxu0 %v359_v31  ;;  %711 = vmatpush.msrb.mxu1 %v360_v32 }
  0x76   : > { %735 = vmatpush.msrb.mxu2 %v329_v33  ;;  %758 = vmatpush.msrb.mxu3 %v330_v34 }
  0x77   : > { %689 = vmatpush.msrb.mxu0 %v327_v35  ;;  %712 = vmatpush.msrb.mxu1 %v328_v36 }
  0x7a   : > { %1490 = vmatmul.msk.f32.gmra.mxu0 %vm391_vm0, %v1842_v23  ;;  %1492 = vmatmul.msk.f32.gmra.mxu1 %vm391_vm0, %v1842_v23 }
  0x7b   : > { %1494 = vmatmul.msk.f32.gmra.mxu2 %vm391_vm0, %v1842_v23  ;;  %1496 = vmatmul.msk.f32.gmra.mxu3 %vm391_vm0, %v1842_v23 }
  0x82   : > { %1497 = vmatmul.msk.f32.vlgmr.msra.gmra.mxu0 %vm391_vm0, %v1817_v10  ;;  %1499 = vmatmul.msk.f32.vlgmr.msra.gmra.mxu1 %vm391_vm0, %v1817_v10 }
  0x83   : > { %1501 = vmatmul.msk.f32.vlgmr.msra.gmra.mxu2 %vm391_vm0, %v1817_v10  ;;  %1503 = vmatmul.msk.f32.vlgmr.msra.gmra.mxu3 %vm391_vm0, %v1817_v10 }
  0x84   : > { %826 = vmatpush.msra.mxu2 %v365_v37  ;;  %849 = vmatpush.msra.mxu3 %v366_v38 }
  0x85   : > { %780 = vmatpush.msra.mxu0 %v363_v39  ;;  %803 = vmatpush.msra.mxu1 %v364_v40 }
  0x86   : > { %827 = vmatpush.msra.mxu2 %v333_v41  ;;  %850 = vmatpush.msra.mxu3 %v334_v42 }
  0x87   : > { %781 = vmatpush.msra.mxu0 %v331_v43  ;;  %804 = vmatpush.msra.mxu1 %v332_v44 }
  0x8a   : > { %1498 = vmatmul.msk.f32.gmra.mxu0 %vm391_vm0, %v1842_v23  ;;  %1500 = vmatmul.msk.f32.gmra.mxu1 %vm391_vm0, %v1842_v23 }
  0x8b   : > { %1502 = vmatmul.msk.f32.gmra.mxu2 %vm391_vm0, %v1842_v23  ;;  %1504 = vmatmul.msk.f32.gmra.mxu3 %vm391_vm0, %v1842_v23 }
  0x92   : > { %1505 = vmatmul.msk.f32.vlgmr.msrb.gmra.mxu0 %vm391_vm0, %v1817_v10  ;;  %1507 = vmatmul.msk.f32.vlgmr.msrb.gmra.mxu1 %vm391_vm0, %v1817_v10 }
  0x93   : > { %1509 = vmatmul.msk.f32.vlgmr.msrb.gmra.mxu2 %vm391_vm0, %v1817_v10  ;;  %1511 = vmatmul.msk.f32.vlgmr.msrb.gmra.mxu3 %vm391_vm0, %v1817_v10 }
  0x94   : > { %918 = vmatpush.msrb.mxu2 %v369_v45  ;;  %941 = vmatpush.msrb.mxu3 %v370_v46 }
  0x95   : > { %872 = vmatpush.msrb.mxu0 %v367_v47  ;;  %895 = vmatpush.msrb.mxu1 %v368_v48 }
  0x96   : > { %919 = vmatpush.msrb.mxu2 %v337_v49  ;;  %942 = vmatpush.msrb.mxu3 %v338_v50 }
  0x97   : > { %873 = vmatpush.msrb.mxu0 %v335_v51  ;;  %896 = vmatpush.msrb.mxu1 %v336_v52 }
  0x9a   : > { %1506 = vmatmul.msk.f32.gmra.mxu0 %vm391_vm0, %v1842_v23  ;;  %1508 = vmatmul.msk.f32.gmra.mxu1 %vm391_vm0, %v1842_v23 }
  0x9b   : > { %1510 = vmatmul.msk.f32.gmra.mxu2 %vm391_vm0, %v1842_v23  ;;  %1512 = vmatmul.msk.f32.gmra.mxu3 %vm391_vm0, %v1842_v23 }
  0xa2   : > { %1513 = vmatmul.msk.f32.vlgmr.msra.gmra.mxu0 %vm391_vm0, %v1817_v10  ;;  %1515 = vmatmul.msk.f32.vlgmr.msra.gmra.mxu1 %vm391_vm0, %v1817_v10 }
  0xa3   : > { %1517 = vmatmul.msk.f32.vlgmr.msra.gmra.mxu2 %vm391_vm0, %v1817_v10  ;;  %1519 = vmatmul.msk.f32.vlgmr.msra.gmra.mxu3 %vm391_vm0, %v1817_v10 }
  0xa4   : > { %1010 = vmatpush.msra.mxu2 %v373_v53  ;;  %1033 = vmatpush.msra.mxu3 %v374_v54 }
  0xa5   : > { %964 = vmatpush.msra.mxu0 %v371_v55  ;;  %987 = vmatpush.msra.mxu1 %v372_v56 }
  0xa6   : > { %1011 = vmatpush.msra.mxu2 %v341_v57  ;;  %1034 = vmatpush.msra.mxu3 %v342_v58 }
  0xa7   : > { %965 = vmatpush.msra.mxu0 %v339_v59  ;;  %988 = vmatpush.msra.mxu1 %v340_v60 }
  0xaa   : > { %1514 = vmatmul.msk.f32.gmra.mxu0 %vm391_vm0, %v1842_v23  ;;  %1516 = vmatmul.msk.f32.gmra.mxu1 %vm391_vm0, %v1842_v23 }
  0xab   : > { %1518 = vmatmul.msk.f32.gmra.mxu2 %vm391_vm0, %v1842_v23  ;;  %1520 = vmatmul.msk.f32.gmra.mxu3 %vm391_vm0, %v1842_v23 }
  0xb2   : > { %1521 = vmatmul.msk.f32.vlgmr.msrb.gmra.mxu0 %vm391_vm0, %v1817_v10  ;;  %1523 = vmatmul.msk.f32.vlgmr.msrb.gmra.mxu1 %vm391_vm0, %v1817_v10 }
  0xb3   : > { %1525 = vmatmul.msk.f32.vlgmr.msrb.gmra.mxu2 %vm391_vm0, %v1817_v10  ;;  %1527 = vmatmul.msk.f32.vlgmr.msrb.gmra.mxu3 %vm391_vm0, %v1817_v10 }
  0xb4   : > { %1102 = vmatpush.msrb.mxu2 %v377_v61  ;;  %1125 = vmatpush.msrb.mxu3 %v378_v62 }
  0xb5   : > { %1056 = vmatpush.msrb.mxu0 %v375_v63  ;;  %1079 = vmatpush.msrb.mxu1 %v376_v0 }
  0xb6   : > { %1103 = vmatpush.msrb.mxu2 %v345_v1  ;;  %1126 = vmatpush.msrb.mxu3 %v346_v2 }
  0xb7   : > { %1057 = vmatpush.msrb.mxu0 %v343_v3  ;;  %1080 = vmatpush.msrb.mxu1 %v344_v4 }
  0xba   : > { %1522 = vmatmul.msk.f32.gmra.mxu0 %vm391_vm0, %v1842_v23  ;;  %1524 = vmatmul.msk.f32.gmra.mxu1 %vm391_vm0, %v1842_v23 }
  0xbb   : > { %1526 = vmatmul.msk.f32.gmra.mxu2 %vm391_vm0, %v1842_v23  ;;  %1528 = vmatmul.msk.f32.gmra.mxu3 %vm391_vm0, %v1842_v23 }
  0xc2   : > { %1529 = vmatmul.msk.f32.vlgmr.msra.gmra.mxu0 %vm391_vm0, %v1817_v10  ;;  %1531 = vmatmul.msk.f32.vlgmr.msra.gmra.mxu1 %vm391_vm0, %v1817_v10 }
  0xc3   : > { %1533 = vmatmul.msk.f32.vlgmr.msra.gmra.mxu2 %vm391_vm0, %v1817_v10  ;;  %1535 = vmatmul.msk.f32.vlgmr.msra.gmra.mxu3 %vm391_vm0, %v1817_v10 }
  0xca   : > { %1530 = vmatmul.msk.f32.gmra.mxu0 %vm391_vm0, %v1842_v23  ;;  %1532 = vmatmul.msk.f32.gmra.mxu1 %vm391_vm0, %v1842_v23 }
  0xcb   : > { %1534 = vmatmul.msk.f32.gmra.mxu2 %vm391_vm0, %v1842_v23  ;;  %1536 = vmatmul.msk.f32.gmra.mxu3 %vm391_vm0, %v1842_v23 }
  0xd0   : > { %v2011_v5 = vpop.permute.xlu0 %383 }
  0xd2   : > { %1537 = vmatmul.msk.f32.vlgmr.msrb.gmra.mxu0 %vm391_vm0, %v1817_v10  ;;  %1539 = vmatmul.msk.f32.vlgmr.msrb.gmra.mxu1 %vm391_vm0, %v1817_v10 }
  0xd3   : > { %1541 = vmatmul.msk.f32.vlgmr.msrb.gmra.mxu2 %vm391_vm0, %v1817_v10  ;;  %1543 = vmatmul.msk.f32.vlgmr.msrb.gmra.mxu3 %vm391_vm0, %v1817_v10 }
  0xda   : > { %1538 = vmatmul.msk.f32.gmra.mxu0 %vm391_vm0, %v1842_v23  ;;  %1540 = vmatmul.msk.f32.gmra.mxu1 %vm391_vm0, %v1842_v23 }
  0xdb   : > { %1542 = vmatmul.msk.f32.gmra.mxu2 %vm391_vm0, %v1842_v23  ;;  %1544 = vmatmul.msk.f32.gmra.mxu3 %vm391_vm0, %v1842_v23 }
  0xdf   : > { %v415_v6 = vpop.f32.mrf.mxu0  ;;  %v438_v7 = vpop.f32.mrf.mxu1 }
  0xe0   : > { %v416_v8 = vadd.f32 %v415_v6, %v2011_v5  ;;  %v439_v9 = vadd.f32 %v438_v7, %v2011_v5  ;;  %v2020_v12 = vpop.permute.xlu0 %388 }
  0xe2   : > { %v1134_v10 = vmax.f32 %v416_v8, 0.0  ;;  %v1135_v11 = vmax.f32 %v439_v9, 0.0 }
  0xe4   : > { %1198 = vst [vmem:[%s2016_s12] sm:$0xff] %v1134_v10 }
  0xe5   : > { %1199 = vst [vmem:[%s2016_s12 + $0x8] sm:$0xff] %v1135_v11 }
  0xe6   : > { %v461_v13 = vpop.f32.mrf.mxu2  ;;  %v484_v14 = vpop.f32.mrf.mxu3 }
  0xe7   : > { %v462_v15 = vadd.f32 %v461_v13, %v2011_v5  ;;  %v485_v16 = vadd.f32 %v484_v14, %v2011_v5  ;;  %v418_v17 = vpop.f32.mrf.mxu0  ;;  %v441_v18 = vpop.f32.mrf.mxu1 }
  0xe8   : > { %v419_v19 = vadd.f32 %v418_v17, %v2020_v12  ;;  %v442_v20 = vadd.f32 %v441_v18, %v2020_v12 }
  0xe9   : > { %v1136_v21 = vmax.f32 %v462_v15, 0.0  ;;  %v1137_v22 = vmax.f32 %v485_v16, 0.0 }
  0xea   : > { %v1166_v23 = vmax.f32 %v419_v19, 0.0  ;;  %v1167_v24 = vmax.f32 %v442_v20, 0.0 }
  0xeb   : > { %1200 = vst [vmem:[%s2016_s12 + $0x10] sm:$0xff] %v1136_v21 }
  0xec   : > { %1201 = vst [vmem:[%s2016_s12 + $0x18] sm:$0xff] %v1137_v22 }
  0xed   : > { %1230 = vst [vmem:[%s2016_s12 + $0x100] sm:$0xff] %v1166_v23 }
  0xee   : > { %1231 = vst [vmem:[%s2016_s12 + $0x108] sm:$0xff] %v1167_v24  ;;  %v464_v25 = vpop.f32.mrf.mxu2  ;;  %v487_v26 = vpop.f32.mrf.mxu3 }
  0xef   : > { %v465_v27 = vadd.f32 %v464_v25, %v2020_v12  ;;  %v488_v28 = vadd.f32 %v487_v26, %v2020_v12  ;;  %v507_v29 = vpop.f32.mrf.mxu0  ;;  %v530_v30 = vpop.f32.mrf.mxu1 }
  0xf0   : > { %v508_v31 = vadd.f32 %v507_v29, %v2011_v5  ;;  %v531_v32 = vadd.f32 %v530_v30, %v2011_v5 }
  0xf1   : > { %v1168_v33 = vmax.f32 %v465_v27, 0.0  ;;  %v1169_v34 = vmax.f32 %v488_v28, 0.0 }
  0xf2   : > { %v1138_v35 = vmax.f32 %v508_v31, 0.0  ;;  %v1139_v36 = vmax.f32 %v531_v32, 0.0 }
  0xf3   : > { %1232 = vst [vmem:[%s2016_s12 + $0x110] sm:$0xff] %v1168_v33 }
  0xf4   : > { %1233 = vst [vmem:[%s2016_s12 + $0x118] sm:$0xff] %v1169_v34 }
  0xf5   : > { %1202 = vst [vmem:[%s2016_s12 + $0x20] sm:$0xff] %v1138_v35 }
  0xf6   : > { %1203 = vst [vmem:[%s2016_s12 + $0x28] sm:$0xff] %v1139_v36  ;;  %v553_v37 = vpop.f32.mrf.mxu2  ;;  %v576_v38 = vpop.f32.mrf.mxu3 }
  0xf7   : > { %v554_v39 = vadd.f32 %v553_v37, %v2011_v5  ;;  %v577_v40 = vadd.f32 %v576_v38, %v2011_v5  ;;  %v510_v41 = vpop.f32.mrf.mxu0  ;;  %v533_v42 = vpop.f32.mrf.mxu1 }
  0xf8   : > { %v511_v43 = vadd.f32 %v510_v41, %v2020_v12  ;;  %v534_v44 = vadd.f32 %v533_v42, %v2020_v12 }
  0xf9   : > { %v1140_v45 = vmax.f32 %v554_v39, 0.0  ;;  %v1141_v46 = vmax.f32 %v577_v40, 0.0 }
  0xfa   : > { %v1170_v47 = vmax.f32 %v511_v43, 0.0  ;;  %v1171_v48 = vmax.f32 %v534_v44, 0.0 }
  0xfb   : > { %1204 = vst [vmem:[%s2016_s12 + $0x30] sm:$0xff] %v1140_v45 }
  0xfc   : > { %1205 = vst [vmem:[%s2016_s12 + $0x38] sm:$0xff] %v1141_v46 }
  0xfd   : > { %1234 = vst [vmem:[%s2016_s12 + $0x120] sm:$0xff] %v1170_v47 }
  0xfe   : > { %1235 = vst [vmem:[%s2016_s12 + $0x128] sm:$0xff] %v1171_v48  ;;  %v556_v49 = vpop.f32.mrf.mxu2  ;;  %v579_v50 = vpop.f32.mrf.mxu3 }
  0xff   : > { %v557_v51 = vadd.f32 %v556_v49, %v2020_v12  ;;  %v580_v52 = vadd.f32 %v579_v50, %v2020_v12  ;;  %v599_v53 = vpop.f32.mrf.mxu0  ;;  %v622_v54 = vpop.f32.mrf.mxu1 }
 0x100   : > { %v600_v55 = vadd.f32 %v599_v53, %v2011_v5  ;;  %v623_v56 = vadd.f32 %v622_v54, %v2011_v5 }
 0x101   : > { %v1172_v57 = vmax.f32 %v557_v51, 0.0  ;;  %v1173_v58 = vmax.f32 %v580_v52, 0.0 }
 0x102   : > { %v1142_v59 = vmax.f32 %v600_v55, 0.0  ;;  %v1143_v60 = vmax.f32 %v623_v56, 0.0 }
 0x103   : > { %1236 = vst [vmem:[%s2016_s12 + $0x130] sm:$0xff] %v1172_v57 }
 0x104   : > { %1237 = vst [vmem:[%s2016_s12 + $0x138] sm:$0xff] %v1173_v58 }
 0x105   : > { %1206 = vst [vmem:[%s2016_s12 + $0x40] sm:$0xff] %v1142_v59 }
 0x106   : > { %1207 = vst [vmem:[%s2016_s12 + $0x48] sm:$0xff] %v1143_v60  ;;  %v645_v61 = vpop.f32.mrf.mxu2  ;;  %v668_v62 = vpop.f32.mrf.mxu3 }
 0x107   : > { %v646_v63 = vadd.f32 %v645_v61, %v2011_v5  ;;  %v669_v0 = vadd.f32 %v668_v62, %v2011_v5  ;;  %v602_v1 = vpop.f32.mrf.mxu0  ;;  %v625_v2 = vpop.f32.mrf.mxu1 }
 0x108   : > { %v603_v3 = vadd.f32 %v602_v1, %v2020_v12  ;;  %v626_v4 = vadd.f32 %v625_v2, %v2020_v12 }
 0x109   : > { %v1144_v6 = vmax.f32 %v646_v63, 0.0  ;;  %v1145_v7 = vmax.f32 %v669_v0, 0.0 }
 0x10a   : > { %v1174_v8 = vmax.f32 %v603_v3, 0.0  ;;  %v1175_v9 = vmax.f32 %v626_v4, 0.0 }
 0x10b   : > { %1208 = vst [vmem:[%s2016_s12 + $0x50] sm:$0xff] %v1144_v6 }
 0x10c   : > { %1209 = vst [vmem:[%s2016_s12 + $0x58] sm:$0xff] %v1145_v7 }
 0x10d   : > { %1238 = vst [vmem:[%s2016_s12 + $0x140] sm:$0xff] %v1174_v8 }
 0x10e   : > { %1239 = vst [vmem:[%s2016_s12 + $0x148] sm:$0xff] %v1175_v9  ;;  %v648_v10 = vpop.f32.mrf.mxu2  ;;  %v671_v11 = vpop.f32.mrf.mxu3 }
 0x10f   : > { %v649_v13 = vadd.f32 %v648_v10, %v2020_v12  ;;  %v672_v14 = vadd.f32 %v671_v11, %v2020_v12  ;;  %v691_v15 = vpop.f32.mrf.mxu0  ;;  %v714_v16 = vpop.f32.mrf.mxu1 }
 0x110   : > { %v692_v17 = vadd.f32 %v691_v15, %v2011_v5  ;;  %v715_v18 = vadd.f32 %v714_v16, %v2011_v5 }
 0x111   : > { %v1176_v19 = vmax.f32 %v649_v13, 0.0  ;;  %v1177_v20 = vmax.f32 %v672_v14, 0.0 }
 0x112   : > { %v1146_v21 = vmax.f32 %v692_v17, 0.0  ;;  %v1147_v22 = vmax.f32 %v715_v18, 0.0 }
 0x113   : > { %1240 = vst [vmem:[%s2016_s12 + $0x150] sm:$0xff] %v1176_v19 }
 0x114   : > { %1241 = vst [vmem:[%s2016_s12 + $0x158] sm:$0xff] %v1177_v20 }
 0x115   : > { %1210 = vst [vmem:[%s2016_s12 + $0x60] sm:$0xff] %v1146_v21 }
 0x116   : > { %1211 = vst [vmem:[%s2016_s12 + $0x68] sm:$0xff] %v1147_v22  ;;  %v737_v23 = vpop.f32.mrf.mxu2  ;;  %v760_v24 = vpop.f32.mrf.mxu3 }
 0x117   : > { %v738_v25 = vadd.f32 %v737_v23, %v2011_v5  ;;  %v761_v26 = vadd.f32 %v760_v24, %v2011_v5  ;;  %v694_v27 = vpop.f32.mrf.mxu0  ;;  %v717_v28 = vpop.f32.mrf.mxu1 }
 0x118   : > { %v695_v29 = vadd.f32 %v694_v27, %v2020_v12  ;;  %v718_v30 = vadd.f32 %v717_v28, %v2020_v12 }
 0x119   : > { %v1148_v31 = vmax.f32 %v738_v25, 0.0  ;;  %v1149_v32 = vmax.f32 %v761_v26, 0.0 }
 0x11a   : > { %v1178_v33 = vmax.f32 %v695_v29, 0.0  ;;  %v1179_v34 = vmax.f32 %v718_v30, 0.0 }
 0x11b   : > { %1212 = vst [vmem:[%s2016_s12 + $0x70] sm:$0xff] %v1148_v31 }
 0x11c   : > { %1213 = vst [vmem:[%s2016_s12 + $0x78] sm:$0xff] %v1149_v32 }
 0x11d   : > { %1242 = vst [vmem:[%s2016_s12 + $0x160] sm:$0xff] %v1178_v33 }
 0x11e   : > { %1243 = vst [vmem:[%s2016_s12 + $0x168] sm:$0xff] %v1179_v34  ;;  %v740_v35 = vpop.f32.mrf.mxu2  ;;  %v763_v36 = vpop.f32.mrf.mxu3 }
 0x11f   : > { %v741_v37 = vadd.f32 %v740_v35, %v2020_v12  ;;  %v764_v38 = vadd.f32 %v763_v36, %v2020_v12  ;;  %v783_v39 = vpop.f32.mrf.mxu0  ;;  %v806_v40 = vpop.f32.mrf.mxu1 }
 0x120   : > { %v784_v41 = vadd.f32 %v783_v39, %v2011_v5  ;;  %v807_v42 = vadd.f32 %v806_v40, %v2011_v5 }
 0x121   : > { %v1180_v43 = vmax.f32 %v741_v37, 0.0  ;;  %v1181_v44 = vmax.f32 %v764_v38, 0.0 }
 0x122   : > { %v1150_v45 = vmax.f32 %v784_v41, 0.0  ;;  %v1151_v46 = vmax.f32 %v807_v42, 0.0 }
 0x123   : > { %1244 = vst [vmem:[%s2016_s12 + $0x170] sm:$0xff] %v1180_v43 }
 0x124   : > { %1245 = vst [vmem:[%s2016_s12 + $0x178] sm:$0xff] %v1181_v44 }
 0x125   : > { %1214 = vst [vmem:[%s2016_s12 + $0x80] sm:$0xff] %v1150_v45 }
 0x126   : > { %1215 = vst [vmem:[%s2016_s12 + $0x88] sm:$0xff] %v1151_v46  ;;  %v829_v47 = vpop.f32.mrf.mxu2  ;;  %v852_v48 = vpop.f32.mrf.mxu3 }
 0x127   : > { %v830_v49 = vadd.f32 %v829_v47, %v2011_v5  ;;  %v853_v50 = vadd.f32 %v852_v48, %v2011_v5  ;;  %v786_v51 = vpop.f32.mrf.mxu0  ;;  %v809_v52 = vpop.f32.mrf.mxu1 }
 0x128   : > { %v787_v53 = vadd.f32 %v786_v51, %v2020_v12  ;;  %v810_v54 = vadd.f32 %v809_v52, %v2020_v12 }
 0x129   : > { %v1152_v55 = vmax.f32 %v830_v49, 0.0  ;;  %v1153_v56 = vmax.f32 %v853_v50, 0.0 }
 0x12a   : > { %v1182_v57 = vmax.f32 %v787_v53, 0.0  ;;  %v1183_v58 = vmax.f32 %v810_v54, 0.0 }
 0x12b   : > { %1216 = vst [vmem:[%s2016_s12 + $0x90] sm:$0xff] %v1152_v55 }
 0x12c   : > { %1217 = vst [vmem:[%s2016_s12 + $0x98] sm:$0xff] %v1153_v56 }
 0x12d   : > { %1246 = vst [vmem:[%s2016_s12 + $0x180] sm:$0xff] %v1182_v57 }
 0x12e   : > { %1247 = vst [vmem:[%s2016_s12 + $0x188] sm:$0xff] %v1183_v58  ;;  %v832_v59 = vpop.f32.mrf.mxu2  ;;  %v855_v60 = vpop.f32.mrf.mxu3 }
 0x12f   : > { %v833_v61 = vadd.f32 %v832_v59, %v2020_v12  ;;  %v856_v62 = vadd.f32 %v855_v60, %v2020_v12  ;;  %v875_v63 = vpop.f32.mrf.mxu0  ;;  %v898_v0 = vpop.f32.mrf.mxu1 }
 0x130   : > { %v876_v1 = vadd.f32 %v875_v63, %v2011_v5  ;;  %v899_v2 = vadd.f32 %v898_v0, %v2011_v5 }
 0x131   : > { %v1184_v3 = vmax.f32 %v833_v61, 0.0  ;;  %v1185_v4 = vmax.f32 %v856_v62, 0.0 }
 0x132   : > { %v1154_v6 = vmax.f32 %v876_v1, 0.0  ;;  %v1155_v7 = vmax.f32 %v899_v2, 0.0 }
 0x133   : > { %1248 = vst [vmem:[%s2016_s12 + $0x190] sm:$0xff] %v1184_v3 }
 0x134   : > { %1249 = vst [vmem:[%s2016_s12 + $0x198] sm:$0xff] %v1185_v4 }
 0x135   : > { %1218 = vst [vmem:[%s2016_s12 + $0xa0] sm:$0xff] %v1154_v6 }
 0x136   : > { %1219 = vst [vmem:[%s2016_s12 + $0xa8] sm:$0xff] %v1155_v7  ;;  %v921_v8 = vpop.f32.mrf.mxu2  ;;  %v944_v9 = vpop.f32.mrf.mxu3 }
 0x137   : > { %v922_v10 = vadd.f32 %v921_v8, %v2011_v5  ;;  %v945_v11 = vadd.f32 %v944_v9, %v2011_v5  ;;  %v878_v13 = vpop.f32.mrf.mxu0  ;;  %v901_v14 = vpop.f32.mrf.mxu1 }
 0x138   : > { %v879_v15 = vadd.f32 %v878_v13, %v2020_v12  ;;  %v902_v16 = vadd.f32 %v901_v14, %v2020_v12  ;;  %v1288_v13 = vld [vmem:[%s2016_s12 + $0x10] sm:$0xff] (%p1653_p5)  ;;  %v1290_v14 = vld [vmem:[%s2016_s12 + $0x18] sm:$0xff] (%p1653_p5) }
 0x139   : > { %v1156_v17 = vmax.f32 %v922_v10, 0.0  ;;  %v1157_v18 = vmax.f32 %v945_v11, 0.0  ;;  %v1286_v11 = vld [vmem:[%s2016_s12 + $0x8] sm:$0xff] (%p1653_p5)  ;;  %1289 = vst [vmem:[%s2155_s20 + $0x10] sm:$0xff] (%p1653_p5), %v1288_v13 }
 0x13a   : > { %v1186_v19 = vmax.f32 %v879_v15, 0.0  ;;  %v1187_v20 = vmax.f32 %v902_v16, 0.0  ;;  %1287 = vst [vmem:[%s2155_s20 + $0x8] sm:$0xff] (%p1653_p5), %v1286_v11  ;;  %v1292_v15 = vld [vmem:[%s2016_s12 + $0x20] sm:$0xff] (%p1653_p5)  ;;  %v1294_v16 = vld [vmem:[%s2016_s12 + $0x28] sm:$0xff] (%p1653_p5) }
 0x13b   : > { %1220 = vst [vmem:[%s2016_s12 + $0xb0] sm:$0xff] %v1156_v17  ;;  %v1296_v17 = vld [vmem:[%s2016_s12 + $0x30] sm:$0xff] (%p1653_p5) }
 0x13c   : > { %1221 = vst [vmem:[%s2016_s12 + $0xb8] sm:$0xff] %v1157_v18  ;;  %v1298_v18 = vld [vmem:[%s2016_s12 + $0x38] sm:$0xff] (%p1653_p5) }
 0x13d   : > { %1250 = vst [vmem:[%s2016_s12 + $0x1a0] sm:$0xff] %v1186_v19  ;;  %v1300_v19 = vld [vmem:[%s2016_s12 + $0x40] sm:$0xff] (%p1653_p5) }
 0x13e   : > { %1251 = vst [vmem:[%s2016_s12 + $0x1a8] sm:$0xff] %v1187_v20  ;;  %v924_v21 = vpop.f32.mrf.mxu2  ;;  %v947_v22 = vpop.f32.mrf.mxu3  ;;  %v1302_v20 = vld [vmem:[%s2016_s12 + $0x48] sm:$0xff] (%p1653_p5) }
 0x13f   : > { %v925_v23 = vadd.f32 %v924_v21, %v2020_v12  ;;  %v948_v24 = vadd.f32 %v947_v22, %v2020_v12  ;;  %v967_v25 = vpop.f32.mrf.mxu0  ;;  %v990_v26 = vpop.f32.mrf.mxu1  ;;  %1291 = vst [vmem:[%s2155_s20 + $0x18] sm:$0xff] (%p1653_p5), %v1290_v14  ;;  %v1304_v21 = vld [vmem:[%s2016_s12 + $0x50] sm:$0xff] (%p1653_p5)  ;;  %v1306_v22 = vld [vmem:[%s2016_s12 + $0x58] sm:$0xff] (%p1653_p5) }
 0x140   : > { %v968_v27 = vadd.f32 %v967_v25, %v2011_v5  ;;  %v991_v28 = vadd.f32 %v990_v26, %v2011_v5  ;;  %1293 = vst [vmem:[%s2155_s20 + $0x20] sm:$0xff] (%p1653_p5), %v1292_v15  ;;  %v1312_v25 = vld [vmem:[%s2016_s12 + $0x70] sm:$0xff] (%p1653_p5)  ;;  %v1314_v26 = vld [vmem:[%s2016_s12 + $0x78] sm:$0xff] (%p1653_p5) }
 0x141   : > { %v1188_v29 = vmax.f32 %v925_v23, 0.0  ;;  %v1189_v30 = vmax.f32 %v948_v24, 0.0  ;;  %1295 = vst [vmem:[%s2155_s20 + $0x28] sm:$0xff] (%p1653_p5), %v1294_v16  ;;  %v1308_v23 = vld [vmem:[%s2016_s12 + $0x60] sm:$0xff] (%p1653_p5)  ;;  %v1310_v24 = vld [vmem:[%s2016_s12 + $0x68] sm:$0xff] (%p1653_p5) }
 0x142   : > { %v1158_v31 = vmax.f32 %v968_v27, 0.0  ;;  %v1159_v32 = vmax.f32 %v991_v28, 0.0  ;;  %1297 = vst [vmem:[%s2155_s20 + $0x30] sm:$0xff] (%p1653_p5), %v1296_v17  ;;  %v1316_v27 = vld [vmem:[%s2016_s12 + $0x80] sm:$0xff] (%p1653_p5)  ;;  %v1318_v28 = vld [vmem:[%s2016_s12 + $0x88] sm:$0xff] (%p1653_p5) }
 0x143   : > { %1252 = vst [vmem:[%s2016_s12 + $0x1b0] sm:$0xff] %v1188_v29  ;;  %v1320_v29 = vld [vmem:[%s2016_s12 + $0x90] sm:$0xff] (%p1653_p5) }
 0x144   : > { %1253 = vst [vmem:[%s2016_s12 + $0x1b8] sm:$0xff] %v1189_v30  ;;  %v1322_v30 = vld [vmem:[%s2016_s12 + $0x98] sm:$0xff] (%p1653_p5) }
 0x145   : > { %1222 = vst [vmem:[%s2016_s12 + $0xc0] sm:$0xff] %v1158_v31  ;;  %v1324_v31 = vld [vmem:[%s2016_s12 + $0xa0] sm:$0xff] (%p1653_p5) }
 0x146   : > { %1223 = vst [vmem:[%s2016_s12 + $0xc8] sm:$0xff] %v1159_v32  ;;  %v1013_v33 = vpop.f32.mrf.mxu2  ;;  %v1036_v34 = vpop.f32.mrf.mxu3  ;;  %v1326_v32 = vld [vmem:[%s2016_s12 + $0xa8] sm:$0xff] (%p1653_p5) }
 0x147   : > { %v1014_v35 = vadd.f32 %v1013_v33, %v2011_v5  ;;  %v1037_v36 = vadd.f32 %v1036_v34, %v2011_v5  ;;  %v970_v37 = vpop.f32.mrf.mxu0  ;;  %v993_v38 = vpop.f32.mrf.mxu1  ;;  %1299 = vst [vmem:[%s2155_s20 + $0x38] sm:$0xff] (%p1653_p5), %v1298_v18  ;;  %v1328_v33 = vld [vmem:[%s2016_s12 + $0xb0] sm:$0xff] (%p1653_p5)  ;;  %v1330_v34 = vld [vmem:[%s2016_s12 + $0xb8] sm:$0xff] (%p1653_p5) }
 0x148   : > { %v971_v39 = vadd.f32 %v970_v37, %v2020_v12  ;;  %v994_v40 = vadd.f32 %v993_v38, %v2020_v12  ;;  %1301 = vst [vmem:[%s2155_s20 + $0x40] sm:$0xff] (%p1653_p5), %v1300_v19 }
 0x149   : > { %v1160_v41 = vmax.f32 %v1014_v35, 0.0  ;;  %v1161_v42 = vmax.f32 %v1037_v36, 0.0  ;;  %1303 = vst [vmem:[%s2155_s20 + $0x48] sm:$0xff] (%p1653_p5), %v1302_v20 }
 0x14a   : > { %v1190_v43 = vmax.f32 %v971_v39, 0.0  ;;  %v1191_v44 = vmax.f32 %v994_v40, 0.0  ;;  %1305 = vst [vmem:[%s2155_s20 + $0x50] sm:$0xff] (%p1653_p5), %v1304_v21 }
 0x14b   : > { %1224 = vst [vmem:[%s2016_s12 + $0xd0] sm:$0xff] %v1160_v41 }
 0x14c   : > { %1225 = vst [vmem:[%s2016_s12 + $0xd8] sm:$0xff] %v1161_v42  ;;  %v1332_v35 = vld [vmem:[%s2016_s12 + $0xc0] sm:$0xff] (%p1653_p5) }
 0x14d   : > { %1254 = vst [vmem:[%s2016_s12 + $0x1c0] sm:$0xff] %v1190_v43  ;;  %v1334_v36 = vld [vmem:[%s2016_s12 + $0xc8] sm:$0xff] (%p1653_p5)  ;;  %v1348_v43 = vld [vmem:[%s2016_s12 + $0x100] sm:$0xff] (%p1653_p5) }
 0x14e   : > { %1255 = vst [vmem:[%s2016_s12 + $0x1c8] sm:$0xff] %v1191_v44  ;;  %v1016_v45 = vpop.f32.mrf.mxu2  ;;  %v1039_v46 = vpop.f32.mrf.mxu3  ;;  %v1350_v44 = vld [vmem:[%s2016_s12 + $0x108] sm:$0xff] (%p1653_p5) }
 0x14f   : > { %v1017_v47 = vadd.f32 %v1016_v45, %v2020_v12  ;;  %v1040_v48 = vadd.f32 %v1039_v46, %v2020_v12  ;;  %v1059_v49 = vpop.f32.mrf.mxu0  ;;  %v1082_v50 = vpop.f32.mrf.mxu1  ;;  %1307 = vst [vmem:[%s2155_s20 + $0x58] sm:$0xff] (%p1653_p5), %v1306_v22  ;;  %v1352_v45 = vld [vmem:[%s2016_s12 + $0x110] sm:$0xff] (%p1653_p5)  ;;  %v1354_v46 = vld [vmem:[%s2016_s12 + $0x118] sm:$0xff] (%p1653_p5) }
 0x150   : > { %v1060_v51 = vadd.f32 %v1059_v49, %v2011_v5  ;;  %v1083_v52 = vadd.f32 %v1082_v50, %v2011_v5  ;;  %1309 = vst [vmem:[%s2155_s20 + $0x60] sm:$0xff] (%p1653_p5), %v1308_v23  ;;  %v1360_v49 = vld [vmem:[%s2016_s12 + $0x130] sm:$0xff] (%p1653_p5)  ;;  %v1362_v50 = vld [vmem:[%s2016_s12 + $0x138] sm:$0xff] (%p1653_p5) }
 0x151   : > { %v1192_v53 = vmax.f32 %v1017_v47, 0.0  ;;  %v1193_v54 = vmax.f32 %v1040_v48, 0.0  ;;  %1311 = vst [vmem:[%s2155_s20 + $0x68] sm:$0xff] (%p1653_p5), %v1310_v24  ;;  %v1356_v47 = vld [vmem:[%s2016_s12 + $0x120] sm:$0xff] (%p1653_p5)  ;;  %v1358_v48 = vld [vmem:[%s2016_s12 + $0x128] sm:$0xff] (%p1653_p5) }
 0x152   : > { %v1162_v55 = vmax.f32 %v1060_v51, 0.0  ;;  %v1163_v56 = vmax.f32 %v1083_v52, 0.0  ;;  %1313 = vst [vmem:[%s2155_s20 + $0x70] sm:$0xff] (%p1653_p5), %v1312_v25  ;;  %v1336_v37 = vld [vmem:[%s2016_s12 + $0xd0] sm:$0xff] (%p1653_p5)  ;;  %v1364_v51 = vld [vmem:[%s2016_s12 + $0x140] sm:$0xff] (%p1653_p5)  ;;  %v1366_v52 = vld [vmem:[%s2016_s12 + $0x148] sm:$0xff] (%p1653_p5) }
 0x153   : > { %1256 = vst [vmem:[%s2016_s12 + $0x1d0] sm:$0xff] %v1192_v53  ;;  %v1338_v38 = vld [vmem:[%s2016_s12 + $0xd8] sm:$0xff] (%p1653_p5)  ;;  %v1368_v53 = vld [vmem:[%s2016_s12 + $0x150] sm:$0xff] (%p1653_p5) }
 0x154   : > { %1257 = vst [vmem:[%s2016_s12 + $0x1d8] sm:$0xff] %v1193_v54  ;;  %v1370_v54 = vld [vmem:[%s2016_s12 + $0x158] sm:$0xff] (%p1653_p5) }
 0x155   : > { %1226 = vst [vmem:[%s2016_s12 + $0xe0] sm:$0xff] %v1162_v55  ;;  %v1372_v55 = vld [vmem:[%s2016_s12 + $0x160] sm:$0xff] (%p1653_p5) }
 0x156   : > { %1227 = vst [vmem:[%s2016_s12 + $0xe8] sm:$0xff] %v1163_v56  ;;  %v1105_v57 = vpop.f32.mrf.mxu2  ;;  %v1128_v58 = vpop.f32.mrf.mxu3  ;;  %v1374_v56 = vld [vmem:[%s2016_s12 + $0x168] sm:$0xff] (%p1653_p5) }
 0x157   : > { %v1106_v59 = vadd.f32 %v1105_v57, %v2011_v5  ;;  %v1129_v60 = vadd.f32 %v1128_v58, %v2011_v5  ;;  %v1062_v61 = vpop.f32.mrf.mxu0  ;;  %v1085_v62 = vpop.f32.mrf.mxu1  ;;  %1315 = vst [vmem:[%s2155_s20 + $0x78] sm:$0xff] (%p1653_p5), %v1314_v26  ;;  %v1376_v57 = vld [vmem:[%s2016_s12 + $0x170] sm:$0xff] (%p1653_p5)  ;;  %v1378_v58 = vld [vmem:[%s2016_s12 + $0x178] sm:$0xff] (%p1653_p5) }
 0x158   : > { %v1063_v63 = vadd.f32 %v1062_v61, %v2020_v12  ;;  %v1086_v0 = vadd.f32 %v1085_v62, %v2020_v12  ;;  %1317 = vst [vmem:[%s2155_s20 + $0x80] sm:$0xff] (%p1653_p5), %v1316_v27  ;;  %v1384_v61 = vld [vmem:[%s2016_s12 + $0x190] sm:$0xff] (%p1653_p5)  ;;  %v1386_v62 = vld [vmem:[%s2016_s12 + $0x198] sm:$0xff] (%p1653_p5) }
 0x159   : > { %v1164_v1 = vmax.f32 %v1106_v59, 0.0  ;;  %v1165_v2 = vmax.f32 %v1129_v60, 0.0  ;;  %1319 = vst [vmem:[%s2155_s20 + $0x88] sm:$0xff] (%p1653_p5), %v1318_v28  ;;  %v1380_v59 = vld [vmem:[%s2016_s12 + $0x180] sm:$0xff] (%p1653_p5)  ;;  %v1382_v60 = vld [vmem:[%s2016_s12 + $0x188] sm:$0xff] (%p1653_p5) }
 0x15a   : > { %v1194_v3 = vmax.f32 %v1063_v63, 0.0  ;;  %v1195_v4 = vmax.f32 %v1086_v0, 0.0  ;;  %1321 = vst [vmem:[%s2155_s20 + $0x90] sm:$0xff] (%p1653_p5), %v1320_v29  ;;  %v1388_v63 = vld [vmem:[%s2016_s12 + $0x1a0] sm:$0xff] (%p1653_p5)  ;;  %v1390_v0 = vld [vmem:[%s2016_s12 + $0x1a8] sm:$0xff] (%p1653_p5) }
 0x15b   : > { %1228 = vst [vmem:[%s2016_s12 + $0xf0] sm:$0xff] %v1164_v1  ;;  %v1392_v1 = vld [vmem:[%s2016_s12 + $0x1b0] sm:$0xff] (%p1653_p5) }
 0x15c   : > { %1229 = vst [vmem:[%s2016_s12 + $0xf8] sm:$0xff] %v1165_v2  ;;  %v1340_v39 = vld [vmem:[%s2016_s12 + $0xe0] sm:$0xff] (%p1653_p5)  ;;  %v1394_v2 = vld [vmem:[%s2016_s12 + $0x1b8] sm:$0xff] (%p1653_p5) }
 0x15d   : > { %1258 = vst [vmem:[%s2016_s12 + $0x1e0] sm:$0xff] %v1194_v3  ;;  %v1342_v40 = vld [vmem:[%s2016_s12 + $0xe8] sm:$0xff] (%p1653_p5)  ;;  %v1396_v3 = vld [vmem:[%s2016_s12 + $0x1c0] sm:$0xff] (%p1653_p5) }
 0x15e   : > { %1259 = vst [vmem:[%s2016_s12 + $0x1e8] sm:$0xff] %v1195_v4  ;;  %v1108_v6 = vpop.f32.mrf.mxu2  ;;  %v1131_v7 = vpop.f32.mrf.mxu3  ;;  %v1398_v4 = vld [vmem:[%s2016_s12 + $0x1c8] sm:$0xff] (%p1653_p5) }
 0x15f   : > { %v1109_v5 = vadd.f32 %v1108_v6, %v2020_v12  ;;  %v1132_v8 = vadd.f32 %v1131_v7, %v2020_v12  ;;  %v1284_v12 = vld [vmem:[%s2016_s12] sm:$0xff] (%p1653_p5)  ;;  %1323 = vst [vmem:[%s2155_s20 + $0x98] sm:$0xff] (%p1653_p5), %v1322_v30  ;;  %v1400_v6 = vld [vmem:[%s2016_s12 + $0x1d0] sm:$0xff] (%p1653_p5)  ;;  %v1402_v7 = vld [vmem:[%s2016_s12 + $0x1d8] sm:$0xff] (%p1653_p5) }
 0x160   : > { %1268 = sbr.rel (!%p1653_p5) target bundleno = 399 (0x18f), region = 59  ;;  %1285 = vst [vmem:[%s2155_s20] sm:$0xff] (%p1653_p5), %v1284_v12 }
 0x161   : > { %v1196_v9 = vmax.f32 %v1109_v5, 0.0  ;;  %v1197_v10 = vmax.f32 %v1132_v8, 0.0  ;;  %1325 = vst [vmem:[%s2155_s20 + $0xa0] sm:$0xff] (%p1653_p5), %v1324_v31 }
 0x162   : > { %1327 = vst [vmem:[%s2155_s20 + $0xa8] sm:$0xff] (%p1653_p5), %v1326_v32  ;;  %v1344_v41 = vld [vmem:[%s2016_s12 + $0xf0] sm:$0xff] (%p1653_p5) }
 0x163   : > { %1260 = vst [vmem:[%s2016_s12 + $0x1f0] sm:$0xff] %v1196_v9  ;;  %v1346_v42 = vld [vmem:[%s2016_s12 + $0xf8] sm:$0xff] (%p1653_p5) }
 0x164   : > { %1261 = vst [vmem:[%s2016_s12 + $0x1f8] sm:$0xff] %v1197_v10  ;;  %v1404_v5 = vld [vmem:[%s2016_s12 + $0x1e0] sm:$0xff] (%p1653_p5) }
 0x165   : > { %1329 = vst [vmem:[%s2155_s20 + $0xb0] sm:$0xff] %v1328_v33  ;;  %v1406_v8 = vld [vmem:[%s2016_s12 + $0x1e8] sm:$0xff] }
 0x166   : > { %1331 = vst [vmem:[%s2155_s20 + $0xb8] sm:$0xff] %v1330_v34 }
 0x167   : > { %1333 = vst [vmem:[%s2155_s20 + $0xc0] sm:$0xff] %v1332_v35 }
 0x168   : > { %1335 = vst [vmem:[%s2155_s20 + $0xc8] sm:$0xff] %v1334_v36 }
 0x169   : > { %1337 = vst [vmem:[%s2155_s20 + $0xd0] sm:$0xff] %v1336_v37 }
 0x16a   : > { %1339 = vst [vmem:[%s2155_s20 + $0xd8] sm:$0xff] %v1338_v38  ;;  %v1408_v9 = vld [vmem:[%s2016_s12 + $0x1f0] sm:$0xff] }
 0x16b   : > { %1341 = vst [vmem:[%s2155_s20 + $0xe0] sm:$0xff] %v1340_v39  ;;  %v1410_v10 = vld [vmem:[%s2016_s12 + $0x1f8] sm:$0xff] }
 0x16c   : > { %1343 = vst [vmem:[%s2155_s20 + $0xe8] sm:$0xff] %v1342_v40 }
 0x16d   : > { %1345 = vst [vmem:[%s2155_s20 + $0xf0] sm:$0xff] %v1344_v41 }
 0x16e   : > { %1347 = vst [vmem:[%s2155_s20 + $0xf8] sm:$0xff] %v1346_v42 }
 0x16f   : > { %1349 = vst [vmem:[%s2155_s20 + $0x200] sm:$0xff] %v1348_v43 }
 0x170   : > { %1351 = vst [vmem:[%s2155_s20 + $0x208] sm:$0xff] %v1350_v44 }
 0x171   : > { %1353 = vst [vmem:[%s2155_s20 + $0x210] sm:$0xff] %v1352_v45 }
 0x172   : > { %1355 = vst [vmem:[%s2155_s20 + $0x218] sm:$0xff] %v1354_v46 }
 0x173   : > { %1357 = vst [vmem:[%s2155_s20 + $0x220] sm:$0xff] %v1356_v47 }
 0x174   : > { %1359 = vst [vmem:[%s2155_s20 + $0x228] sm:$0xff] %v1358_v48 }
 0x175   : > { %1361 = vst [vmem:[%s2155_s20 + $0x230] sm:$0xff] %v1360_v49 }
 0x176   : > { %1363 = vst [vmem:[%s2155_s20 + $0x238] sm:$0xff] %v1362_v50 }
 0x177   : > { %1365 = vst [vmem:[%s2155_s20 + $0x240] sm:$0xff] %v1364_v51 }
 0x178   : > { %1367 = vst [vmem:[%s2155_s20 + $0x248] sm:$0xff] %v1366_v52 }
 0x179   : > { %1369 = vst [vmem:[%s2155_s20 + $0x250] sm:$0xff] %v1368_v53 }
 0x17a   : > { %1371 = vst [vmem:[%s2155_s20 + $0x258] sm:$0xff] %v1370_v54 }
 0x17b   : > { %1373 = vst [vmem:[%s2155_s20 + $0x260] sm:$0xff] %v1372_v55 }
 0x17c   : > { %1375 = vst [vmem:[%s2155_s20 + $0x268] sm:$0xff] %v1374_v56 }
 0x17d   : > { %1377 = vst [vmem:[%s2155_s20 + $0x270] sm:$0xff] %v1376_v57 }
 0x17e   : > { %1379 = vst [vmem:[%s2155_s20 + $0x278] sm:$0xff] %v1378_v58 }
 0x17f   : > { %1381 = vst [vmem:[%s2155_s20 + $0x280] sm:$0xff] %v1380_v59 }
 0x180   : > { %1383 = vst [vmem:[%s2155_s20 + $0x288] sm:$0xff] %v1382_v60 }
 0x181   : > { %1385 = vst [vmem:[%s2155_s20 + $0x290] sm:$0xff] %v1384_v61 }
 0x182   : > { %1387 = vst [vmem:[%s2155_s20 + $0x298] sm:$0xff] %v1386_v62 }
 0x183   : > { %1389 = vst [vmem:[%s2155_s20 + $0x2a0] sm:$0xff] %v1388_v63 }
 0x184   : > { %1391 = vst [vmem:[%s2155_s20 + $0x2a8] sm:$0xff] %v1390_v0 }
 0x185   : > { %1393 = vst [vmem:[%s2155_s20 + $0x2b0] sm:$0xff] %v1392_v1 }
 0x186   : > { %1395 = vst [vmem:[%s2155_s20 + $0x2b8] sm:$0xff] %v1394_v2 }
 0x187   : > { %1397 = vst [vmem:[%s2155_s20 + $0x2c0] sm:$0xff] %v1396_v3 }
 0x188   : > { %1399 = vst [vmem:[%s2155_s20 + $0x2c8] sm:$0xff] %v1398_v4 }
 0x189   : > { %1401 = vst [vmem:[%s2155_s20 + $0x2d0] sm:$0xff] %v1400_v6 }
 0x18a   : > { %1403 = vst [vmem:[%s2155_s20 + $0x2d8] sm:$0xff] %v1402_v7 }
 0x18b   : > { %1405 = vst [vmem:[%s2155_s20 + $0x2e0] sm:$0xff] %v1404_v5 }
 0x18c   : > { %1407 = vst [vmem:[%s2155_s20 + $0x2e8] sm:$0xff] %v1406_v8 }
 0x18d   : > { %1409 = vst [vmem:[%s2155_s20 + $0x2f0] sm:$0xff] %v1408_v9 }
 0x18e   : > { %1411 = vst [vmem:[%s2155_s20 + $0x2f8] sm:$0xff] %v1410_v10 }
 0x18f PF: > { %p10_p10 = scmp.ge.s32.totalorder %s1640_s16, 4   ;;  %s2298_s12 = smov %s1596_s13 }
 0x190   : > { %s2299_s13 = smov %s1651_s19  ;;  %s2300_s14 = smov %s1640_s16 }
 0x191   :  { %12 = sbr.rel (!%p10_p10) target bundleno = 2 (0x2), region = 113 }

// kernel: discriminator_forward.5
= control target key start
LH: loop header
LB: loop body
LE: loop exit
PB: predicated region body
PF: predicated region fallthrough
CT: control target
= control target key end

     0   :  { %s1959_s12 = smov 0   ;;  %s1961_s13 = smov 0   ;;  %s3445_s0 = inlined_call_operand.vmem [shape: f32[32,256], index: 0, kind: input, shape index: {}]   ;;  %s3446_s1 = inlined_call_operand.vmem [shape: f32[256,2048], index: 1, kind: input, shape index: {}]   ;;  %s3447_s2 = inlined_call_operand.vmem [shape: f32[32,1], index: 2, kind: input, shape index: {}]   ;;  %s3448_s3 = inlined_call_operand.vmem [shape: f32[32,2048], index: 3, kind: output, shape index: {}]  }
   0x1   :  { %s1963_s14 = smov 0  }
   0x2 LB: > { %s1864_s15 = sadd.s32 4294967295, %s1935_s14   ;;  %s1976_s16 = sadd.s32 1, %s1935_s14   ;;  %s1935_s14 = sphi %s1963_s14, %s3452_s14   ;;  %s1931_s13 = sphi %s1961_s13, %s3451_s13   ;;  %s1927_s12 = sphi %s1959_s12, %s3450_s12  }
   0x3   : > { %s38_s17 = ssub.s32 %s1935_s14, %s1976_s16  ;;  %s41_s18 = sadd.s32 1, %s1931_s13 }
   0x4   : > { %p39_p0 = scmp.eq.s32.totalorder %s38_s17, 0  ;;  %p48_p1 = scmp.ne.s32.totalorder %s1931_s13, %s1927_s12 }
   0x5   : > { %p49_p2 = scmp.eq.s32.totalorder %s1935_s14, 0  ;;  %p99_p3 = scmp.eq.s32.totalorder %s1864_s15, 1 }
   0x6   : > { %s1987_s19 = scalar_select %p39_p0, %s1931_s13, %s41_s18  }
   0x7   : > { %p50_p4 = por %p49_p2, %p48_p1  ;;  %p1989_p5 = por %p99_p3, %p48_p1 }
   0x8   : > { %p1867_p6 = scmp.ge.s32.totalorder %s1935_s14, 2 }
   0xa   : > { %127 = sbr.rel (%p1867_p6) target bundleno = 275 (0x113), region = 24 }
   0xf   : > { %130 = sbr.rel (!%p50_p4) target bundleno = 275 (0x113), region = 28  ;;  %s132_s21 = sand.u32 (%p50_p4), 1, %s1931_s13  }
  0x10   : > { %s1879_s22 = sshll.u32 (%p50_p4), %s1935_s14, 6  ;;  %s1868_s23 = sshll.u32 (%p50_p4), %s132_s21, 11 }
  0x11   : > { %s1999_s26 = scalar_lea.vmem (%p50_p4), %s3446_s1, %s1879_s22  ;;  %s2004_s27 = scalar_lea.vmem (%p50_p4), [#allocation2], %s1868_s23 }
  0x12   : > { %v150_v0 = vld [vmem:[%s1999_s26] sm:$0xff] (%p50_p4)  ;;  %v152_v1 = vld [vmem:[%s1999_s26 + $0x8] sm:$0xff] (%p50_p4)  ;;  %v154_v2 = vld [vmem:[%s1999_s26 + $0x10] sm:$0xff] (%p50_p4) }
  0x13   : > { %151 = vst [vmem:[%s2004_s27] sm:$0xff] (%p50_p4), %v150_v0  ;;  %v156_v3 = vld [vmem:[%s1999_s26 + $0x18] sm:$0xff] (%p50_p4)  ;;  %v158_v4 = vld [vmem:[%s1999_s26 + $0x20] sm:$0xff] (%p50_p4)  ;;  %v160_v5 = vld [vmem:[%s1999_s26 + $0x28] sm:$0xff] (%p50_p4) }
  0x14   : > { %153 = vst [vmem:[%s2004_s27 + $0x8] sm:$0xff] %v152_v1  ;;  %v162_v6 = vld [vmem:[%s1999_s26 + $0x30] sm:$0xff]  ;;  %v164_v7 = vld [vmem:[%s1999_s26 + $0x38] sm:$0xff]  ;;  %v166_v8 = vld [vmem:[%s1999_s26 + $0x80] sm:$0xff] }
  0x15   : > { %155 = vst [vmem:[%s2004_s27 + $0x10] sm:$0xff] %v154_v2  ;;  %v168_v9 = vld [vmem:[%s1999_s26 + $0x88] sm:$0xff]  ;;  %v170_v10 = vld [vmem:[%s1999_s26 + $0x90] sm:$0xff]  ;;  %v172_v11 = vld [vmem:[%s1999_s26 + $0x98] sm:$0xff] }
  0x16   : > { %157 = vst [vmem:[%s2004_s27 + $0x18] sm:$0xff] %v156_v3  ;;  %v174_v12 = vld [vmem:[%s1999_s26 + $0xa0] sm:$0xff]  ;;  %v176_v13 = vld [vmem:[%s1999_s26 + $0xa8] sm:$0xff]  ;;  %v178_v14 = vld [vmem:[%s1999_s26 + $0xb0] sm:$0xff] }
  0x17   : > { %159 = vst [vmem:[%s2004_s27 + $0x20] sm:$0xff] %v158_v4  ;;  %v180_v15 = vld [vmem:[%s1999_s26 + $0xb8] sm:$0xff]  ;;  %v182_v16 = vld [vmem:[%s1999_s26 + $0x100] sm:$0xff]  ;;  %v184_v17 = vld [vmem:[%s1999_s26 + $0x108] sm:$0xff] }
  0x18   : > { %161 = vst [vmem:[%s2004_s27 + $0x28] sm:$0xff] %v160_v5  ;;  %v186_v18 = vld [vmem:[%s1999_s26 + $0x110] sm:$0xff]  ;;  %v188_v19 = vld [vmem:[%s1999_s26 + $0x118] sm:$0xff]  ;;  %v190_v20 = vld [vmem:[%s1999_s26 + $0x120] sm:$0xff] }
  0x19   : > { %163 = vst [vmem:[%s2004_s27 + $0x30] sm:$0xff] %v162_v6  ;;  %v192_v21 = vld [vmem:[%s1999_s26 + $0x128] sm:$0xff]  ;;  %v194_v22 = vld [vmem:[%s1999_s26 + $0x130] sm:$0xff]  ;;  %v196_v23 = vld [vmem:[%s1999_s26 + $0x138] sm:$0xff] }
  0x1a   : > { %165 = vst [vmem:[%s2004_s27 + $0x38] sm:$0xff] %v164_v7  ;;  %v198_v24 = vld [vmem:[%s1999_s26 + $0x180] sm:$0xff]  ;;  %v200_v25 = vld [vmem:[%s1999_s26 + $0x188] sm:$0xff]  ;;  %v202_v26 = vld [vmem:[%s1999_s26 + $0x190] sm:$0xff] }
  0x1b   : > { %167 = vst [vmem:[%s2004_s27 + $0x40] sm:$0xff] %v166_v8  ;;  %v204_v27 = vld [vmem:[%s1999_s26 + $0x198] sm:$0xff]  ;;  %v206_v28 = vld [vmem:[%s1999_s26 + $0x1a0] sm:$0xff]  ;;  %v208_v29 = vld [vmem:[%s1999_s26 + $0x1a8] sm:$0xff] }
  0x1c   : > { %169 = vst [vmem:[%s2004_s27 + $0x48] sm:$0xff] %v168_v9  ;;  %v210_v30 = vld [vmem:[%s1999_s26 + $0x1b0] sm:$0xff]  ;;  %v212_v31 = vld [vmem:[%s1999_s26 + $0x1b8] sm:$0xff]  ;;  %v214_v32 = vld [vmem:[%s1999_s26 + $0x200] sm:$0xff] }
  0x1d   : > { %171 = vst [vmem:[%s2004_s27 + $0x50] sm:$0xff] %v170_v10  ;;  %v216_v33 = vld [vmem:[%s1999_s26 + $0x208] sm:$0xff]  ;;  %v218_v34 = vld [vmem:[%s1999_s26 + $0x210] sm:$0xff]  ;;  %v220_v35 = vld [vmem:[%s1999_s26 + $0x218] sm:$0xff] }
  0x1e   : > { %173 = vst [vmem:[%s2004_s27 + $0x58] sm:$0xff] %v172_v11  ;;  %v222_v36 = vld [vmem:[%s1999_s26 + $0x220] sm:$0xff]  ;;  %v224_v37 = vld [vmem:[%s1999_s26 + $0x228] sm:$0xff]  ;;  %v226_v38 = vld [vmem:[%s1999_s26 + $0x230] sm:$0xff] }
  0x1f   : > { %175 = vst [vmem:[%s2004_s27 + $0x60] sm:$0xff] %v174_v12  ;;  %v228_v39 = vld [vmem:[%s1999_s26 + $0x238] sm:$0xff]  ;;  %v230_v40 = vld [vmem:[%s1999_s26 + $0x280] sm:$0xff]  ;;  %v232_v41 = vld [vmem:[%s1999_s26 + $0x288] sm:$0xff] }
  0x20   : > { %177 = vst [vmem:[%s2004_s27 + $0x68] sm:$0xff] %v176_v13  ;;  %v234_v42 = vld [vmem:[%s1999_s26 + $0x290] sm:$0xff]  ;;  %v236_v43 = vld [vmem:[%s1999_s26 + $0x298] sm:$0xff]  ;;  %v238_v44 = vld [vmem:[%s1999_s26 + $0x2a0] sm:$0xff] }
  0x21   : > { %179 = vst [vmem:[%s2004_s27 + $0x70] sm:$0xff] %v178_v14  ;;  %v240_v45 = vld [vmem:[%s1999_s26 + $0x2a8] sm:$0xff]  ;;  %v242_v46 = vld [vmem:[%s1999_s26 + $0x2b0] sm:$0xff]  ;;  %v244_v47 = vld [vmem:[%s1999_s26 + $0x2b8] sm:$0xff] }
  0x22   : > { %181 = vst [vmem:[%s2004_s27 + $0x78] sm:$0xff] %v180_v15  ;;  %v246_v48 = vld [vmem:[%s1999_s26 + $0x300] sm:$0xff]  ;;  %v248_v49 = vld [vmem:[%s1999_s26 + $0x308] sm:$0xff]  ;;  %v250_v50 = vld [vmem:[%s1999_s26 + $0x310] sm:$0xff] }
  0x23   : > { %183 = vst [vmem:[%s2004_s27 + $0x80] sm:$0xff] %v182_v16  ;;  %v252_v51 = vld [vmem:[%s1999_s26 + $0x318] sm:$0xff]  ;;  %v254_v52 = vld [vmem:[%s1999_s26 + $0x320] sm:$0xff]  ;;  %v256_v53 = vld [vmem:[%s1999_s26 + $0x328] sm:$0xff] }
  0x24   : > { %185 = vst [vmem:[%s2004_s27 + $0x88] sm:$0xff] %v184_v17  ;;  %v258_v54 = vld [vmem:[%s1999_s26 + $0x330] sm:$0xff]  ;;  %v260_v55 = vld [vmem:[%s1999_s26 + $0x338] sm:$0xff]  ;;  %v262_v56 = vld [vmem:[%s1999_s26 + $0x380] sm:$0xff] }
  0x25   : > { %187 = vst [vmem:[%s2004_s27 + $0x90] sm:$0xff] %v186_v18  ;;  %v264_v57 = vld [vmem:[%s1999_s26 + $0x388] sm:$0xff]  ;;  %v266_v58 = vld [vmem:[%s1999_s26 + $0x390] sm:$0xff]  ;;  %v268_v59 = vld [vmem:[%s1999_s26 + $0x398] sm:$0xff] }
  0x26   : > { %189 = vst [vmem:[%s2004_s27 + $0x98] sm:$0xff] %v188_v19  ;;  %v270_v60 = vld [vmem:[%s1999_s26 + $0x3a0] sm:$0xff]  ;;  %v272_v61 = vld [vmem:[%s1999_s26 + $0x3a8] sm:$0xff]  ;;  %v274_v62 = vld [vmem:[%s1999_s26 + $0x3b0] sm:$0xff] }
  0x27   : > { %191 = vst [vmem:[%s2004_s27 + $0xa0] sm:$0xff] %v190_v20  ;;  %v276_v63 = vld [vmem:[%s1999_s26 + $0x3b8] sm:$0xff]  ;;  %v278_v0 = vld [vmem:[%s1999_s26 + $0x400] sm:$0xff]  ;;  %v280_v1 = vld [vmem:[%s1999_s26 + $0x408] sm:$0xff] }
  0x28   : > { %193 = vst [vmem:[%s2004_s27 + $0xa8] sm:$0xff] %v192_v21  ;;  %v282_v2 = vld [vmem:[%s1999_s26 + $0x410] sm:$0xff]  ;;  %v284_v3 = vld [vmem:[%s1999_s26 + $0x418] sm:$0xff]  ;;  %v286_v4 = vld [vmem:[%s1999_s26 + $0x420] sm:$0xff] }
  0x29   : > { %195 = vst [vmem:[%s2004_s27 + $0xb0] sm:$0xff] %v194_v22  ;;  %v288_v5 = vld [vmem:[%s1999_s26 + $0x428] sm:$0xff]  ;;  %v290_v6 = vld [vmem:[%s1999_s26 + $0x430] sm:$0xff]  ;;  %v292_v7 = vld [vmem:[%s1999_s26 + $0x438] sm:$0xff] }
  0x2a   : > { %197 = vst [vmem:[%s2004_s27 + $0xb8] sm:$0xff] %v196_v23  ;;  %v294_v8 = vld [vmem:[%s1999_s26 + $0x480] sm:$0xff]  ;;  %v296_v9 = vld [vmem:[%s1999_s26 + $0x488] sm:$0xff]  ;;  %v298_v10 = vld [vmem:[%s1999_s26 + $0x490] sm:$0xff] }
  0x2b   : > { %199 = vst [vmem:[%s2004_s27 + $0xc0] sm:$0xff] %v198_v24  ;;  %v300_v11 = vld [vmem:[%s1999_s26 + $0x498] sm:$0xff]  ;;  %v302_v12 = vld [vmem:[%s1999_s26 + $0x4a0] sm:$0xff]  ;;  %v304_v13 = vld [vmem:[%s1999_s26 + $0x4a8] sm:$0xff] }
  0x2c   : > { %201 = vst [vmem:[%s2004_s27 + $0xc8] sm:$0xff] %v200_v25  ;;  %v306_v14 = vld [vmem:[%s1999_s26 + $0x4b0] sm:$0xff]  ;;  %v308_v15 = vld [vmem:[%s1999_s26 + $0x4b8] sm:$0xff]  ;;  %v310_v16 = vld [vmem:[%s1999_s26 + $0x500] sm:$0xff] }
  0x2d   : > { %203 = vst [vmem:[%s2004_s27 + $0xd0] sm:$0xff] %v202_v26  ;;  %v312_v17 = vld [vmem:[%s1999_s26 + $0x508] sm:$0xff]  ;;  %v314_v18 = vld [vmem:[%s1999_s26 + $0x510] sm:$0xff]  ;;  %v316_v19 = vld [vmem:[%s1999_s26 + $0x518] sm:$0xff] }
  0x2e   : > { %205 = vst [vmem:[%s2004_s27 + $0xd8] sm:$0xff] %v204_v27  ;;  %v318_v20 = vld [vmem:[%s1999_s26 + $0x520] sm:$0xff]  ;;  %v320_v21 = vld [vmem:[%s1999_s26 + $0x528] sm:$0xff]  ;;  %v322_v22 = vld [vmem:[%s1999_s26 + $0x530] sm:$0xff] }
  0x2f   : > { %207 = vst [vmem:[%s2004_s27 + $0xe0] sm:$0xff] %v206_v28  ;;  %v324_v23 = vld [vmem:[%s1999_s26 + $0x538] sm:$0xff]  ;;  %v326_v24 = vld [vmem:[%s1999_s26 + $0x580] sm:$0xff]  ;;  %v328_v25 = vld [vmem:[%s1999_s26 + $0x588] sm:$0xff] }
  0x30   : > { %209 = vst [vmem:[%s2004_s27 + $0xe8] sm:$0xff] %v208_v29  ;;  %v330_v26 = vld [vmem:[%s1999_s26 + $0x590] sm:$0xff]  ;;  %v332_v27 = vld [vmem:[%s1999_s26 + $0x598] sm:$0xff]  ;;  %v334_v28 = vld [vmem:[%s1999_s26 + $0x5a0] sm:$0xff] }
  0x31   : > { %211 = vst [vmem:[%s2004_s27 + $0xf0] sm:$0xff] %v210_v30  ;;  %v336_v29 = vld [vmem:[%s1999_s26 + $0x5a8] sm:$0xff]  ;;  %v338_v30 = vld [vmem:[%s1999_s26 + $0x5b0] sm:$0xff] }
  0x32   : > { %213 = vst [vmem:[%s2004_s27 + $0xf8] sm:$0xff] %v212_v31  ;;  %v340_v31 = vld [vmem:[%s1999_s26 + $0x5b8] sm:$0xff] }
  0x33   : > { %215 = vst [vmem:[%s2004_s27 + $0x100] sm:$0xff] %v214_v32  ;;  %v342_v32 = vld [vmem:[%s1999_s26 + $0x600] sm:$0xff] }
  0x34   : > { %217 = vst [vmem:[%s2004_s27 + $0x108] sm:$0xff] %v216_v33  ;;  %v344_v33 = vld [vmem:[%s1999_s26 + $0x608] sm:$0xff] }
  0x35   : > { %219 = vst [vmem:[%s2004_s27 + $0x110] sm:$0xff] %v218_v34  ;;  %v346_v34 = vld [vmem:[%s1999_s26 + $0x610] sm:$0xff] }
  0x36   : > { %221 = vst [vmem:[%s2004_s27 + $0x118] sm:$0xff] %v220_v35  ;;  %v348_v35 = vld [vmem:[%s1999_s26 + $0x618] sm:$0xff] }
  0x37   : > { %223 = vst [vmem:[%s2004_s27 + $0x120] sm:$0xff] %v222_v36  ;;  %v350_v36 = vld [vmem:[%s1999_s26 + $0x620] sm:$0xff] }
  0x38   : > { %225 = vst [vmem:[%s2004_s27 + $0x128] sm:$0xff] %v224_v37  ;;  %v352_v37 = vld [vmem:[%s1999_s26 + $0x628] sm:$0xff] }
  0x39   : > { %227 = vst [vmem:[%s2004_s27 + $0x130] sm:$0xff] %v226_v38  ;;  %v354_v38 = vld [vmem:[%s1999_s26 + $0x630] sm:$0xff] }
  0x3a   : > { %229 = vst [vmem:[%s2004_s27 + $0x138] sm:$0xff] %v228_v39  ;;  %v356_v39 = vld [vmem:[%s1999_s26 + $0x638] sm:$0xff] }
  0x3b   : > { %231 = vst [vmem:[%s2004_s27 + $0x140] sm:$0xff] %v230_v40  ;;  %v358_v40 = vld [vmem:[%s1999_s26 + $0x680] sm:$0xff] }
  0x3c   : > { %233 = vst [vmem:[%s2004_s27 + $0x148] sm:$0xff] %v232_v41  ;;  %v360_v41 = vld [vmem:[%s1999_s26 + $0x688] sm:$0xff] }
  0x3d   : > { %235 = vst [vmem:[%s2004_s27 + $0x150] sm:$0xff] %v234_v42  ;;  %v362_v42 = vld [vmem:[%s1999_s26 + $0x690] sm:$0xff] }
  0x3e   : > { %237 = vst [vmem:[%s2004_s27 + $0x158] sm:$0xff] %v236_v43  ;;  %v364_v43 = vld [vmem:[%s1999_s26 + $0x698] sm:$0xff] }
  0x3f   : > { %239 = vst [vmem:[%s2004_s27 + $0x160] sm:$0xff] %v238_v44  ;;  %v366_v44 = vld [vmem:[%s1999_s26 + $0x6a0] sm:$0xff] }
  0x40   : > { %241 = vst [vmem:[%s2004_s27 + $0x168] sm:$0xff] %v240_v45  ;;  %v368_v45 = vld [vmem:[%s1999_s26 + $0x6a8] sm:$0xff] }
  0x41   : > { %243 = vst [vmem:[%s2004_s27 + $0x170] sm:$0xff] %v242_v46  ;;  %v370_v46 = vld [vmem:[%s1999_s26 + $0x6b0] sm:$0xff] }
  0x42   : > { %245 = vst [vmem:[%s2004_s27 + $0x178] sm:$0xff] %v244_v47  ;;  %v372_v47 = vld [vmem:[%s1999_s26 + $0x6b8] sm:$0xff] }
  0x43   : > { %247 = vst [vmem:[%s2004_s27 + $0x180] sm:$0xff] %v246_v48  ;;  %v374_v48 = vld [vmem:[%s1999_s26 + $0x700] sm:$0xff] }
  0x44   : > { %249 = vst [vmem:[%s2004_s27 + $0x188] sm:$0xff] %v248_v49  ;;  %v376_v49 = vld [vmem:[%s1999_s26 + $0x708] sm:$0xff] }
  0x45   : > { %251 = vst [vmem:[%s2004_s27 + $0x190] sm:$0xff] %v250_v50  ;;  %v378_v50 = vld [vmem:[%s1999_s26 + $0x710] sm:$0xff] }
  0x46   : > { %253 = vst [vmem:[%s2004_s27 + $0x198] sm:$0xff] %v252_v51  ;;  %v380_v51 = vld [vmem:[%s1999_s26 + $0x718] sm:$0xff] }
  0x47   : > { %255 = vst [vmem:[%s2004_s27 + $0x1a0] sm:$0xff] %v254_v52  ;;  %v382_v52 = vld [vmem:[%s1999_s26 + $0x720] sm:$0xff] }
  0x48   : > { %257 = vst [vmem:[%s2004_s27 + $0x1a8] sm:$0xff] %v256_v53  ;;  %v384_v53 = vld [vmem:[%s1999_s26 + $0x728] sm:$0xff] }
  0x49   : > { %259 = vst [vmem:[%s2004_s27 + $0x1b0] sm:$0xff] %v258_v54  ;;  %v386_v54 = vld [vmem:[%s1999_s26 + $0x730] sm:$0xff] }
  0x4a   : > { %261 = vst [vmem:[%s2004_s27 + $0x1b8] sm:$0xff] %v260_v55  ;;  %v388_v55 = vld [vmem:[%s1999_s26 + $0x738] sm:$0xff] }
  0x4b   : > { %263 = vst [vmem:[%s2004_s27 + $0x1c0] sm:$0xff] %v262_v56  ;;  %v390_v56 = vld [vmem:[%s1999_s26 + $0x780] sm:$0xff] }
  0x4c   : > { %265 = vst [vmem:[%s2004_s27 + $0x1c8] sm:$0xff] %v264_v57  ;;  %v392_v57 = vld [vmem:[%s1999_s26 + $0x788] sm:$0xff] }
  0x4d   : > { %267 = vst [vmem:[%s2004_s27 + $0x1d0] sm:$0xff] %v266_v58  ;;  %v394_v58 = vld [vmem:[%s1999_s26 + $0x790] sm:$0xff] }
  0x4e   : > { %269 = vst [vmem:[%s2004_s27 + $0x1d8] sm:$0xff] %v268_v59  ;;  %v396_v59 = vld [vmem:[%s1999_s26 + $0x798] sm:$0xff] }
  0x4f   : > { %271 = vst [vmem:[%s2004_s27 + $0x1e0] sm:$0xff] %v270_v60  ;;  %v398_v60 = vld [vmem:[%s1999_s26 + $0x7a0] sm:$0xff] }
  0x50   : > { %273 = vst [vmem:[%s2004_s27 + $0x1e8] sm:$0xff] %v272_v61  ;;  %v400_v61 = vld [vmem:[%s1999_s26 + $0x7a8] sm:$0xff] }
  0x51   : > { %275 = vst [vmem:[%s2004_s27 + $0x1f0] sm:$0xff] %v274_v62  ;;  %v402_v62 = vld [vmem:[%s1999_s26 + $0x7b0] sm:$0xff] }
  0x52   : > { %277 = vst [vmem:[%s2004_s27 + $0x1f8] sm:$0xff] %v276_v63  ;;  %v404_v63 = vld [vmem:[%s1999_s26 + $0x7b8] sm:$0xff] }
  0x53   : > { %279 = vst [vmem:[%s2004_s27 + $0x200] sm:$0xff] %v278_v0  ;;  %v406_v0 = vld [vmem:[%s1999_s26 + $0x800] sm:$0xff] }
  0x54   : > { %281 = vst [vmem:[%s2004_s27 + $0x208] sm:$0xff] %v280_v1  ;;  %v408_v1 = vld [vmem:[%s1999_s26 + $0x808] sm:$0xff] }
  0x55   : > { %283 = vst [vmem:[%s2004_s27 + $0x210] sm:$0xff] %v282_v2  ;;  %v410_v2 = vld [vmem:[%s1999_s26 + $0x810] sm:$0xff] }
  0x56   : > { %285 = vst [vmem:[%s2004_s27 + $0x218] sm:$0xff] %v284_v3  ;;  %v412_v3 = vld [vmem:[%s1999_s26 + $0x818] sm:$0xff] }
  0x57   : > { %287 = vst [vmem:[%s2004_s27 + $0x220] sm:$0xff] %v286_v4  ;;  %v414_v4 = vld [vmem:[%s1999_s26 + $0x820] sm:$0xff] }
  0x58   : > { %289 = vst [vmem:[%s2004_s27 + $0x228] sm:$0xff] %v288_v5  ;;  %v416_v5 = vld [vmem:[%s1999_s26 + $0x828] sm:$0xff] }
  0x59   : > { %291 = vst [vmem:[%s2004_s27 + $0x230] sm:$0xff] %v290_v6  ;;  %v418_v6 = vld [vmem:[%s1999_s26 + $0x830] sm:$0xff] }
  0x5a   : > { %293 = vst [vmem:[%s2004_s27 + $0x238] sm:$0xff] %v292_v7  ;;  %v420_v7 = vld [vmem:[%s1999_s26 + $0x838] sm:$0xff] }
  0x5b   : > { %295 = vst [vmem:[%s2004_s27 + $0x240] sm:$0xff] %v294_v8  ;;  %v422_v8 = vld [vmem:[%s1999_s26 + $0x880] sm:$0xff] }
  0x5c   : > { %297 = vst [vmem:[%s2004_s27 + $0x248] sm:$0xff] %v296_v9  ;;  %v424_v9 = vld [vmem:[%s1999_s26 + $0x888] sm:$0xff] }
  0x5d   : > { %299 = vst [vmem:[%s2004_s27 + $0x250] sm:$0xff] %v298_v10  ;;  %v426_v10 = vld [vmem:[%s1999_s26 + $0x890] sm:$0xff] }
  0x5e   : > { %301 = vst [vmem:[%s2004_s27 + $0x258] sm:$0xff] %v300_v11  ;;  %v428_v11 = vld [vmem:[%s1999_s26 + $0x898] sm:$0xff] }
  0x5f   : > { %303 = vst [vmem:[%s2004_s27 + $0x260] sm:$0xff] %v302_v12  ;;  %v430_v12 = vld [vmem:[%s1999_s26 + $0x8a0] sm:$0xff] }
  0x60   : > { %305 = vst [vmem:[%s2004_s27 + $0x268] sm:$0xff] %v304_v13  ;;  %v432_v13 = vld [vmem:[%s1999_s26 + $0x8a8] sm:$0xff] }
  0x61   : > { %307 = vst [vmem:[%s2004_s27 + $0x270] sm:$0xff] %v306_v14  ;;  %v434_v14 = vld [vmem:[%s1999_s26 + $0x8b0] sm:$0xff] }
  0x62   : > { %309 = vst [vmem:[%s2004_s27 + $0x278] sm:$0xff] %v308_v15  ;;  %v436_v15 = vld [vmem:[%s1999_s26 + $0x8b8] sm:$0xff] }
  0x63   : > { %311 = vst [vmem:[%s2004_s27 + $0x280] sm:$0xff] %v310_v16  ;;  %v438_v16 = vld [vmem:[%s1999_s26 + $0x900] sm:$0xff] }
  0x64   : > { %313 = vst [vmem:[%s2004_s27 + $0x288] sm:$0xff] %v312_v17  ;;  %v440_v17 = vld [vmem:[%s1999_s26 + $0x908] sm:$0xff] }
  0x65   : > { %315 = vst [vmem:[%s2004_s27 + $0x290] sm:$0xff] %v314_v18  ;;  %v442_v18 = vld [vmem:[%s1999_s26 + $0x910] sm:$0xff] }
  0x66   : > { %317 = vst [vmem:[%s2004_s27 + $0x298] sm:$0xff] %v316_v19  ;;  %v444_v19 = vld [vmem:[%s1999_s26 + $0x918] sm:$0xff] }
  0x67   : > { %319 = vst [vmem:[%s2004_s27 + $0x2a0] sm:$0xff] %v318_v20  ;;  %v446_v20 = vld [vmem:[%s1999_s26 + $0x920] sm:$0xff] }
  0x68   : > { %321 = vst [vmem:[%s2004_s27 + $0x2a8] sm:$0xff] %v320_v21  ;;  %v448_v21 = vld [vmem:[%s1999_s26 + $0x928] sm:$0xff] }
  0x69   : > { %323 = vst [vmem:[%s2004_s27 + $0x2b0] sm:$0xff] %v322_v22  ;;  %v450_v22 = vld [vmem:[%s1999_s26 + $0x930] sm:$0xff] }
  0x6a   : > { %325 = vst [vmem:[%s2004_s27 + $0x2b8] sm:$0xff] %v324_v23  ;;  %v452_v23 = vld [vmem:[%s1999_s26 + $0x938] sm:$0xff] }
  0x6b   : > { %327 = vst [vmem:[%s2004_s27 + $0x2c0] sm:$0xff] %v326_v24  ;;  %v454_v24 = vld [vmem:[%s1999_s26 + $0x980] sm:$0xff] }
  0x6c   : > { %329 = vst [vmem:[%s2004_s27 + $0x2c8] sm:$0xff] %v328_v25  ;;  %v456_v25 = vld [vmem:[%s1999_s26 + $0x988] sm:$0xff] }
  0x6d   : > { %331 = vst [vmem:[%s2004_s27 + $0x2d0] sm:$0xff] %v330_v26  ;;  %v458_v26 = vld [vmem:[%s1999_s26 + $0x990] sm:$0xff] }
  0x6e   : > { %333 = vst [vmem:[%s2004_s27 + $0x2d8] sm:$0xff] %v332_v27  ;;  %v460_v27 = vld [vmem:[%s1999_s26 + $0x998] sm:$0xff] }
  0x6f   : > { %335 = vst [vmem:[%s2004_s27 + $0x2e0] sm:$0xff] %v334_v28  ;;  %v462_v28 = vld [vmem:[%s1999_s26 + $0x9a0] sm:$0xff] }
  0x70   : > { %337 = vst [vmem:[%s2004_s27 + $0x2e8] sm:$0xff] %v336_v29  ;;  %v464_v29 = vld [vmem:[%s1999_s26 + $0x9a8] sm:$0xff] }
  0x71   : > { %339 = vst [vmem:[%s2004_s27 + $0x2f0] sm:$0xff] %v338_v30  ;;  %v466_v30 = vld [vmem:[%s1999_s26 + $0x9b0] sm:$0xff] }
  0x72   : > { %341 = vst [vmem:[%s2004_s27 + $0x2f8] sm:$0xff] %v340_v31  ;;  %v468_v31 = vld [vmem:[%s1999_s26 + $0x9b8] sm:$0xff] }
  0x73   : > { %343 = vst [vmem:[%s2004_s27 + $0x300] sm:$0xff] %v342_v32  ;;  %v470_v32 = vld [vmem:[%s1999_s26 + $0xa00] sm:$0xff] }
  0x74   : > { %345 = vst [vmem:[%s2004_s27 + $0x308] sm:$0xff] %v344_v33  ;;  %v472_v33 = vld [vmem:[%s1999_s26 + $0xa08] sm:$0xff] }
  0x75   : > { %347 = vst [vmem:[%s2004_s27 + $0x310] sm:$0xff] %v346_v34  ;;  %v474_v34 = vld [vmem:[%s1999_s26 + $0xa10] sm:$0xff] }
  0x76   : > { %349 = vst [vmem:[%s2004_s27 + $0x318] sm:$0xff] %v348_v35  ;;  %v476_v35 = vld [vmem:[%s1999_s26 + $0xa18] sm:$0xff] }
  0x77   : > { %351 = vst [vmem:[%s2004_s27 + $0x320] sm:$0xff] %v350_v36  ;;  %v478_v36 = vld [vmem:[%s1999_s26 + $0xa20] sm:$0xff] }
  0x78   : > { %353 = vst [vmem:[%s2004_s27 + $0x328] sm:$0xff] %v352_v37  ;;  %v480_v37 = vld [vmem:[%s1999_s26 + $0xa28] sm:$0xff] }
  0x79   : > { %355 = vst [vmem:[%s2004_s27 + $0x330] sm:$0xff] %v354_v38  ;;  %v482_v38 = vld [vmem:[%s1999_s26 + $0xa30] sm:$0xff] }
  0x7a   : > { %357 = vst [vmem:[%s2004_s27 + $0x338] sm:$0xff] %v356_v39  ;;  %v484_v39 = vld [vmem:[%s1999_s26 + $0xa38] sm:$0xff] }
  0x7b   : > { %359 = vst [vmem:[%s2004_s27 + $0x340] sm:$0xff] %v358_v40  ;;  %v486_v40 = vld [vmem:[%s1999_s26 + $0xa80] sm:$0xff] }
  0x7c   : > { %361 = vst [vmem:[%s2004_s27 + $0x348] sm:$0xff] %v360_v41  ;;  %v488_v41 = vld [vmem:[%s1999_s26 + $0xa88] sm:$0xff] }
  0x7d   : > { %363 = vst [vmem:[%s2004_s27 + $0x350] sm:$0xff] %v362_v42  ;;  %v490_v42 = vld [vmem:[%s1999_s26 + $0xa90] sm:$0xff] }
  0x7e   : > { %365 = vst [vmem:[%s2004_s27 + $0x358] sm:$0xff] %v364_v43  ;;  %v492_v43 = vld [vmem:[%s1999_s26 + $0xa98] sm:$0xff] }
  0x7f   : > { %367 = vst [vmem:[%s2004_s27 + $0x360] sm:$0xff] %v366_v44  ;;  %v494_v44 = vld [vmem:[%s1999_s26 + $0xaa0] sm:$0xff] }
  0x80   : > { %369 = vst [vmem:[%s2004_s27 + $0x368] sm:$0xff] %v368_v45  ;;  %v496_v45 = vld [vmem:[%s1999_s26 + $0xaa8] sm:$0xff] }
  0x81   : > { %371 = vst [vmem:[%s2004_s27 + $0x370] sm:$0xff] %v370_v46  ;;  %v498_v46 = vld [vmem:[%s1999_s26 + $0xab0] sm:$0xff] }
  0x82   : > { %373 = vst [vmem:[%s2004_s27 + $0x378] sm:$0xff] %v372_v47  ;;  %v500_v47 = vld [vmem:[%s1999_s26 + $0xab8] sm:$0xff] }
  0x83   : > { %375 = vst [vmem:[%s2004_s27 + $0x380] sm:$0xff] %v374_v48  ;;  %v502_v48 = vld [vmem:[%s1999_s26 + $0xb00] sm:$0xff] }
  0x84   : > { %377 = vst [vmem:[%s2004_s27 + $0x388] sm:$0xff] %v376_v49  ;;  %v504_v49 = vld [vmem:[%s1999_s26 + $0xb08] sm:$0xff] }
  0x85   : > { %379 = vst [vmem:[%s2004_s27 + $0x390] sm:$0xff] %v378_v50  ;;  %v506_v50 = vld [vmem:[%s1999_s26 + $0xb10] sm:$0xff] }
  0x86   : > { %381 = vst [vmem:[%s2004_s27 + $0x398] sm:$0xff] %v380_v51  ;;  %v508_v51 = vld [vmem:[%s1999_s26 + $0xb18] sm:$0xff] }
  0x87   : > { %383 = vst [vmem:[%s2004_s27 + $0x3a0] sm:$0xff] %v382_v52  ;;  %v510_v52 = vld [vmem:[%s1999_s26 + $0xb20] sm:$0xff] }
  0x88   : > { %385 = vst [vmem:[%s2004_s27 + $0x3a8] sm:$0xff] %v384_v53  ;;  %v512_v53 = vld [vmem:[%s1999_s26 + $0xb28] sm:$0xff] }
  0x89   : > { %387 = vst [vmem:[%s2004_s27 + $0x3b0] sm:$0xff] %v386_v54  ;;  %v514_v54 = vld [vmem:[%s1999_s26 + $0xb30] sm:$0xff] }
  0x8a   : > { %389 = vst [vmem:[%s2004_s27 + $0x3b8] sm:$0xff] %v388_v55  ;;  %v516_v55 = vld [vmem:[%s1999_s26 + $0xb38] sm:$0xff] }
  0x8b   : > { %391 = vst [vmem:[%s2004_s27 + $0x3c0] sm:$0xff] %v390_v56  ;;  %v518_v56 = vld [vmem:[%s1999_s26 + $0xb80] sm:$0xff] }
  0x8c   : > { %393 = vst [vmem:[%s2004_s27 + $0x3c8] sm:$0xff] %v392_v57  ;;  %v520_v57 = vld [vmem:[%s1999_s26 + $0xb88] sm:$0xff] }
  0x8d   : > { %395 = vst [vmem:[%s2004_s27 + $0x3d0] sm:$0xff] %v394_v58  ;;  %v522_v58 = vld [vmem:[%s1999_s26 + $0xb90] sm:$0xff] }
  0x8e   : > { %397 = vst [vmem:[%s2004_s27 + $0x3d8] sm:$0xff] %v396_v59  ;;  %v524_v59 = vld [vmem:[%s1999_s26 + $0xb98] sm:$0xff] }
  0x8f   : > { %399 = vst [vmem:[%s2004_s27 + $0x3e0] sm:$0xff] %v398_v60  ;;  %v526_v60 = vld [vmem:[%s1999_s26 + $0xba0] sm:$0xff] }
  0x90   : > { %401 = vst [vmem:[%s2004_s27 + $0x3e8] sm:$0xff] %v400_v61  ;;  %v528_v61 = vld [vmem:[%s1999_s26 + $0xba8] sm:$0xff] }
  0x91   : > { %403 = vst [vmem:[%s2004_s27 + $0x3f0] sm:$0xff] %v402_v62  ;;  %v530_v62 = vld [vmem:[%s1999_s26 + $0xbb0] sm:$0xff] }
  0x92   : > { %405 = vst [vmem:[%s2004_s27 + $0x3f8] sm:$0xff] %v404_v63  ;;  %v532_v63 = vld [vmem:[%s1999_s26 + $0xbb8] sm:$0xff] }
  0x93   : > { %407 = vst [vmem:[%s2004_s27 + $0x400] sm:$0xff] %v406_v0  ;;  %v534_v0 = vld [vmem:[%s1999_s26 + $0xc00] sm:$0xff] }
  0x94   : > { %409 = vst [vmem:[%s2004_s27 + $0x408] sm:$0xff] %v408_v1  ;;  %v536_v1 = vld [vmem:[%s1999_s26 + $0xc08] sm:$0xff] }
  0x95   : > { %411 = vst [vmem:[%s2004_s27 + $0x410] sm:$0xff] %v410_v2  ;;  %v538_v2 = vld [vmem:[%s1999_s26 + $0xc10] sm:$0xff] }
  0x96   : > { %413 = vst [vmem:[%s2004_s27 + $0x418] sm:$0xff] %v412_v3  ;;  %v540_v3 = vld [vmem:[%s1999_s26 + $0xc18] sm:$0xff] }
  0x97   : > { %415 = vst [vmem:[%s2004_s27 + $0x420] sm:$0xff] %v414_v4  ;;  %v542_v4 = vld [vmem:[%s1999_s26 + $0xc20] sm:$0xff] }
  0x98   : > { %417 = vst [vmem:[%s2004_s27 + $0x428] sm:$0xff] %v416_v5  ;;  %v544_v5 = vld [vmem:[%s1999_s26 + $0xc28] sm:$0xff] }
  0x99   : > { %419 = vst [vmem:[%s2004_s27 + $0x430] sm:$0xff] %v418_v6  ;;  %v546_v6 = vld [vmem:[%s1999_s26 + $0xc30] sm:$0xff] }
  0x9a   : > { %421 = vst [vmem:[%s2004_s27 + $0x438] sm:$0xff] %v420_v7  ;;  %v548_v7 = vld [vmem:[%s1999_s26 + $0xc38] sm:$0xff] }
  0x9b   : > { %423 = vst [vmem:[%s2004_s27 + $0x440] sm:$0xff] %v422_v8  ;;  %v550_v8 = vld [vmem:[%s1999_s26 + $0xc80] sm:$0xff] }
  0x9c   : > { %425 = vst [vmem:[%s2004_s27 + $0x448] sm:$0xff] %v424_v9  ;;  %v552_v9 = vld [vmem:[%s1999_s26 + $0xc88] sm:$0xff] }
  0x9d   : > { %427 = vst [vmem:[%s2004_s27 + $0x450] sm:$0xff] %v426_v10  ;;  %v554_v10 = vld [vmem:[%s1999_s26 + $0xc90] sm:$0xff] }
  0x9e   : > { %429 = vst [vmem:[%s2004_s27 + $0x458] sm:$0xff] %v428_v11  ;;  %v556_v11 = vld [vmem:[%s1999_s26 + $0xc98] sm:$0xff] }
  0x9f   : > { %431 = vst [vmem:[%s2004_s27 + $0x460] sm:$0xff] %v430_v12  ;;  %v558_v12 = vld [vmem:[%s1999_s26 + $0xca0] sm:$0xff] }
  0xa0   : > { %433 = vst [vmem:[%s2004_s27 + $0x468] sm:$0xff] %v432_v13  ;;  %v560_v13 = vld [vmem:[%s1999_s26 + $0xca8] sm:$0xff] }
  0xa1   : > { %435 = vst [vmem:[%s2004_s27 + $0x470] sm:$0xff] %v434_v14  ;;  %v562_v14 = vld [vmem:[%s1999_s26 + $0xcb0] sm:$0xff] }
  0xa2   : > { %437 = vst [vmem:[%s2004_s27 + $0x478] sm:$0xff] %v436_v15  ;;  %v564_v15 = vld [vmem:[%s1999_s26 + $0xcb8] sm:$0xff] }
  0xa3   : > { %439 = vst [vmem:[%s2004_s27 + $0x480] sm:$0xff] %v438_v16  ;;  %v566_v16 = vld [vmem:[%s1999_s26 + $0xd00] sm:$0xff] }
  0xa4   : > { %441 = vst [vmem:[%s2004_s27 + $0x488] sm:$0xff] %v440_v17  ;;  %v568_v17 = vld [vmem:[%s1999_s26 + $0xd08] sm:$0xff] }
  0xa5   : > { %443 = vst [vmem:[%s2004_s27 + $0x490] sm:$0xff] %v442_v18  ;;  %v570_v18 = vld [vmem:[%s1999_s26 + $0xd10] sm:$0xff] }
  0xa6   : > { %445 = vst [vmem:[%s2004_s27 + $0x498] sm:$0xff] %v444_v19  ;;  %v572_v19 = vld [vmem:[%s1999_s26 + $0xd18] sm:$0xff] }
  0xa7   : > { %447 = vst [vmem:[%s2004_s27 + $0x4a0] sm:$0xff] %v446_v20  ;;  %v574_v20 = vld [vmem:[%s1999_s26 + $0xd20] sm:$0xff] }
  0xa8   : > { %449 = vst [vmem:[%s2004_s27 + $0x4a8] sm:$0xff] %v448_v21  ;;  %v576_v21 = vld [vmem:[%s1999_s26 + $0xd28] sm:$0xff] }
  0xa9   : > { %451 = vst [vmem:[%s2004_s27 + $0x4b0] sm:$0xff] %v450_v22  ;;  %v578_v22 = vld [vmem:[%s1999_s26 + $0xd30] sm:$0xff] }
  0xaa   : > { %453 = vst [vmem:[%s2004_s27 + $0x4b8] sm:$0xff] %v452_v23  ;;  %v580_v23 = vld [vmem:[%s1999_s26 + $0xd38] sm:$0xff] }
  0xab   : > { %455 = vst [vmem:[%s2004_s27 + $0x4c0] sm:$0xff] %v454_v24  ;;  %v582_v24 = vld [vmem:[%s1999_s26 + $0xd80] sm:$0xff] }
  0xac   : > { %457 = vst [vmem:[%s2004_s27 + $0x4c8] sm:$0xff] %v456_v25  ;;  %v584_v25 = vld [vmem:[%s1999_s26 + $0xd88] sm:$0xff] }
  0xad   : > { %459 = vst [vmem:[%s2004_s27 + $0x4d0] sm:$0xff] %v458_v26  ;;  %v586_v26 = vld [vmem:[%s1999_s26 + $0xd90] sm:$0xff] }
  0xae   : > { %461 = vst [vmem:[%s2004_s27 + $0x4d8] sm:$0xff] %v460_v27  ;;  %v588_v27 = vld [vmem:[%s1999_s26 + $0xd98] sm:$0xff] }
  0xaf   : > { %463 = vst [vmem:[%s2004_s27 + $0x4e0] sm:$0xff] %v462_v28  ;;  %v590_v28 = vld [vmem:[%s1999_s26 + $0xda0] sm:$0xff] }
  0xb0   : > { %465 = vst [vmem:[%s2004_s27 + $0x4e8] sm:$0xff] %v464_v29  ;;  %v592_v29 = vld [vmem:[%s1999_s26 + $0xda8] sm:$0xff] }
  0xb1   : > { %467 = vst [vmem:[%s2004_s27 + $0x4f0] sm:$0xff] %v466_v30  ;;  %v594_v30 = vld [vmem:[%s1999_s26 + $0xdb0] sm:$0xff] }
  0xb2   : > { %469 = vst [vmem:[%s2004_s27 + $0x4f8] sm:$0xff] %v468_v31  ;;  %v596_v31 = vld [vmem:[%s1999_s26 + $0xdb8] sm:$0xff] }
  0xb3   : > { %471 = vst [vmem:[%s2004_s27 + $0x500] sm:$0xff] %v470_v32  ;;  %v598_v32 = vld [vmem:[%s1999_s26 + $0xe00] sm:$0xff] }
  0xb4   : > { %473 = vst [vmem:[%s2004_s27 + $0x508] sm:$0xff] %v472_v33  ;;  %v600_v33 = vld [vmem:[%s1999_s26 + $0xe08] sm:$0xff] }
  0xb5   : > { %475 = vst [vmem:[%s2004_s27 + $0x510] sm:$0xff] %v474_v34  ;;  %v602_v34 = vld [vmem:[%s1999_s26 + $0xe10] sm:$0xff] }
  0xb6   : > { %477 = vst [vmem:[%s2004_s27 + $0x518] sm:$0xff] %v476_v35  ;;  %v604_v35 = vld [vmem:[%s1999_s26 + $0xe18] sm:$0xff] }
  0xb7   : > { %479 = vst [vmem:[%s2004_s27 + $0x520] sm:$0xff] %v478_v36  ;;  %v606_v36 = vld [vmem:[%s1999_s26 + $0xe20] sm:$0xff] }
  0xb8   : > { %481 = vst [vmem:[%s2004_s27 + $0x528] sm:$0xff] %v480_v37  ;;  %v608_v37 = vld [vmem:[%s1999_s26 + $0xe28] sm:$0xff] }
  0xb9   : > { %483 = vst [vmem:[%s2004_s27 + $0x530] sm:$0xff] %v482_v38  ;;  %v610_v38 = vld [vmem:[%s1999_s26 + $0xe30] sm:$0xff] }
  0xba   : > { %485 = vst [vmem:[%s2004_s27 + $0x538] sm:$0xff] %v484_v39  ;;  %v612_v39 = vld [vmem:[%s1999_s26 + $0xe38] sm:$0xff] }
  0xbb   : > { %487 = vst [vmem:[%s2004_s27 + $0x540] sm:$0xff] %v486_v40  ;;  %v614_v40 = vld [vmem:[%s1999_s26 + $0xe80] sm:$0xff] }
  0xbc   : > { %489 = vst [vmem:[%s2004_s27 + $0x548] sm:$0xff] %v488_v41  ;;  %v616_v41 = vld [vmem:[%s1999_s26 + $0xe88] sm:$0xff] }
  0xbd   : > { %491 = vst [vmem:[%s2004_s27 + $0x550] sm:$0xff] %v490_v42  ;;  %v618_v42 = vld [vmem:[%s1999_s26 + $0xe90] sm:$0xff] }
  0xbe   : > { %493 = vst [vmem:[%s2004_s27 + $0x558] sm:$0xff] %v492_v43  ;;  %v620_v43 = vld [vmem:[%s1999_s26 + $0xe98] sm:$0xff] }
  0xbf   : > { %495 = vst [vmem:[%s2004_s27 + $0x560] sm:$0xff] %v494_v44  ;;  %v622_v44 = vld [vmem:[%s1999_s26 + $0xea0] sm:$0xff] }
  0xc0   : > { %497 = vst [vmem:[%s2004_s27 + $0x568] sm:$0xff] %v496_v45  ;;  %v624_v45 = vld [vmem:[%s1999_s26 + $0xea8] sm:$0xff] }
  0xc1   : > { %499 = vst [vmem:[%s2004_s27 + $0x570] sm:$0xff] %v498_v46  ;;  %v626_v46 = vld [vmem:[%s1999_s26 + $0xeb0] sm:$0xff] }
  0xc2   : > { %501 = vst [vmem:[%s2004_s27 + $0x578] sm:$0xff] %v500_v47  ;;  %v628_v47 = vld [vmem:[%s1999_s26 + $0xeb8] sm:$0xff] }
  0xc3   : > { %503 = vst [vmem:[%s2004_s27 + $0x580] sm:$0xff] %v502_v48  ;;  %v630_v48 = vld [vmem:[%s1999_s26 + $0xf00] sm:$0xff] }
  0xc4   : > { %505 = vst [vmem:[%s2004_s27 + $0x588] sm:$0xff] %v504_v49  ;;  %v632_v49 = vld [vmem:[%s1999_s26 + $0xf08] sm:$0xff] }
  0xc5   : > { %507 = vst [vmem:[%s2004_s27 + $0x590] sm:$0xff] %v506_v50  ;;  %v634_v50 = vld [vmem:[%s1999_s26 + $0xf10] sm:$0xff] }
  0xc6   : > { %509 = vst [vmem:[%s2004_s27 + $0x598] sm:$0xff] %v508_v51  ;;  %v636_v51 = vld [vmem:[%s1999_s26 + $0xf18] sm:$0xff] }
  0xc7   : > { %511 = vst [vmem:[%s2004_s27 + $0x5a0] sm:$0xff] %v510_v52  ;;  %v638_v52 = vld [vmem:[%s1999_s26 + $0xf20] sm:$0xff] }
  0xc8   : > { %513 = vst [vmem:[%s2004_s27 + $0x5a8] sm:$0xff] %v512_v53  ;;  %v640_v53 = vld [vmem:[%s1999_s26 + $0xf28] sm:$0xff] }
  0xc9   : > { %515 = vst [vmem:[%s2004_s27 + $0x5b0] sm:$0xff] %v514_v54  ;;  %v642_v54 = vld [vmem:[%s1999_s26 + $0xf30] sm:$0xff] }
  0xca   : > { %517 = vst [vmem:[%s2004_s27 + $0x5b8] sm:$0xff] %v516_v55  ;;  %v644_v55 = vld [vmem:[%s1999_s26 + $0xf38] sm:$0xff] }
  0xcb   : > { %519 = vst [vmem:[%s2004_s27 + $0x5c0] sm:$0xff] %v518_v56  ;;  %v646_v56 = vld [vmem:[%s1999_s26 + $0xf80] sm:$0xff] }
  0xcc   : > { %521 = vst [vmem:[%s2004_s27 + $0x5c8] sm:$0xff] %v520_v57  ;;  %v648_v57 = vld [vmem:[%s1999_s26 + $0xf88] sm:$0xff] }
  0xcd   : > { %523 = vst [vmem:[%s2004_s27 + $0x5d0] sm:$0xff] %v522_v58  ;;  %v650_v58 = vld [vmem:[%s1999_s26 + $0xf90] sm:$0xff] }
  0xce   : > { %525 = vst [vmem:[%s2004_s27 + $0x5d8] sm:$0xff] %v524_v59  ;;  %v652_v59 = vld [vmem:[%s1999_s26 + $0xf98] sm:$0xff] }
  0xcf   : > { %527 = vst [vmem:[%s2004_s27 + $0x5e0] sm:$0xff] %v526_v60  ;;  %v654_v60 = vld [vmem:[%s1999_s26 + $0xfa0] sm:$0xff] }
  0xd0   : > { %529 = vst [vmem:[%s2004_s27 + $0x5e8] sm:$0xff] %v528_v61  ;;  %v656_v61 = vld [vmem:[%s1999_s26 + $0xfa8] sm:$0xff] }
  0xd1   : > { %531 = vst [vmem:[%s2004_s27 + $0x5f0] sm:$0xff] %v530_v62  ;;  %v658_v62 = vld [vmem:[%s1999_s26 + $0xfb0] sm:$0xff] }
  0xd2   : > { %533 = vst [vmem:[%s2004_s27 + $0x5f8] sm:$0xff] %v532_v63  ;;  %v660_v63 = vld [vmem:[%s1999_s26 + $0xfb8] sm:$0xff] }
  0xd3   : > { %535 = vst [vmem:[%s2004_s27 + $0x600] sm:$0xff] %v534_v0 }
  0xd4   : > { %537 = vst [vmem:[%s2004_s27 + $0x608] sm:$0xff] %v536_v1 }
  0xd5   : > { %539 = vst [vmem:[%s2004_s27 + $0x610] sm:$0xff] %v538_v2 }
  0xd6   : > { %541 = vst [vmem:[%s2004_s27 + $0x618] sm:$0xff] %v540_v3 }
  0xd7   : > { %543 = vst [vmem:[%s2004_s27 + $0x620] sm:$0xff] %v542_v4 }
  0xd8   : > { %545 = vst [vmem:[%s2004_s27 + $0x628] sm:$0xff] %v544_v5 }
  0xd9   : > { %547 = vst [vmem:[%s2004_s27 + $0x630] sm:$0xff] %v546_v6 }
  0xda   : > { %549 = vst [vmem:[%s2004_s27 + $0x638] sm:$0xff] %v548_v7 }
  0xdb   : > { %551 = vst [vmem:[%s2004_s27 + $0x640] sm:$0xff] %v550_v8 }
  0xdc   : > { %553 = vst [vmem:[%s2004_s27 + $0x648] sm:$0xff] %v552_v9 }
  0xdd   : > { %555 = vst [vmem:[%s2004_s27 + $0x650] sm:$0xff] %v554_v10 }
  0xde   : > { %557 = vst [vmem:[%s2004_s27 + $0x658] sm:$0xff] %v556_v11 }
  0xdf   : > { %559 = vst [vmem:[%s2004_s27 + $0x660] sm:$0xff] %v558_v12 }
  0xe0   : > { %561 = vst [vmem:[%s2004_s27 + $0x668] sm:$0xff] %v560_v13 }
  0xe1   : > { %563 = vst [vmem:[%s2004_s27 + $0x670] sm:$0xff] %v562_v14 }
  0xe2   : > { %565 = vst [vmem:[%s2004_s27 + $0x678] sm:$0xff] %v564_v15 }
  0xe3   : > { %567 = vst [vmem:[%s2004_s27 + $0x680] sm:$0xff] %v566_v16 }
  0xe4   : > { %569 = vst [vmem:[%s2004_s27 + $0x688] sm:$0xff] %v568_v17 }
  0xe5   : > { %571 = vst [vmem:[%s2004_s27 + $0x690] sm:$0xff] %v570_v18 }
  0xe6   : > { %573 = vst [vmem:[%s2004_s27 + $0x698] sm:$0xff] %v572_v19 }
  0xe7   : > { %575 = vst [vmem:[%s2004_s27 + $0x6a0] sm:$0xff] %v574_v20 }
  0xe8   : > { %577 = vst [vmem:[%s2004_s27 + $0x6a8] sm:$0xff] %v576_v21 }
  0xe9   : > { %579 = vst [vmem:[%s2004_s27 + $0x6b0] sm:$0xff] %v578_v22 }
  0xea   : > { %581 = vst [vmem:[%s2004_s27 + $0x6b8] sm:$0xff] %v580_v23 }
  0xeb   : > { %583 = vst [vmem:[%s2004_s27 + $0x6c0] sm:$0xff] %v582_v24 }
  0xec   : > { %585 = vst [vmem:[%s2004_s27 + $0x6c8] sm:$0xff] %v584_v25 }
  0xed   : > { %587 = vst [vmem:[%s2004_s27 + $0x6d0] sm:$0xff] %v586_v26 }
  0xee   : > { %589 = vst [vmem:[%s2004_s27 + $0x6d8] sm:$0xff] %v588_v27 }
  0xef   : > { %591 = vst [vmem:[%s2004_s27 + $0x6e0] sm:$0xff] %v590_v28 }
  0xf0   : > { %593 = vst [vmem:[%s2004_s27 + $0x6e8] sm:$0xff] %v592_v29 }
  0xf1   : > { %595 = vst [vmem:[%s2004_s27 + $0x6f0] sm:$0xff] %v594_v30 }
  0xf2   : > { %597 = vst [vmem:[%s2004_s27 + $0x6f8] sm:$0xff] %v596_v31 }
  0xf3   : > { %599 = vst [vmem:[%s2004_s27 + $0x700] sm:$0xff] %v598_v32 }
  0xf4   : > { %601 = vst [vmem:[%s2004_s27 + $0x708] sm:$0xff] %v600_v33 }
  0xf5   : > { %603 = vst [vmem:[%s2004_s27 + $0x710] sm:$0xff] %v602_v34 }
  0xf6   : > { %605 = vst [vmem:[%s2004_s27 + $0x718] sm:$0xff] %v604_v35 }
  0xf7   : > { %607 = vst [vmem:[%s2004_s27 + $0x720] sm:$0xff] %v606_v36 }
  0xf8   : > { %609 = vst [vmem:[%s2004_s27 + $0x728] sm:$0xff] %v608_v37 }
  0xf9   : > { %611 = vst [vmem:[%s2004_s27 + $0x730] sm:$0xff] %v610_v38 }
  0xfa   : > { %613 = vst [vmem:[%s2004_s27 + $0x738] sm:$0xff] %v612_v39 }
  0xfb   : > { %615 = vst [vmem:[%s2004_s27 + $0x740] sm:$0xff] %v614_v40 }
  0xfc   : > { %617 = vst [vmem:[%s2004_s27 + $0x748] sm:$0xff] %v616_v41 }
  0xfd   : > { %619 = vst [vmem:[%s2004_s27 + $0x750] sm:$0xff] %v618_v42 }
  0xfe   : > { %621 = vst [vmem:[%s2004_s27 + $0x758] sm:$0xff] %v620_v43 }
  0xff   : > { %623 = vst [vmem:[%s2004_s27 + $0x760] sm:$0xff] %v622_v44 }
 0x100   : > { %625 = vst [vmem:[%s2004_s27 + $0x768] sm:$0xff] %v624_v45 }
 0x101   : > { %627 = vst [vmem:[%s2004_s27 + $0x770] sm:$0xff] %v626_v46 }
 0x102   : > { %629 = vst [vmem:[%s2004_s27 + $0x778] sm:$0xff] %v628_v47 }
 0x103   : > { %631 = vst [vmem:[%s2004_s27 + $0x780] sm:$0xff] %v630_v48 }
 0x104   : > { %633 = vst [vmem:[%s2004_s27 + $0x788] sm:$0xff] %v632_v49 }
 0x105   : > { %635 = vst [vmem:[%s2004_s27 + $0x790] sm:$0xff] %v634_v50 }
 0x106   : > { %637 = vst [vmem:[%s2004_s27 + $0x798] sm:$0xff] %v636_v51 }
 0x107   : > { %639 = vst [vmem:[%s2004_s27 + $0x7a0] sm:$0xff] %v638_v52 }
 0x108   : > { %641 = vst [vmem:[%s2004_s27 + $0x7a8] sm:$0xff] %v640_v53 }
 0x109   : > { %643 = vst [vmem:[%s2004_s27 + $0x7b0] sm:$0xff] %v642_v54 }
 0x10a   : > { %645 = vst [vmem:[%s2004_s27 + $0x7b8] sm:$0xff] %v644_v55 }
 0x10b   : > { %647 = vst [vmem:[%s2004_s27 + $0x7c0] sm:$0xff] %v646_v56 }
 0x10c   : > { %649 = vst [vmem:[%s2004_s27 + $0x7c8] sm:$0xff] %v648_v57 }
 0x10d   : > { %651 = vst [vmem:[%s2004_s27 + $0x7d0] sm:$0xff] %v650_v58 }
 0x10e   : > { %653 = vst [vmem:[%s2004_s27 + $0x7d8] sm:$0xff] %v652_v59 }
 0x10f   : > { %655 = vst [vmem:[%s2004_s27 + $0x7e0] sm:$0xff] %v654_v60 }
 0x110   : > { %657 = vst [vmem:[%s2004_s27 + $0x7e8] sm:$0xff] %v656_v61 }
 0x111   : > { %659 = vst [vmem:[%s2004_s27 + $0x7f0] sm:$0xff] %v658_v62 }
 0x112   : > { %661 = vst [vmem:[%s2004_s27 + $0x7f8] sm:$0xff] %v660_v63 }
 0x113 PF: > { %p1871_p7 = scmp.ge.s32.totalorder %s1935_s14, 1  ;;  %p666_p8 = scmp.lt.s32.totalorder %s1935_s14, 3 }
 0x115   : > { %p667_p9 = pnand %p1871_p7, %p666_p8 }
 0x116   : > { %s673_s28 = sand.u32 (!%p667_p9), 1, %s1927_s12  }
 0x117   : > { %670 = sbr.rel (%p667_p9) target bundleno = 996 (0x3e4), region = 51  ;;  %s1872_s29 = sshll.u32 (!%p667_p9), %s673_s28, 11 }
 0x118   : > { %s2520_s30 = scalar_lea.vmem (!%p667_p9), [#allocation2], %s1872_s29 }
 0x11c   : > { %v825_v0 = vld [vmem:[%s2520_s30 + $0x3c0] sm:$0xff]  ;;  %v826_v1 = vld [vmem:[%s2520_s30 + $0x3c8] sm:$0xff]  ;;  %v828_v63 = vld [vmem:[%s2520_s30 + $0x3d8] sm:$0xff] }
 0x11d   : > { %v817_v2 = vld [vmem:[%s2520_s30 + $0x380] sm:$0xff]  ;;  %985 = vmatpush.msra.mxu0 %v825_v0  ;;  %1043 = vmatpush.msra.mxu2 %v826_v1  ;;  %v818_v4 = vld [vmem:[%s2520_s30 + $0x388] sm:$0xff] }
 0x11e   : > { %v953_v3 = vld [vmem:[%s2520_s30 + $0x7c0] sm:$0xff]  ;;  %v954_v5 = vld [vmem:[%s2520_s30 + $0x7c8] sm:$0xff] }
 0x11f   : > { %1014 = vmatpush.msra.mxu1 %v953_v3  ;;  %1072 = vmatpush.msra.mxu3 %v954_v5  ;;  %v809_v6 = vld [vmem:[%s2520_s30 + $0x340] sm:$0xff]  ;;  %v810_v8 = vld [vmem:[%s2520_s30 + $0x348] sm:$0xff]  ;;  %v956_v5 = vld [vmem:[%s2520_s30 + $0x7d8] sm:$0xff] }
 0x120   : > { %v945_v7 = vld [vmem:[%s2520_s30 + $0x780] sm:$0xff]  ;;  %986 = vmatpush.msra.mxu0 %v817_v2  ;;  %1044 = vmatpush.msra.mxu2 %v818_v4  ;;  %v946_v9 = vld [vmem:[%s2520_s30 + $0x788] sm:$0xff]  ;;  %v827_v2 = vld [vmem:[%s2520_s30 + $0x3d0] sm:$0xff] }
 0x121   : > { %v937_v10 = vld [vmem:[%s2520_s30 + $0x740] sm:$0xff]  ;;  %1015 = vmatpush.msra.mxu1 %v945_v7  ;;  %1073 = vmatpush.msra.mxu3 %v946_v9  ;;  %v802_v12 = vld [vmem:[%s2520_s30 + $0x308] sm:$0xff]  ;;  %v820_v4 = vld [vmem:[%s2520_s30 + $0x398] sm:$0xff] }
 0x122   : > { %v801_v11 = vld [vmem:[%s2520_s30 + $0x300] sm:$0xff]  ;;  %v938_v13 = vld [vmem:[%s2520_s30 + $0x748] sm:$0xff]  ;;  %987 = vmatpush.msra.mxu0 %v809_v6  ;;  %1045 = vmatpush.msra.mxu2 %v810_v8  ;;  %v819_v6 = vld [vmem:[%s2520_s30 + $0x390] sm:$0xff] }
 0x123   : > { %v929_v14 = vld [vmem:[%s2520_s30 + $0x700] sm:$0xff]  ;;  %v930_v15 = vld [vmem:[%s2520_s30 + $0x708] sm:$0xff]  ;;  %1016 = vmatpush.msra.mxu1 %v937_v10  ;;  %1074 = vmatpush.msra.mxu3 %v938_v13  ;;  %v955_v7 = vld [vmem:[%s2520_s30 + $0x7d0] sm:$0xff] }
 0x124   : > { %v793_v16 = vld [vmem:[%s2520_s30 + $0x2c0] sm:$0xff]  ;;  %v794_v17 = vld [vmem:[%s2520_s30 + $0x2c8] sm:$0xff]  ;;  %988 = vmatpush.msra.mxu0 %v801_v11  ;;  %1046 = vmatpush.msra.mxu2 %v802_v12  ;;  %v812_v8 = vld [vmem:[%s2520_s30 + $0x358] sm:$0xff] }
 0x125   : > { %v921_v18 = vld [vmem:[%s2520_s30 + $0x6c0] sm:$0xff]  ;;  %v922_v19 = vld [vmem:[%s2520_s30 + $0x6c8] sm:$0xff]  ;;  %1017 = vmatpush.msra.mxu1 %v929_v14  ;;  %1075 = vmatpush.msra.mxu3 %v930_v15  ;;  %v948_v9 = vld [vmem:[%s2520_s30 + $0x798] sm:$0xff] }
 0x126   : > { %v785_v20 = vld [vmem:[%s2520_s30 + $0x280] sm:$0xff]  ;;  %v786_v21 = vld [vmem:[%s2520_s30 + $0x288] sm:$0xff]  ;;  %989 = vmatpush.msra.mxu0 %v793_v16  ;;  %1047 = vmatpush.msra.mxu2 %v794_v17  ;;  %v811_v10 = vld [vmem:[%s2520_s30 + $0x350] sm:$0xff] }
 0x127   : > { %v913_v22 = vld [vmem:[%s2520_s30 + $0x680] sm:$0xff]  ;;  %v914_v23 = vld [vmem:[%s2520_s30 + $0x688] sm:$0xff]  ;;  %1018 = vmatpush.msra.mxu1 %v921_v18  ;;  %1076 = vmatpush.msra.mxu3 %v922_v19  ;;  %v947_v11 = vld [vmem:[%s2520_s30 + $0x790] sm:$0xff] }
 0x128   : > { %v777_v24 = vld [vmem:[%s2520_s30 + $0x240] sm:$0xff]  ;;  %v778_v25 = vld [vmem:[%s2520_s30 + $0x248] sm:$0xff]  ;;  %990 = vmatpush.msra.mxu0 %v785_v20  ;;  %1048 = vmatpush.msra.mxu2 %v786_v21  ;;  %v804_v12 = vld [vmem:[%s2520_s30 + $0x318] sm:$0xff] }
 0x129   : > { %v905_v26 = vld [vmem:[%s2520_s30 + $0x640] sm:$0xff]  ;;  %v906_v27 = vld [vmem:[%s2520_s30 + $0x648] sm:$0xff]  ;;  %1019 = vmatpush.msra.mxu1 %v913_v22  ;;  %1077 = vmatpush.msra.mxu3 %v914_v23  ;;  %v940_v13 = vld [vmem:[%s2520_s30 + $0x758] sm:$0xff] }
 0x12a   : > { %v769_v28 = vld [vmem:[%s2520_s30 + $0x200] sm:$0xff]  ;;  %v770_v29 = vld [vmem:[%s2520_s30 + $0x208] sm:$0xff]  ;;  %991 = vmatpush.msra.mxu0 %v777_v24  ;;  %1049 = vmatpush.msra.mxu2 %v778_v25  ;;  %v803_v14 = vld [vmem:[%s2520_s30 + $0x310] sm:$0xff] }
 0x12b   : > { %v897_v30 = vld [vmem:[%s2520_s30 + $0x600] sm:$0xff]  ;;  %v898_v31 = vld [vmem:[%s2520_s30 + $0x608] sm:$0xff]  ;;  %1020 = vmatpush.msra.mxu1 %v905_v26  ;;  %1078 = vmatpush.msra.mxu3 %v906_v27  ;;  %v939_v15 = vld [vmem:[%s2520_s30 + $0x750] sm:$0xff] }
 0x12c   : > { %v761_v32 = vld [vmem:[%s2520_s30 + $0x1c0] sm:$0xff]  ;;  %v762_v33 = vld [vmem:[%s2520_s30 + $0x1c8] sm:$0xff]  ;;  %992 = vmatpush.msra.mxu0 %v769_v28  ;;  %1050 = vmatpush.msra.mxu2 %v770_v29  ;;  %v2617_v16 = vld [vmem:[%s3445_s0 + $0x10] sm:$0xff] }
 0x12d   : > { %v889_v34 = vld [vmem:[%s2520_s30 + $0x5c0] sm:$0xff]  ;;  %v890_v35 = vld [vmem:[%s2520_s30 + $0x5c8] sm:$0xff]  ;;  %1021 = vmatpush.msra.mxu1 %v897_v30  ;;  %1079 = vmatpush.msra.mxu3 %v898_v31  ;;  %v796_v17 = vld [vmem:[%s2520_s30 + $0x2d8] sm:$0xff] }
 0x12e   : > { %v753_v36 = vld [vmem:[%s2520_s30 + $0x180] sm:$0xff]  ;;  %v754_v37 = vld [vmem:[%s2520_s30 + $0x188] sm:$0xff]  ;;  %993 = vmatpush.msra.mxu0 %v761_v32  ;;  %1051 = vmatpush.msra.mxu2 %v762_v33  ;;  %v932_v18 = vld [vmem:[%s2520_s30 + $0x718] sm:$0xff] }
 0x12f   : > { %v881_v38 = vld [vmem:[%s2520_s30 + $0x580] sm:$0xff]  ;;  %v882_v39 = vld [vmem:[%s2520_s30 + $0x588] sm:$0xff]  ;;  %1022 = vmatpush.msra.mxu1 %v889_v34  ;;  %1080 = vmatpush.msra.mxu3 %v890_v35  ;;  %v795_v19 = vld [vmem:[%s2520_s30 + $0x2d0] sm:$0xff]  ;;  %v1937_v35 = vmov 0  }
 0x130   : > { %v745_v40 = vld [vmem:[%s2520_s30 + $0x140] sm:$0xff]  ;;  %v746_v41 = vld [vmem:[%s2520_s30 + $0x148] sm:$0xff]  ;;  %994 = vmatpush.msra.mxu0 %v753_v36  ;;  %1052 = vmatpush.msra.mxu2 %v754_v37  ;;  %v931_v20 = vld [vmem:[%s2520_s30 + $0x710] sm:$0xff] }
 0x131   : > { %v873_v42 = vld [vmem:[%s2520_s30 + $0x540] sm:$0xff]  ;;  %v874_v43 = vld [vmem:[%s2520_s30 + $0x548] sm:$0xff]  ;;  %1023 = vmatpush.msra.mxu1 %v881_v38  ;;  %1081 = vmatpush.msra.mxu3 %v882_v39  ;;  %v2628_v21 = vld [vmem:[%s3445_s0 + $0x18] sm:$0xff] }
 0x132   : > { %v737_v44 = vld [vmem:[%s2520_s30 + $0x100] sm:$0xff]  ;;  %v738_v45 = vld [vmem:[%s2520_s30 + $0x108] sm:$0xff]  ;;  %995 = vmatpush.msra.mxu0 %v745_v40  ;;  %1053 = vmatpush.msra.mxu2 %v746_v41  ;;  %v788_v22 = vld [vmem:[%s2520_s30 + $0x298] sm:$0xff] }
 0x133   : > { %v865_v46 = vld [vmem:[%s2520_s30 + $0x500] sm:$0xff]  ;;  %v866_v47 = vld [vmem:[%s2520_s30 + $0x508] sm:$0xff]  ;;  %1024 = vmatpush.msra.mxu1 %v873_v42  ;;  %1082 = vmatpush.msra.mxu3 %v874_v43  ;;  %v924_v23 = vld [vmem:[%s2520_s30 + $0x6d8] sm:$0xff] }
 0x134   : > { %v729_v48 = vld [vmem:[%s2520_s30 + $0xc0] sm:$0xff]  ;;  %v730_v49 = vld [vmem:[%s2520_s30 + $0xc8] sm:$0xff]  ;;  %996 = vmatpush.msra.mxu0 %v737_v44  ;;  %1054 = vmatpush.msra.mxu2 %v738_v45  ;;  %v787_v24 = vld [vmem:[%s2520_s30 + $0x290] sm:$0xff] }
 0x135   : > { %v857_v50 = vld [vmem:[%s2520_s30 + $0x4c0] sm:$0xff]  ;;  %v858_v51 = vld [vmem:[%s2520_s30 + $0x4c8] sm:$0xff]  ;;  %1025 = vmatpush.msra.mxu1 %v865_v46  ;;  %1083 = vmatpush.msra.mxu3 %v866_v47  ;;  %v923_v25 = vld [vmem:[%s2520_s30 + $0x6d0] sm:$0xff] }
 0x136   : > { %v721_v52 = vld [vmem:[%s2520_s30 + $0x80] sm:$0xff]  ;;  %v722_v53 = vld [vmem:[%s2520_s30 + $0x88] sm:$0xff]  ;;  %997 = vmatpush.msra.mxu0 %v729_v48  ;;  %1055 = vmatpush.msra.mxu2 %v730_v49  ;;  %v780_v26 = vld [vmem:[%s2520_s30 + $0x258] sm:$0xff] }
 0x137   : > { %v849_v54 = vld [vmem:[%s2520_s30 + $0x480] sm:$0xff]  ;;  %v850_v55 = vld [vmem:[%s2520_s30 + $0x488] sm:$0xff]  ;;  %1026 = vmatpush.msra.mxu1 %v857_v50  ;;  %1084 = vmatpush.msra.mxu3 %v858_v51  ;;  %v916_v27 = vld [vmem:[%s2520_s30 + $0x698] sm:$0xff] }
 0x138   : > { %v713_v56 = vld [vmem:[%s2520_s30 + $0x40] sm:$0xff]  ;;  %v714_v57 = vld [vmem:[%s2520_s30 + $0x48] sm:$0xff]  ;;  %998 = vmatpush.msra.mxu0 %v721_v52  ;;  %1056 = vmatpush.msra.mxu2 %v722_v53  ;;  %v779_v28 = vld [vmem:[%s2520_s30 + $0x250] sm:$0xff] }
 0x139   : > { %v841_v58 = vld [vmem:[%s2520_s30 + $0x440] sm:$0xff]  ;;  %v842_v59 = vld [vmem:[%s2520_s30 + $0x448] sm:$0xff]  ;;  %1027 = vmatpush.msra.mxu1 %v849_v54  ;;  %1085 = vmatpush.msra.mxu3 %v850_v55  ;;  %v915_v29 = vld [vmem:[%s2520_s30 + $0x690] sm:$0xff] }
 0x13a   : > { %v705_v60 = vld [vmem:[%s2520_s30] sm:$0xff]  ;;  %v706_v61 = vld [vmem:[%s2520_s30 + $0x8] sm:$0xff]  ;;  %999 = vmatpush.msra.mxu0 %v713_v56  ;;  %1057 = vmatpush.msra.mxu2 %v714_v57  ;;  %v772_v30 = vld [vmem:[%s2520_s30 + $0x218] sm:$0xff] }
 0x13b   : > { %v2587_v62 = vld [vmem:[%s3445_s0] sm:$0xff]  ;;  %1028 = vmatpush.msra.mxu1 %v841_v58  ;;  %1086 = vmatpush.msra.mxu3 %v842_v59  ;;  %v834_v1 = vld [vmem:[%s2520_s30 + $0x408] sm:$0xff]  ;;  %v908_v31 = vld [vmem:[%s2520_s30 + $0x658] sm:$0xff] }
 0x13c   : > { %v833_v0 = vld [vmem:[%s2520_s30 + $0x400] sm:$0xff]  ;;  %1000 = vmatpush.msra.mxu0 %v705_v60  ;;  %1058 = vmatpush.msra.mxu2 %v706_v61  ;;  %v2598_v3 = vld [vmem:[%s3445_s0 + $0x8] sm:$0xff]  ;;  %v771_v33 = vld [vmem:[%s2520_s30 + $0x210] sm:$0xff] }
 0x13d   : > { %1001 = vmatmul.f32.vlgmr.msra.gmra.mxu0 %v2587_v62  ;;  %1059 = vmatmul.f32.vlgmr.msra.gmra.mxu2 %v2587_v62  ;;  %v961_v32 = vld [vmem:[%s3447_s2] sm:$0xff]  ;;  %v907_v34 = vld [vmem:[%s2520_s30 + $0x650] sm:$0xff]  ;;  %v764_v37 = vld [vmem:[%s2520_s30 + $0x1d8] sm:$0xff] }
 0x13e   : > { %1159 = vmatpush.msrb.mxu2 %v828_v63  ;;  %1029 = vmatpush.msra.mxu1 %v833_v0  ;;  %v2651_v36 = vld [vmem:[%s3445_s0 + $0x20] sm:$0xff]  ;;  %v900_v38 = vld [vmem:[%s2520_s30 + $0x618] sm:$0xff]  ;;  %v763_v39 = vld [vmem:[%s2520_s30 + $0x1d0] sm:$0xff] }
 0x13f   : > { %1087 = vmatpush.msra.mxu3 %v834_v1  ;;  %1101 = vmatpush.msrb.mxu0 %v827_v2  ;;  %v899_v40 = vld [vmem:[%s2520_s30 + $0x610] sm:$0xff]  ;;  %v2662_v41 = vld [vmem:[%s3445_s0 + $0x28] sm:$0xff]  ;;  %v756_v42 = vld [vmem:[%s2520_s30 + $0x198] sm:$0xff] }
 0x140   : > { %1030 = vmatmul.f32.vlgmr.msra.gmra.mxu1 %v2598_v3  ;;  %1088 = vmatmul.f32.vlgmr.msra.gmra.mxu3 %v2598_v3  ;;  %v892_v43 = vld [vmem:[%s2520_s30 + $0x5d8] sm:$0xff]  ;;  %v755_v44 = vld [vmem:[%s2520_s30 + $0x190] sm:$0xff]  ;;  %v962_v52 = vld [vmem:[%s3447_s2 + $0x8] sm:$0xff] }
 0x141   : > { %1160 = vmatpush.msrb.mxu2 %v820_v4  ;;  %1188 = vmatpush.msrb.mxu3 %v956_v5  ;;  %v891_v45 = vld [vmem:[%s2520_s30 + $0x5d0] sm:$0xff]  ;;  %v748_v46 = vld [vmem:[%s2520_s30 + $0x158] sm:$0xff] }
 0x142   : > { %1102 = vmatpush.msrb.mxu0 %v819_v6  ;;  %1130 = vmatpush.msrb.mxu1 %v955_v7  ;;  %v884_v47 = vld [vmem:[%s2520_s30 + $0x598] sm:$0xff]  ;;  %v747_v48 = vld [vmem:[%s2520_s30 + $0x150] sm:$0xff] }
 0x143   : > { %1161 = vmatpush.msrb.mxu2 %v812_v8  ;;  %1189 = vmatpush.msrb.mxu3 %v948_v9  ;;  %v883_v49 = vld [vmem:[%s2520_s30 + $0x590] sm:$0xff]  ;;  %v740_v50 = vld [vmem:[%s2520_s30 + $0x118] sm:$0xff] }
 0x144   : > { %1103 = vmatpush.msrb.mxu0 %v811_v10  ;;  %1131 = vmatpush.msrb.mxu1 %v947_v11  ;;  %v876_v51 = vld [vmem:[%s2520_s30 + $0x558] sm:$0xff]  ;;  %v739_v53 = vld [vmem:[%s2520_s30 + $0x110] sm:$0xff] }
 0x145   : > { %1162 = vmatpush.msrb.mxu2 %v804_v12  ;;  %1190 = vmatpush.msrb.mxu3 %v940_v13  ;;  %v875_v54 = vld [vmem:[%s2520_s30 + $0x550] sm:$0xff]  ;;  %v868_v56 = vld [vmem:[%s2520_s30 + $0x518] sm:$0xff]  ;;  %v830_v13 = vld [vmem:[%s2520_s30 + $0x3e8] sm:$0xff] }
 0x146   : > { %1104 = vmatpush.msrb.mxu0 %v803_v14  ;;  %1132 = vmatpush.msrb.mxu1 %v939_v15  ;;  %v2684_v55 = vld [vmem:[%s3445_s0 + $0x30] sm:$0xff]  ;;  %v732_v57 = vld [vmem:[%s2520_s30 + $0xd8] sm:$0xff]  ;;  %v829_v15 = vld [vmem:[%s2520_s30 + $0x3e0] sm:$0xff] }
 0x147   : > { %1004 = vmatmul.f32.gmra.mxu0 %v2617_v16  ;;  %1062 = vmatmul.f32.gmra.mxu2 %v2617_v16  ;;  %v731_v58 = vld [vmem:[%s2520_s30 + $0xd0] sm:$0xff]  ;;  %v2694_v60 = vld [vmem:[%s3445_s0 + $0x38] sm:$0xff] }
 0x148   : > { %1163 = vmatpush.msrb.mxu2 %v796_v17  ;;  %1191 = vmatpush.msrb.mxu3 %v932_v18  ;;  %v867_v59 = vld [vmem:[%s2520_s30 + $0x510] sm:$0xff]  ;;  %v724_v61 = vld [vmem:[%s2520_s30 + $0x98] sm:$0xff]  ;;  %v822_v17 = vld [vmem:[%s2520_s30 + $0x3a8] sm:$0xff] }
 0x149   : > { %1105 = vmatpush.msrb.mxu0 %v795_v19  ;;  %1133 = vmatpush.msrb.mxu1 %v931_v20  ;;  %v860_v63 = vld [vmem:[%s2520_s30 + $0x4d8] sm:$0xff]  ;;  %v723_v0 = vld [vmem:[%s2520_s30 + $0x90] sm:$0xff]  ;;  %v958_v18 = vld [vmem:[%s2520_s30 + $0x7e8] sm:$0xff] }
 0x14a   : > { %1033 = vmatmul.f32.gmra.mxu1 %v2628_v21  ;;  %1091 = vmatmul.f32.gmra.mxu3 %v2628_v21  ;;  %v859_v1 = vld [vmem:[%s2520_s30 + $0x4d0] sm:$0xff]  ;;  %v716_v2 = vld [vmem:[%s2520_s30 + $0x58] sm:$0xff]  ;;  %v821_v19 = vld [vmem:[%s2520_s30 + $0x3a0] sm:$0xff] }
 0x14b   : > { %1164 = vmatpush.msrb.mxu2 %v788_v22  ;;  %1192 = vmatpush.msrb.mxu3 %v924_v23  ;;  %v852_v4 = vld [vmem:[%s2520_s30 + $0x498] sm:$0xff]  ;;  %v715_v5 = vld [vmem:[%s2520_s30 + $0x50] sm:$0xff]  ;;  %v957_v20 = vld [vmem:[%s2520_s30 + $0x7e0] sm:$0xff] }
 0x14c   : > { %1106 = vmatpush.msrb.mxu0 %v787_v24  ;;  %1134 = vmatpush.msrb.mxu1 %v923_v25  ;;  %v851_v6 = vld [vmem:[%s2520_s30 + $0x490] sm:$0xff]  ;;  %v708_v7 = vld [vmem:[%s2520_s30 + $0x18] sm:$0xff]  ;;  %v814_v22 = vld [vmem:[%s2520_s30 + $0x368] sm:$0xff] }
 0x14d   : > { %1165 = vmatpush.msrb.mxu2 %v780_v26  ;;  %1193 = vmatpush.msrb.mxu3 %v916_v27  ;;  %v844_v8 = vld [vmem:[%s2520_s30 + $0x458] sm:$0xff]  ;;  %v963_v9 = vld [vmem:[%s3447_s2 + $0x10] sm:$0xff]  ;;  %v950_v23 = vld [vmem:[%s2520_s30 + $0x7a8] sm:$0xff] }
 0x14e   : > { %1107 = vmatpush.msrb.mxu0 %v779_v28  ;;  %1135 = vmatpush.msrb.mxu1 %v915_v29  ;;  %v707_v10 = vld [vmem:[%s2520_s30 + $0x10] sm:$0xff]  ;;  %v836_v12 = vld [vmem:[%s2520_s30 + $0x418] sm:$0xff]  ;;  %v813_v24 = vld [vmem:[%s2520_s30 + $0x360] sm:$0xff] }
 0x14f   : > { %1907 = vset.pattern.permute.xlu0 %v1937_v35  ;;  %1166 = vmatpush.msrb.mxu2 %v772_v30  ;;  %v843_v11 = vld [vmem:[%s2520_s30 + $0x450] sm:$0xff]  ;;  %v949_v25 = vld [vmem:[%s2520_s30 + $0x7a0] sm:$0xff]  ;;  %v806_v26 = vld [vmem:[%s2520_s30 + $0x328] sm:$0xff] }
 0x150   : > { %1194 = vmatpush.msrb.mxu3 %v908_v31  ;;  %967 = vperm.xlu0 %1907, %v961_v32   ;;  %v835_v14 = vld [vmem:[%s2520_s30 + $0x410] sm:$0xff]  ;;  %v942_v27 = vld [vmem:[%s2520_s30 + $0x768] sm:$0xff]  ;;  %v964_v28 = vld [vmem:[%s3447_s2 + $0x18] sm:$0xff] }
 0x151   : > { %1108 = vmatpush.msrb.mxu0 %v771_v33  ;;  %1136 = vmatpush.msrb.mxu1 %v907_v34  ;;  %v805_v29 = vld [vmem:[%s2520_s30 + $0x320] sm:$0xff]  ;;  %v798_v31 = vld [vmem:[%s2520_s30 + $0x2e8] sm:$0xff] }
 0x152   : > { %1007 = vmatmul.f32.gmra.mxu0 %v2651_v36  ;;  %1065 = vmatmul.f32.gmra.mxu2 %v2651_v36  ;;  %v941_v30 = vld [vmem:[%s2520_s30 + $0x760] sm:$0xff]  ;;  %v934_v32 = vld [vmem:[%s2520_s30 + $0x728] sm:$0xff] }
 0x153   : > { %1167 = vmatpush.msrb.mxu2 %v764_v37  ;;  %1195 = vmatpush.msrb.mxu3 %v900_v38  ;;  %v797_v33 = vld [vmem:[%s2520_s30 + $0x2e0] sm:$0xff]  ;;  %v926_v37 = vld [vmem:[%s2520_s30 + $0x6e8] sm:$0xff] }
 0x154   : > { %1109 = vmatpush.msrb.mxu0 %v763_v39  ;;  %1137 = vmatpush.msrb.mxu1 %v899_v40  ;;  %v933_v34 = vld [vmem:[%s2520_s30 + $0x720] sm:$0xff]  ;;  %v782_v40 = vld [vmem:[%s2520_s30 + $0x268] sm:$0xff] }
 0x155   : > { %1036 = vmatmul.f32.gmra.mxu1 %v2662_v41  ;;  %1094 = vmatmul.f32.gmra.mxu3 %v2662_v41  ;;  %v789_v38 = vld [vmem:[%s2520_s30 + $0x2a0] sm:$0xff] }
 0x156   : > { %1168 = vmatpush.msrb.mxu2 %v756_v42  ;;  %1196 = vmatpush.msrb.mxu3 %v892_v43  ;;  %v925_v39 = vld [vmem:[%s2520_s30 + $0x6e0] sm:$0xff]  ;;  %v918_v42 = vld [vmem:[%s2520_s30 + $0x6a8] sm:$0xff] }
 0x157   : > { %1110 = vmatpush.msrb.mxu0 %v755_v44  ;;  %1138 = vmatpush.msrb.mxu1 %v891_v45  ;;  %v781_v43 = vld [vmem:[%s2520_s30 + $0x260] sm:$0xff]  ;;  %v774_v45 = vld [vmem:[%s2520_s30 + $0x228] sm:$0xff] }
 0x158   : > { %1169 = vmatpush.msrb.mxu2 %v748_v46  ;;  %1197 = vmatpush.msrb.mxu3 %v884_v47  ;;  %v917_v44 = vld [vmem:[%s2520_s30 + $0x6a0] sm:$0xff]  ;;  %v910_v46 = vld [vmem:[%s2520_s30 + $0x668] sm:$0xff] }
 0x159   : > { %1111 = vmatpush.msrb.mxu0 %v747_v48  ;;  %1139 = vmatpush.msrb.mxu1 %v883_v49  ;;  %v773_v47 = vld [vmem:[%s2520_s30 + $0x220] sm:$0xff]  ;;  %v766_v49 = vld [vmem:[%s2520_s30 + $0x1e8] sm:$0xff] }
 0x15a   : > { %1170 = vmatpush.msrb.mxu2 %v740_v50  ;;  %1198 = vmatpush.msrb.mxu3 %v876_v51  ;;  %v909_v48 = vld [vmem:[%s2520_s30 + $0x660] sm:$0xff]  ;;  %v902_v50 = vld [vmem:[%s2520_s30 + $0x628] sm:$0xff] }
 0x15b   : > { %972 = vperm.xlu0 %1907, %v962_v52   ;;  %1112 = vmatpush.msrb.mxu0 %v739_v53  ;;  %v765_v51 = vld [vmem:[%s2520_s30 + $0x1e0] sm:$0xff]  ;;  %v758_v53 = vld [vmem:[%s2520_s30 + $0x1a8] sm:$0xff] }
 0x15c   : > { %1140 = vmatpush.msrb.mxu1 %v875_v54  ;;  %1010 = vmatmul.f32.gmra.mxu0 %v2684_v55  ;;  %v901_v52 = vld [vmem:[%s2520_s30 + $0x620] sm:$0xff]  ;;  %v894_v54 = vld [vmem:[%s2520_s30 + $0x5e8] sm:$0xff] }
 0x15d   : > { %1068 = vmatmul.f32.gmra.mxu2 %v2684_v55  ;;  %1199 = vmatpush.msrb.mxu3 %v868_v56  ;;  %v757_v56 = vld [vmem:[%s2520_s30 + $0x1a0] sm:$0xff] }
 0x15e   : > { %1171 = vmatpush.msrb.mxu2 %v732_v57  ;;  %1113 = vmatpush.msrb.mxu0 %v731_v58  ;;  %v893_v57 = vld [vmem:[%s2520_s30 + $0x5e0] sm:$0xff]  ;;  %v750_v58 = vld [vmem:[%s2520_s30 + $0x168] sm:$0xff] }
 0x15f   : > { %1141 = vmatpush.msrb.mxu1 %v867_v59  ;;  %1097 = vmatmul.f32.gmra.mxu3 %v2694_v60  ;;  %v886_v59 = vld [vmem:[%s2520_s30 + $0x5a8] sm:$0xff] }
 0x160   : > { %1039 = vmatmul.f32.gmra.mxu1 %v2694_v60  ;;  %1172 = vmatpush.msrb.mxu2 %v724_v61  ;;  %v749_v61 = vld [vmem:[%s2520_s30 + $0x160] sm:$0xff] }
 0x161   : > { %1200 = vmatpush.msrb.mxu3 %v860_v63  ;;  %1114 = vmatpush.msrb.mxu0 %v723_v0  ;;  %v885_v63 = vld [vmem:[%s2520_s30 + $0x5a0] sm:$0xff]  ;;  %v742_v0 = vld [vmem:[%s2520_s30 + $0x128] sm:$0xff] }
 0x162   : > { %1142 = vmatpush.msrb.mxu1 %v859_v1  ;;  %1173 = vmatpush.msrb.mxu2 %v716_v2  ;;  %v878_v1 = vld [vmem:[%s2520_s30 + $0x568] sm:$0xff]  ;;  %v741_v2 = vld [vmem:[%s2520_s30 + $0x120] sm:$0xff] }
 0x163   : > { %1201 = vmatpush.msrb.mxu3 %v852_v4  ;;  %1115 = vmatpush.msrb.mxu0 %v715_v5  ;;  %v877_v4 = vld [vmem:[%s2520_s30 + $0x560] sm:$0xff]  ;;  %v734_v5 = vld [vmem:[%s2520_s30 + $0xe8] sm:$0xff] }
 0x164   : > { %1143 = vmatpush.msrb.mxu1 %v851_v6  ;;  %1908 = vset.pattern.permute.xlu1 %v1937_v35  ;;  %v790_v35 = vld [vmem:[%s2520_s30 + $0x2a8] sm:$0xff] }
 0x165   : > { %1174 = vmatpush.msrb.mxu2 %v708_v7  ;;  %1202 = vmatpush.msrb.mxu3 %v844_v8  ;;  %v870_v6 = vld [vmem:[%s2520_s30 + $0x528] sm:$0xff]  ;;  %v733_v7 = vld [vmem:[%s2520_s30 + $0xe0] sm:$0xff] }
 0x166   : > { %977 = vperm.xlu1 %1908, %v963_v9   ;;  %1116 = vmatpush.msrb.mxu0 %v707_v10  ;;  %v869_v8 = vld [vmem:[%s2520_s30 + $0x520] sm:$0xff]  ;;  %v726_v9 = vld [vmem:[%s2520_s30 + $0xa8] sm:$0xff] }
 0x167   : > { %1144 = vmatpush.msrb.mxu1 %v843_v11  ;;  %1117 = vmatmul.f32.vlgmr.msrb.gmra.mxu0 %v2587_v62  ;;  %v862_v10 = vld [vmem:[%s2520_s30 + $0x4e8] sm:$0xff]  ;;  %v725_v11 = vld [vmem:[%s2520_s30 + $0xa0] sm:$0xff] }
 0x168   : > { %1175 = vmatmul.f32.vlgmr.msrb.gmra.mxu2 %v2587_v62  ;;  %1203 = vmatpush.msrb.mxu3 %v836_v12  ;;  %v861_v12 = vld [vmem:[%s2520_s30 + $0x4e0] sm:$0xff] }
 0x169   : > { %1275 = vmatpush.msra.mxu2 %v830_v13  ;;  %1145 = vmatpush.msrb.mxu1 %v835_v14  ;;  %v718_v13 = vld [vmem:[%s2520_s30 + $0x68] sm:$0xff] }
 0x16a   : > { %1217 = vmatpush.msra.mxu0 %v829_v15  ;;  %1146 = vmatmul.f32.vlgmr.msrb.gmra.mxu1 %v2598_v3  ;;  %v854_v14 = vld [vmem:[%s2520_s30 + $0x4a8] sm:$0xff]  ;;  %v717_v15 = vld [vmem:[%s2520_s30 + $0x60] sm:$0xff] }
 0x16b   : > { %1204 = vmatmul.f32.vlgmr.msrb.gmra.mxu3 %v2598_v3  ;;  %1276 = vmatpush.msra.mxu2 %v822_v17  ;;  %v853_v17 = vld [vmem:[%s2520_s30 + $0x4a0] sm:$0xff] }
 0x16c   : > { %1304 = vmatpush.msra.mxu3 %v958_v18  ;;  %1218 = vmatpush.msra.mxu0 %v821_v19  ;;  %v710_v18 = vld [vmem:[%s2520_s30 + $0x28] sm:$0xff] }
 0x16d   : > { %1246 = vmatpush.msra.mxu1 %v957_v20  ;;  %1277 = vmatpush.msra.mxu2 %v814_v22  ;;  %v846_v19 = vld [vmem:[%s2520_s30 + $0x468] sm:$0xff]  ;;  %v709_v20 = vld [vmem:[%s2520_s30 + $0x20] sm:$0xff] }
 0x16e   : > { %1305 = vmatpush.msra.mxu3 %v950_v23  ;;  %1219 = vmatpush.msra.mxu0 %v813_v24  ;;  %v845_v22 = vld [vmem:[%s2520_s30 + $0x460] sm:$0xff]  ;;  %v838_v23 = vld [vmem:[%s2520_s30 + $0x428] sm:$0xff]  ;;  %v832_v24 = vld [vmem:[%s2520_s30 + $0x3f8] sm:$0xff] }
 0x16f   : > { %1247 = vmatpush.msra.mxu1 %v949_v25  ;;  %1278 = vmatpush.msra.mxu2 %v806_v26  ;;  %v837_v25 = vld [vmem:[%s2520_s30 + $0x420] sm:$0xff]  ;;  %v831_v26 = vld [vmem:[%s2520_s30 + $0x3f0] sm:$0xff] }
 0x170   : > { %1306 = vmatpush.msra.mxu3 %v942_v27  ;;  %982 = vperm.xlu1 %1908, %v964_v28   ;;  %v824_v27 = vld [vmem:[%s2520_s30 + $0x3b8] sm:$0xff] }
 0x171   : > { %1220 = vmatpush.msra.mxu0 %v805_v29  ;;  %1248 = vmatpush.msra.mxu1 %v941_v30  ;;  %v960_v28 = vld [vmem:[%s2520_s30 + $0x7f8] sm:$0xff]  ;;  %v823_v29 = vld [vmem:[%s2520_s30 + $0x3b0] sm:$0xff] }
 0x172   : > { %1120 = vmatmul.f32.gmra.mxu0 %v2617_v16  ;;  %1178 = vmatmul.f32.gmra.mxu2 %v2617_v16  ;;  %v959_v30 = vld [vmem:[%s2520_s30 + $0x7f0] sm:$0xff] }
 0x173   : > { %1279 = vmatpush.msra.mxu2 %v798_v31  ;;  %1307 = vmatpush.msra.mxu3 %v934_v32  ;;  %v816_v31 = vld [vmem:[%s2520_s30 + $0x378] sm:$0xff] }
 0x174   : > { %1221 = vmatpush.msra.mxu0 %v797_v33  ;;  %1249 = vmatpush.msra.mxu1 %v933_v34  ;;  %v952_v32 = vld [vmem:[%s2520_s30 + $0x7b8] sm:$0xff]  ;;  %v815_v33 = vld [vmem:[%s2520_s30 + $0x370] sm:$0xff] }
 0x175   : > { %1149 = vmatmul.f32.gmra.mxu1 %v2628_v21  ;;  %1207 = vmatmul.f32.gmra.mxu3 %v2628_v21  ;;  %v951_v34 = vld [vmem:[%s2520_s30 + $0x7b0] sm:$0xff] }
 0x176   : > { %1280 = vmatpush.msra.mxu2 %v790_v35  ;;  %1308 = vmatpush.msra.mxu3 %v926_v37  ;;  %v808_v35 = vld [vmem:[%s2520_s30 + $0x338] sm:$0xff] }
 0x177   : > { %1222 = vmatpush.msra.mxu0 %v789_v38  ;;  %1250 = vmatpush.msra.mxu1 %v925_v39  ;;  %v944_v37 = vld [vmem:[%s2520_s30 + $0x778] sm:$0xff]  ;;  %v807_v38 = vld [vmem:[%s2520_s30 + $0x330] sm:$0xff] }
 0x178   : > { %1281 = vmatpush.msra.mxu2 %v782_v40  ;;  %1309 = vmatpush.msra.mxu3 %v918_v42  ;;  %v943_v39 = vld [vmem:[%s2520_s30 + $0x770] sm:$0xff]  ;;  %v800_v40 = vld [vmem:[%s2520_s30 + $0x2f8] sm:$0xff] }
 0x179   : > { %1223 = vmatpush.msra.mxu0 %v781_v43  ;;  %1251 = vmatpush.msra.mxu1 %v917_v44  ;;  %v936_v42 = vld [vmem:[%s2520_s30 + $0x738] sm:$0xff]  ;;  %v799_v43 = vld [vmem:[%s2520_s30 + $0x2f0] sm:$0xff] }
 0x17a   : > { %1282 = vmatpush.msra.mxu2 %v774_v45  ;;  %1310 = vmatpush.msra.mxu3 %v910_v46  ;;  %v935_v44 = vld [vmem:[%s2520_s30 + $0x730] sm:$0xff]  ;;  %v792_v45 = vld [vmem:[%s2520_s30 + $0x2b8] sm:$0xff] }
 0x17b   : > { %1224 = vmatpush.msra.mxu0 %v773_v47  ;;  %1252 = vmatpush.msra.mxu1 %v909_v48  ;;  %v928_v46 = vld [vmem:[%s2520_s30 + $0x6f8] sm:$0xff]  ;;  %v791_v47 = vld [vmem:[%s2520_s30 + $0x2b0] sm:$0xff] }
 0x17c   : > { %1123 = vmatmul.f32.gmra.mxu0 %v2651_v36  ;;  %1181 = vmatmul.f32.gmra.mxu2 %v2651_v36  ;;  %v927_v48 = vld [vmem:[%s2520_s30 + $0x6f0] sm:$0xff] }
 0x17d   : > { %1283 = vmatpush.msra.mxu2 %v766_v49  ;;  %1311 = vmatpush.msra.mxu3 %v902_v50  ;;  %v784_v49 = vld [vmem:[%s2520_s30 + $0x278] sm:$0xff] }
 0x17e   : > { %1225 = vmatpush.msra.mxu0 %v765_v51  ;;  %1253 = vmatpush.msra.mxu1 %v901_v52  ;;  %v920_v50 = vld [vmem:[%s2520_s30 + $0x6b8] sm:$0xff]  ;;  %v783_v51 = vld [vmem:[%s2520_s30 + $0x270] sm:$0xff] }
 0x17f   : > { %1152 = vmatmul.f32.gmra.mxu1 %v2662_v41  ;;  %1210 = vmatmul.f32.gmra.mxu3 %v2662_v41  ;;  %v919_v52 = vld [vmem:[%s2520_s30 + $0x6b0] sm:$0xff] }
 0x180   : > { %1284 = vmatpush.msra.mxu2 %v758_v53  ;;  %1312 = vmatpush.msra.mxu3 %v894_v54  ;;  %v776_v53 = vld [vmem:[%s2520_s30 + $0x238] sm:$0xff] }
 0x181   : > { %1226 = vmatpush.msra.mxu0 %v757_v56  ;;  %1254 = vmatpush.msra.mxu1 %v893_v57  ;;  %v912_v54 = vld [vmem:[%s2520_s30 + $0x678] sm:$0xff]  ;;  %v775_v56 = vld [vmem:[%s2520_s30 + $0x230] sm:$0xff] }
 0x182   : > { %1285 = vmatpush.msra.mxu2 %v750_v58  ;;  %1313 = vmatpush.msra.mxu3 %v886_v59  ;;  %v911_v57 = vld [vmem:[%s2520_s30 + $0x670] sm:$0xff]  ;;  %v768_v58 = vld [vmem:[%s2520_s30 + $0x1f8] sm:$0xff] }
 0x183   : > { %1227 = vmatpush.msra.mxu0 %v749_v61  ;;  %1255 = vmatpush.msra.mxu1 %v885_v63  ;;  %v904_v59 = vld [vmem:[%s2520_s30 + $0x638] sm:$0xff]  ;;  %v767_v61 = vld [vmem:[%s2520_s30 + $0x1f0] sm:$0xff] }
 0x184   : > { %1286 = vmatpush.msra.mxu2 %v742_v0  ;;  %1314 = vmatpush.msra.mxu3 %v878_v1  ;;  %v903_v63 = vld [vmem:[%s2520_s30 + $0x630] sm:$0xff]  ;;  %v760_v0 = vld [vmem:[%s2520_s30 + $0x1b8] sm:$0xff] }
 0x185   : > { %1228 = vmatpush.msra.mxu0 %v741_v2  ;;  %1256 = vmatpush.msra.mxu1 %v877_v4  ;;  %v896_v1 = vld [vmem:[%s2520_s30 + $0x5f8] sm:$0xff]  ;;  %v759_v2 = vld [vmem:[%s2520_s30 + $0x1b0] sm:$0xff] }
 0x186   : > { %1126 = vmatmul.f32.gmra.mxu0 %v2684_v55  ;;  %1184 = vmatmul.f32.gmra.mxu2 %v2684_v55  ;;  %v895_v4 = vld [vmem:[%s2520_s30 + $0x5f0] sm:$0xff] }
 0x187   : > { %1287 = vmatpush.msra.mxu2 %v734_v5  ;;  %1315 = vmatpush.msra.mxu3 %v870_v6  ;;  %v752_v5 = vld [vmem:[%s2520_s30 + $0x178] sm:$0xff] }
 0x188   : > { %1229 = vmatpush.msra.mxu0 %v733_v7  ;;  %1257 = vmatpush.msra.mxu1 %v869_v8  ;;  %v888_v6 = vld [vmem:[%s2520_s30 + $0x5b8] sm:$0xff]  ;;  %v751_v7 = vld [vmem:[%s2520_s30 + $0x170] sm:$0xff] }
 0x189   : > { %1155 = vmatmul.f32.gmra.mxu1 %v2694_v60  ;;  %1213 = vmatmul.f32.gmra.mxu3 %v2694_v60  ;;  %v887_v8 = vld [vmem:[%s2520_s30 + $0x5b0] sm:$0xff] }
 0x18a   : > { %1288 = vmatpush.msra.mxu2 %v726_v9  ;;  %1316 = vmatpush.msra.mxu3 %v862_v10  ;;  %v744_v9 = vld [vmem:[%s2520_s30 + $0x138] sm:$0xff] }
 0x18b   : > { %1230 = vmatpush.msra.mxu0 %v725_v11  ;;  %1258 = vmatpush.msra.mxu1 %v861_v12  ;;  %v880_v10 = vld [vmem:[%s2520_s30 + $0x578] sm:$0xff]  ;;  %v743_v11 = vld [vmem:[%s2520_s30 + $0x130] sm:$0xff] }
 0x18c   : > { %1289 = vmatpush.msra.mxu2 %v718_v13  ;;  %1317 = vmatpush.msra.mxu3 %v854_v14  ;;  %v879_v12 = vld [vmem:[%s2520_s30 + $0x570] sm:$0xff]  ;;  %v736_v13 = vld [vmem:[%s2520_s30 + $0xf8] sm:$0xff] }
 0x18d   : > { %1231 = vmatpush.msra.mxu0 %v717_v15  ;;  %1259 = vmatpush.msra.mxu1 %v853_v17  ;;  %v872_v14 = vld [vmem:[%s2520_s30 + $0x538] sm:$0xff]  ;;  %v735_v15 = vld [vmem:[%s2520_s30 + $0xf0] sm:$0xff] }
 0x18e   : > { %1290 = vmatpush.msra.mxu2 %v710_v18  ;;  %1318 = vmatpush.msra.mxu3 %v846_v19  ;;  %v871_v17 = vld [vmem:[%s2520_s30 + $0x530] sm:$0xff]  ;;  %v728_v18 = vld [vmem:[%s2520_s30 + $0xb8] sm:$0xff] }
 0x18f   : > { %1232 = vmatpush.msra.mxu0 %v709_v20  ;;  %1260 = vmatpush.msra.mxu1 %v845_v22  ;;  %v864_v19 = vld [vmem:[%s2520_s30 + $0x4f8] sm:$0xff]  ;;  %v727_v20 = vld [vmem:[%s2520_s30 + $0xb0] sm:$0xff] }
 0x190   : > { %1233 = vmatmul.f32.vlgmr.msra.gmra.mxu0 %v2587_v62  ;;  %1291 = vmatmul.f32.vlgmr.msra.gmra.mxu2 %v2587_v62  ;;  %v863_v22 = vld [vmem:[%s2520_s30 + $0x4f0] sm:$0xff] }
 0x191   : > { %1319 = vmatpush.msra.mxu3 %v838_v23  ;;  %1391 = vmatpush.msrb.mxu2 %v832_v24  ;;  %v720_v23 = vld [vmem:[%s2520_s30 + $0x78] sm:$0xff] }
 0x192   : > { %1261 = vmatpush.msra.mxu1 %v837_v25  ;;  %1333 = vmatpush.msrb.mxu0 %v831_v26  ;;  %v856_v24 = vld [vmem:[%s2520_s30 + $0x4b8] sm:$0xff]  ;;  %v719_v25 = vld [vmem:[%s2520_s30 + $0x70] sm:$0xff] }
 0x193   : > { %1262 = vmatmul.f32.vlgmr.msra.gmra.mxu1 %v2598_v3  ;;  %1320 = vmatmul.f32.vlgmr.msra.gmra.mxu3 %v2598_v3  ;;  %v855_v26 = vld [vmem:[%s2520_s30 + $0x4b0] sm:$0xff] }
 0x194   : > { %1392 = vmatpush.msrb.mxu2 %v824_v27  ;;  %1420 = vmatpush.msrb.mxu3 %v960_v28  ;;  %v712_v27 = vld [vmem:[%s2520_s30 + $0x38] sm:$0xff] }
 0x195   : > { %1334 = vmatpush.msrb.mxu0 %v823_v29  ;;  %1362 = vmatpush.msrb.mxu1 %v959_v30  ;;  %v848_v28 = vld [vmem:[%s2520_s30 + $0x478] sm:$0xff]  ;;  %v711_v29 = vld [vmem:[%s2520_s30 + $0x30] sm:$0xff] }
 0x196   : > { %1393 = vmatpush.msrb.mxu2 %v816_v31  ;;  %1421 = vmatpush.msrb.mxu3 %v952_v32  ;;  %v847_v30 = vld [vmem:[%s2520_s30 + $0x470] sm:$0xff]  ;;  %v840_v31 = vld [vmem:[%s2520_s30 + $0x438] sm:$0xff] }
 0x197   : > { %1335 = vmatpush.msrb.mxu0 %v815_v33  ;;  %1363 = vmatpush.msrb.mxu1 %v951_v34  ;;  %v839_v32 = vld [vmem:[%s2520_s30 + $0x430] sm:$0xff]  ;;  %s1873_s30 = sshll.u32 %s673_s28, 8  ;;  %s1880_s28 = sshll.u32 (%p1989_p5), %s1864_s15, 6 }
 0x198   : > { %1394 = vmatpush.msrb.mxu2 %v808_v35  ;;  %1422 = vmatpush.msrb.mxu3 %v944_v37  ;;  %s3282_s12 = scalar_lea.vmem [#allocation3], %s1873_s30  ;;  %s3371_s20 = scalar_lea.vmem (%p1989_p5), %s3448_s3, %s1880_s28 }
 0x199   : > { %1336 = vmatpush.msrb.mxu0 %v807_v38  ;;  %1364 = vmatpush.msrb.mxu1 %v943_v39 }
 0x19a   : > { %1236 = vmatmul.f32.gmra.mxu0 %v2617_v16  ;;  %1294 = vmatmul.f32.gmra.mxu2 %v2617_v16 }
 0x19b   : > { %1395 = vmatpush.msrb.mxu2 %v800_v40  ;;  %1423 = vmatpush.msrb.mxu3 %v936_v42 }
 0x19c   : > { %1337 = vmatpush.msrb.mxu0 %v799_v43  ;;  %1365 = vmatpush.msrb.mxu1 %v935_v44 }
 0x19d   : > { %1265 = vmatmul.f32.gmra.mxu1 %v2628_v21  ;;  %1323 = vmatmul.f32.gmra.mxu3 %v2628_v21 }
 0x19e   : > { %1396 = vmatpush.msrb.mxu2 %v792_v45  ;;  %1424 = vmatpush.msrb.mxu3 %v928_v46 }
 0x19f   : > { %1338 = vmatpush.msrb.mxu0 %v791_v47  ;;  %1366 = vmatpush.msrb.mxu1 %v927_v48 }
 0x1a0   : > { %1397 = vmatpush.msrb.mxu2 %v784_v49  ;;  %1425 = vmatpush.msrb.mxu3 %v920_v50 }
 0x1a1   : > { %1339 = vmatpush.msrb.mxu0 %v783_v51  ;;  %1367 = vmatpush.msrb.mxu1 %v919_v52 }
 0x1a2   : > { %1398 = vmatpush.msrb.mxu2 %v776_v53  ;;  %1426 = vmatpush.msrb.mxu3 %v912_v54 }
 0x1a3   : > { %1340 = vmatpush.msrb.mxu0 %v775_v56  ;;  %1368 = vmatpush.msrb.mxu1 %v911_v57 }
 0x1a4   : > { %1239 = vmatmul.f32.gmra.mxu0 %v2651_v36  ;;  %1297 = vmatmul.f32.gmra.mxu2 %v2651_v36 }
 0x1a5   : > { %1399 = vmatpush.msrb.mxu2 %v768_v58  ;;  %1427 = vmatpush.msrb.mxu3 %v904_v59 }
 0x1a6   : > { %1341 = vmatpush.msrb.mxu0 %v767_v61  ;;  %1369 = vmatpush.msrb.mxu1 %v903_v63 }
 0x1a7   : > { %1268 = vmatmul.f32.gmra.mxu1 %v2662_v41  ;;  %1326 = vmatmul.f32.gmra.mxu3 %v2662_v41 }
 0x1a8   : > { %1400 = vmatpush.msrb.mxu2 %v760_v0  ;;  %1428 = vmatpush.msrb.mxu3 %v896_v1 }
 0x1a9   : > { %1342 = vmatpush.msrb.mxu0 %v759_v2  ;;  %1370 = vmatpush.msrb.mxu1 %v895_v4 }
 0x1aa   : > { %1401 = vmatpush.msrb.mxu2 %v752_v5  ;;  %1429 = vmatpush.msrb.mxu3 %v888_v6 }
 0x1ab   : > { %1343 = vmatpush.msrb.mxu0 %v751_v7  ;;  %1371 = vmatpush.msrb.mxu1 %v887_v8 }
 0x1ac   : > { %1402 = vmatpush.msrb.mxu2 %v744_v9  ;;  %1430 = vmatpush.msrb.mxu3 %v880_v10 }
 0x1ad   : > { %1344 = vmatpush.msrb.mxu0 %v743_v11  ;;  %1372 = vmatpush.msrb.mxu1 %v879_v12 }
 0x1ae   : > { %1242 = vmatmul.f32.gmra.mxu0 %v2684_v55  ;;  %1300 = vmatmul.f32.gmra.mxu2 %v2684_v55 }
 0x1af   : > { %1403 = vmatpush.msrb.mxu2 %v736_v13  ;;  %1431 = vmatpush.msrb.mxu3 %v872_v14 }
 0x1b0   : > { %1345 = vmatpush.msrb.mxu0 %v735_v15  ;;  %1373 = vmatpush.msrb.mxu1 %v871_v17 }
 0x1b1   : > { %1271 = vmatmul.f32.gmra.mxu1 %v2694_v60  ;;  %1329 = vmatmul.f32.gmra.mxu3 %v2694_v60 }
 0x1b2   : > { %1404 = vmatpush.msrb.mxu2 %v728_v18  ;;  %1432 = vmatpush.msrb.mxu3 %v864_v19 }
 0x1b3   : > { %1346 = vmatpush.msrb.mxu0 %v727_v20  ;;  %1374 = vmatpush.msrb.mxu1 %v863_v22 }
 0x1b4   : > { %1405 = vmatpush.msrb.mxu2 %v720_v23  ;;  %1433 = vmatpush.msrb.mxu3 %v856_v24 }
 0x1b5   : > { %1347 = vmatpush.msrb.mxu0 %v719_v25  ;;  %1375 = vmatpush.msrb.mxu1 %v855_v26 }
 0x1b6   : > { %1406 = vmatpush.msrb.mxu2 %v712_v27  ;;  %1434 = vmatpush.msrb.mxu3 %v848_v28 }
 0x1b7   : > { %1348 = vmatpush.msrb.mxu0 %v711_v29  ;;  %1376 = vmatpush.msrb.mxu1 %v847_v30 }
 0x1b8   : > { %1349 = vmatmul.f32.vlgmr.msrb.gmra.mxu0 %v2587_v62  ;;  %1407 = vmatmul.f32.vlgmr.msrb.gmra.mxu2 %v2587_v62 }
 0x1b9   : > { %1435 = vmatpush.msrb.mxu3 %v840_v31  ;;  %1377 = vmatpush.msrb.mxu1 %v839_v32 }
 0x1ba   : > { %1378 = vmatmul.f32.vlgmr.msrb.gmra.mxu1 %v2598_v3  ;;  %1436 = vmatmul.f32.vlgmr.msrb.gmra.mxu3 %v2598_v3  ;;  %v1002_v33 = vpop.f32.mrf.mxu0 }
 0x1bd   : > { %v1031_v34 = vpop.f32.mrf.mxu1 }
 0x1c0   : > { %1352 = vmatmul.f32.gmra.mxu0 %v2617_v16  ;;  %1410 = vmatmul.f32.gmra.mxu2 %v2617_v16  ;;  %v1060_v35 = vpop.f32.mrf.mxu2 }
 0x1c2   : > { %1381 = vmatmul.f32.gmra.mxu1 %v2628_v21  ;;  %1439 = vmatmul.f32.gmra.mxu3 %v2628_v21  ;;  %v2888_v37 = vpop.permute.xlu0 %967 }
 0x1c3   : > { %v1061_v62 = vadd.f32 %v1060_v35, %v2888_v37  ;;  %v1003_v38 = vadd.f32 %v1002_v33, %v2888_v37  ;;  %v1089_v39 = vpop.f32.mrf.mxu3 }
 0x1c4   : > { %v1005_v42 = vpop.f32.mrf.mxu0 }
 0x1c5   : > { %v2892_v40 = vadd.f32 %v1031_v34, %v1003_v38  ;;  %v2894_v3 = vadd.f32 %v1089_v39, %v1061_v62 }
 0x1c7   : > { %v1034_v16 = vpop.f32.mrf.mxu1 }
 0x1c8   : > { %1355 = vmatmul.f32.gmra.mxu0 %v2651_v36  ;;  %1413 = vmatmul.f32.gmra.mxu2 %v2651_v36 }
 0x1ca   : > { %1384 = vmatmul.f32.gmra.mxu1 %v2662_v41  ;;  %1442 = vmatmul.f32.gmra.mxu3 %v2662_v41  ;;  %v1063_v21 = vpop.f32.mrf.mxu2 }
 0x1cd   : > { %v2900_v43 = vpop.permute.xlu0 %972  ;;  %v1092_v44 = vpop.f32.mrf.mxu3 }
 0x1ce   : > { %v1064_v45 = vadd.f32 %v1063_v21, %v2900_v43  ;;  %v1006_v46 = vadd.f32 %v1005_v42, %v2900_v43 }
 0x1cf   : > { %v1008_v48 = vpop.f32.mrf.mxu0 }
 0x1d0   : > { %1358 = vmatmul.f32.gmra.mxu0 %v2684_v55  ;;  %1416 = vmatmul.f32.gmra.mxu2 %v2684_v55  ;;  %v2906_v47 = vadd.f32 %v1034_v16, %v1006_v46  ;;  %v2908_v36 = vadd.f32 %v1092_v44, %v1064_v45  ;;  %v1449_v16 = vadd.f32 %v2894_v3, %v2892_v40 }
 0x1d2   : > { %1387 = vmatmul.f32.gmra.mxu1 %v2694_v60  ;;  %1445 = vmatmul.f32.gmra.mxu3 %v2694_v60  ;;  %v1037_v41 = vpop.f32.mrf.mxu1 }
 0x1d5   : > { %v1066_v49 = vpop.f32.mrf.mxu2 }
 0x1d8   : > { %v2912_v50 = vpop.permute.xlu1 %977  ;;  %v1095_v51 = vpop.f32.mrf.mxu3 }
 0x1d9   : > { %v1067_v52 = vadd.f32 %v1066_v49, %v2912_v50  ;;  %v1009_v53 = vadd.f32 %v1008_v48, %v2912_v50  ;;  %v1011_v54 = vpop.f32.mrf.mxu0 }
 0x1db   : > { %v2916_v55 = vadd.f32 %v1037_v41, %v1009_v53  ;;  %v2918_v56 = vadd.f32 %v1095_v51, %v1067_v52 }
 0x1dd   : > { %v1040_v57 = vpop.f32.mrf.mxu1 }
 0x1e0   : > { %v1069_v58 = vpop.f32.mrf.mxu2 }
 0x1e2   : > { %v2920_v59 = vpop.permute.xlu1 %982  ;;  %v1098_v61 = vpop.f32.mrf.mxu3 }
 0x1e3   : > { %v1070_v60 = vadd.f32 %v1069_v58, %v2920_v59  ;;  %v1012_v63 = vadd.f32 %v1011_v54, %v2920_v59 }
 0x1e4   : > { %v1118_v2 = vpop.f32.mrf.mxu0 }
 0x1e5   : > { %v2924_v0 = vadd.f32 %v1040_v57, %v1012_v63  ;;  %v2926_v1 = vadd.f32 %v1098_v61, %v1070_v60  ;;  %v1119_v34 = vadd.f32 %v1118_v2, %v2888_v37  ;;  %v1458_v2 = vadd.f32 %v2908_v36, %v2906_v47 }
 0x1e7   : > { %v1147_v4 = vpop.f32.mrf.mxu1 }
 0x1e8   : > { %v2948_v39 = vadd.f32 %v1147_v4, %v1119_v34 }
 0x1ea   : > { %v1450_v41 = vadd.f32 %v1449_v16, %v2948_v39 }
 0x1eb   : > { %v1176_v5 = vpop.f32.mrf.mxu2 }
 0x1ec   : > { %v1177_v62 = vadd.f32 %v1176_v5, %v2888_v37 }
 0x1ee   : > { %v1205_v6 = vpop.f32.mrf.mxu3 }
 0x1ef   : > { %v1121_v7 = vpop.f32.mrf.mxu0  ;;  %v2953_v21 = vadd.f32 %v1205_v6, %v1177_v62 }
 0x1f0   : > { %v1122_v46 = vadd.f32 %v1121_v7, %v2900_v43 }
 0x1f1   : > { %v1451_v53 = vadd.f32 %v1450_v41, %v2953_v21 }
 0x1f2   : > { %v1150_v8 = vpop.f32.mrf.mxu1 }
 0x1f3   : > { %v2967_v58 = vadd.f32 %v1150_v8, %v1122_v46 }
 0x1f5   : > { %v1179_v9 = vpop.f32.mrf.mxu2  ;;  %v1459_v8 = vadd.f32 %v1458_v2, %v2967_v58 }
 0x1f6   : > { %v1180_v54 = vadd.f32 %v1179_v9, %v2900_v43 }
 0x1f8   : > { %v1208_v10 = vpop.f32.mrf.mxu3 }
 0x1f9   : > { %v1124_v11 = vpop.f32.mrf.mxu0  ;;  %v2975_v5 = vadd.f32 %v1208_v10, %v1180_v54 }
 0x1fc   : > { %v1153_v12 = vpop.f32.mrf.mxu1 }
 0x1ff   : > { %v1182_v13 = vpop.f32.mrf.mxu2 }
 0x202   : > { %v2928_v14 = vpop.f32.mrf.mxu3 }
 0x203   : > { %v2930_v15 = vpop.f32.mrf.mxu0 }
 0x206   : > { %v2932_v17 = vpop.f32.mrf.mxu1 }
 0x209   : > { %v2934_v18 = vpop.f32.mrf.mxu2 }
 0x20c   : > { %v2936_v19 = vpop.f32.mrf.mxu3 }
 0x20d   : > { %v1234_v20 = vpop.f32.mrf.mxu0 }
 0x20e   : > { %v1235_v42 = vadd.f32 %v1234_v20, %v2888_v37  ;;  %v1125_v20 = vadd.f32 %v1124_v11, %v2912_v50 }
 0x210   : > { %v1263_v22 = vpop.f32.mrf.mxu1  ;;  %v2993_v11 = vadd.f32 %v1153_v12, %v1125_v20  ;;  %v1476_v20 = vadd.f32 %v2926_v1, %v2924_v0 }
 0x211   : > { %v2960_v49 = vadd.f32 %v1263_v22, %v1235_v42  ;;  %v1460_v42 = vadd.f32 %v1459_v8, %v2975_v5 }
 0x213   : > { %v1292_v23 = vpop.f32.mrf.mxu2  ;;  %v1452_v61 = vadd.f32 %v1451_v53, %v2960_v49 }
 0x214   : > { %v1293_v44 = vadd.f32 %v1292_v23, %v2888_v37 }
 0x216   : > { %v1321_v24 = vpop.f32.mrf.mxu3 }
 0x217   : > { %v1237_v25 = vpop.f32.mrf.mxu0  ;;  %v2965_v57 = vadd.f32 %v1321_v24, %v1293_v44 }
 0x218   : > { %v1238_v60 = vadd.f32 %v1237_v25, %v2900_v43 }
 0x219   : > { %v1453_v6 = vadd.f32 %v1452_v61, %v2965_v57 }
 0x21a   : > { %v1266_v26 = vpop.f32.mrf.mxu1 }
 0x21b   : > { %v2982_v24 = vadd.f32 %v1266_v26, %v1238_v60 }
 0x21d   : > { %v1295_v27 = vpop.f32.mrf.mxu2  ;;  %v1461_v26 = vadd.f32 %v1460_v42, %v2982_v24 }
 0x21e   : > { %v1296_v7 = vadd.f32 %v1295_v27, %v2900_v43  ;;  %v1183_v27 = vadd.f32 %v1182_v13, %v2912_v50 }
 0x220   : > { %v1324_v28 = vpop.f32.mrf.mxu3 }
 0x221   : > { %v1240_v29 = vpop.f32.mrf.mxu0 }
 0x222   : > { %v1241_v44 = vadd.f32 %v1240_v29, %v2912_v50  ;;  %v1128_v29 = vadd.f32 %v2930_v15, %v2920_v59 }
 0x224   : > { %v1269_v30 = vpop.f32.mrf.mxu1 }
 0x225   : > { %v3010_v61 = vadd.f32 %v1269_v30, %v1241_v44  ;;  %v3024_v30 = vadd.f32 %v2932_v17, %v1128_v29 }
 0x227   : > { %v1298_v31 = vpop.f32.mrf.mxu2 }
 0x22a   : > { %v2938_v32 = vpop.f32.mrf.mxu3 }
 0x22b   : > { %v2940_v33 = vpop.f32.mrf.mxu0 }
 0x22e   : > { %v2943_v35 = vpop.f32.mrf.mxu1 }
 0x231   : > { %v2946_v38 = vpop.f32.mrf.mxu2 }
 0x232   : > { %v1302_v17 = vadd.f32 %v2946_v38, %v2920_v59 }
 0x234   : > { %v2956_v45 = vpop.f32.mrf.mxu3 }
 0x235   : > { %v1350_v48 = vpop.f32.mrf.mxu0  ;;  %v3050_v38 = vadd.f32 %v2956_v45, %v1302_v17 }
 0x236   : > { %v1351_v51 = vadd.f32 %v1350_v48, %v2888_v37  ;;  %v1467_v48 = vadd.f32 %v2918_v56, %v2916_v55 }
 0x237   : > { %v1379_v52 = vpop.f32.mrf.mxu1 }
 0x238   : > { %v2971_v63 = vadd.f32 %v1379_v52, %v1351_v51  ;;  %v3002_v51 = vadd.f32 %v2928_v14, %v1183_v27  ;;  %v1468_v52 = vadd.f32 %v1467_v48, %v2993_v11 }
 0x23a   : > { %v1454_v10 = vadd.f32 %v1453_v6, %v2971_v63 }
 0x23b   : > { %v1408_v4 = vpop.f32.mrf.mxu2 }
 0x23c   : > { %v1409_v9 = vadd.f32 %v1408_v4, %v2888_v37  ;;  %v2990_v37 = vadd.f32 %v1324_v28, %v1296_v7  ;;  %v1299_v28 = vadd.f32 %v1298_v31, %v2912_v50  ;;  %v1469_v31 = vadd.f32 %v1468_v52, %v3002_v51 }
 0x23d   : > { %v1353_v22 = vpop.f32.mrf.mxu0  ;;  %v1437_v23 = vpop.f32.mrf.mxu3 }
 0x23e   : > { %v1354_v25 = vadd.f32 %v1353_v22, %v2900_v43  ;;  %v2985_v34 = vadd.f32 %v1437_v23, %v1409_v9  ;;  %v1462_v13 = vadd.f32 %v1461_v26, %v2990_v37  ;;  %v3020_v6 = vadd.f32 %v2938_v32, %v1299_v28 }
 0x23f   : > { %v1382_v62 = vpop.f32.mrf.mxu1  ;;  %v1470_v7 = vadd.f32 %v1469_v31, %v3010_v61  ;;  %v1244_v9 = vadd.f32 %v2940_v33, %v2920_v59 }
 0x240   : > { %v1455_v16 = vadd.f32 %v1454_v10, %v2985_v34  ;;  %v2997_v46 = vadd.f32 %v1382_v62, %v1354_v25  ;;  %v1477_v25 = vadd.f32 %v1476_v20, %v3024_v30 }
 0x241   : > { %v1471_v22 = vadd.f32 %v1470_v7, %v3020_v6  ;;  %v3042_v62 = vadd.f32 %v2943_v35, %v1244_v9 }
 0x242   : > { %1456 = vadd.xlane.f32.xlu2 %v1455_v16  ;;  %v1463_v60 = vadd.f32 %v1462_v13, %v2997_v46 }
 0x243   : > { %v1411_v41 = vpop.f32.mrf.mxu2 }
 0x244   : > { %v1412_v12 = vadd.f32 %v1411_v41, %v2900_v43  ;;  %v1186_v43 = vadd.f32 %v2934_v18, %v2920_v59 }
 0x245   : > { %v1356_v53 = vpop.f32.mrf.mxu0  ;;  %v1440_v54 = vpop.f32.mrf.mxu3 }
 0x246   : > { %v1357_v14 = vadd.f32 %v1356_v53, %v2912_v50  ;;  %v3014_v2 = vadd.f32 %v1440_v54, %v1412_v12  ;;  %v3034_v32 = vadd.f32 %v2936_v19, %v1186_v43  ;;  %v1938_v53 = vmov 32768.0  }
 0x247   : > { %v1385_v4 = vpop.f32.mrf.mxu1  ;;  %1909 = vrcp.f32 %v1938_v53 }
 0x248   : > { %v1464_v15 = vadd.f32 %v1463_v60, %v3014_v2  ;;  %v3029_v8 = vadd.f32 %v1385_v4, %v1357_v14  ;;  %v1478_v26 = vadd.f32 %v1477_v25, %v3034_v32 }
 0x24a   : > { %1465 = vadd.xlane.f32.xlu2 %v1464_v15  ;;  %v1472_v42 = vadd.f32 %v1471_v22, %v3029_v8  ;;  %v1479_v44 = vadd.f32 %v1478_v26, %v3042_v62 }
 0x24b   : > { %v1414_v18 = vpop.f32.mrf.mxu2 }
 0x24c   : > { %v1415_v23 = vadd.f32 %v1414_v18, %v2912_v50  ;;  %v1480_v41 = vadd.f32 %v1479_v44, %v3050_v38 }
 0x24d   : > { %v1359_v33 = vpop.f32.mrf.mxu0  ;;  %v1443_v10 = vpop.f32.mrf.mxu3 }
 0x24e   : > { %v1360_v27 = vadd.f32 %v1359_v33, %v2920_v59  ;;  %v3046_v19 = vadd.f32 %v1443_v10, %v1415_v23  ;;  %v1910_v60 = vpop.eup %1909 }
 0x24f   : > { %v1388_v16 = vpop.f32.mrf.mxu1  ;;  %v1495_v31 = vmul.f32 32768.0, %v1910_v60  ;;  %vm1499_vm0 = vweird.f32 %v1910_v60 }
 0x250   : > { %v1473_v50 = vadd.f32 %v1472_v42, %v3046_v19  ;;  %v3054_v48 = vadd.f32 %v1388_v16, %v1360_v27 }
 0x252   : > { %1474 = vadd.xlane.f32.xlu0 %v1473_v50  ;;  %v1481_v12 = vadd.f32 %v1480_v41, %v3054_v48 }
 0x253   : > { %v1417_v35 = vpop.f32.mrf.mxu2 }
 0x254   : > { %v1418_v13 = vadd.f32 %v1417_v35, %v2920_v59  ;;  %v1496_v59 = vsub.f32 1.0, %v1495_v31 }
 0x255   : > { %v1446_v28 = vpop.f32.mrf.mxu3 }
 0x256   : > { %v3059_v52 = vadd.f32 %v1446_v28, %v1418_v13  ;;  %v1497_v18 = vmul.f32 %v1910_v60, %v1496_v59 }
 0x258   : > { %v1482_v45 = vadd.f32 %v1481_v12, %v3059_v52  ;;  %v1498_v23 = vadd.f32 %v1910_v60, %v1497_v18 }
 0x25a   : > { %1483 = vadd.xlane.f32.xlu1 %v1482_v45  ;;  %v3062_v10 = vsel %vm1499_vm0, %v1910_v60, %v1498_v23 }
 0x2b5   : > { %v1457_v29 = vpop.xlane.xlu2 %1456 }
 0x2bd   : > { %v1466_v54 = vpop.xlane.xlu2 %1465 }
 0x2be   : > { %v1485_v4 = vadd.f32 %v1466_v54, %v1457_v29 }
 0x2c5   : > { %v1475_v14 = vpop.xlane.xlu0 %1474 }
 0x2c6   : > { %v1486_v43 = vadd.f32 %v1485_v4, %v1475_v14 }
 0x2cd   : > { %v1484_v15 = vpop.xlane.xlu1 %1483 }
 0x2ce   : > { %v1487_v7 = vadd.f32 %v1486_v43, %v1484_v15 }
 0x2d0   : > { %v1488_v9 = vrot.slane %v1487_v7, 4 }
 0x2d2   : > { %v1489_v20 = vadd.f32 %v1488_v9, %v1487_v7 }
 0x2d4   : > { %v1490_v22 = vrot.slane %v1489_v20, 2 }
 0x2d6   : > { %v1491_v17 = vadd.f32 %v1490_v22, %v1489_v20 }
 0x2d8   : > { %v1492_v25 = vrot.slane %v1491_v17, 1 }
 0x2da   : > { %v1493_v33 = vadd.f32 %v1492_v25, %v1491_v17 }
 0x2dc   : > { %v3065_v42 = vmul.f32 %v3062_v10, %v1493_v33 }
 0x2de   : > { %v3069_v27 = vsub.f32 %v2892_v40, %v3065_v42  ;;  %v3073_v16 = vsub.f32 %v2894_v3, %v3065_v42  ;;  %v3077_v26 = vsub.f32 %v2948_v39, %v3065_v42  ;;  %v3081_v50 = vsub.f32 %v2953_v21, %v3065_v42 }
 0x2df   : > { %v3085_v44 = vsub.f32 %v2906_v47, %v3065_v42  ;;  %v3089_v40 = vsub.f32 %v2908_v36, %v3065_v42  ;;  %v3093_v3 = vsub.f32 %v2916_v55, %v3065_v42  ;;  %v3097_v39 = vsub.f32 %v2918_v56, %v3065_v42 }
 0x2e0   : > { %v1534_v21 = vmul.f32 %v3069_v27, %v3069_v27  ;;  %v1535_v35 = vmul.f32 %v3073_v16, %v3073_v16  ;;  %v3105_v47 = vsub.f32 %v2960_v49, %v3065_v42  ;;  %v3109_v36 = vsub.f32 %v2965_v57, %v3065_v42 }
 0x2e1   : > { %v1536_v55 = vmul.f32 %v3077_v26, %v3077_v26  ;;  %v3115_v56 = vsub.f32 %v2967_v58, %v3065_v42  ;;  %v3119_v13 = vsub.f32 %v2993_v11, %v3065_v42  ;;  %v1537_v49 = vmul.f32 %v3081_v50, %v3081_v50 }
 0x2e2   : > { %v1566_v41 = vadd.f32 %v1535_v35, %v1534_v21  ;;  %v1542_v28 = vmul.f32 %v3085_v44, %v3085_v44  ;;  %v1543_v12 = vmul.f32 %v3089_v40, %v3089_v40  ;;  %v1550_v45 = vmul.f32 %v3093_v3, %v3093_v3 }
 0x2e3   : > { %v1551_v58 = vmul.f32 %v3097_v39, %v3097_v39  ;;  %v3133_v11 = vsub.f32 %v2971_v63, %v3065_v42  ;;  %v3137_v29 = vsub.f32 %v2975_v5, %v3065_v42  ;;  %v3141_v53 = vsub.f32 %v2924_v0, %v3065_v42 }
 0x2e4   : > { %v1567_v57 = vadd.f32 %v1566_v41, %v1536_v55  ;;  %v3145_v54 = vsub.f32 %v2985_v34, %v3065_v42  ;;  %v3149_v60 = vsub.f32 %v2926_v1, %v3065_v42  ;;  %v1538_v63 = vmul.f32 %v3105_v47, %v3105_v47 }
 0x2e5   : > { %v3155_v5 = vsub.f32 %v2982_v24, %v3065_v42  ;;  %v3159_v0 = vsub.f32 %v3002_v51, %v3065_v42  ;;  %v1539_v34 = vmul.f32 %v3109_v36, %v3109_v36  ;;  %v1544_v4 = vmul.f32 %v3115_v56, %v3115_v56 }
 0x2e6   : > { %v1568_v14 = vadd.f32 %v1567_v57, %v1537_v49  ;;  %v1552_v31 = vmul.f32 %v3119_v13, %v3119_v13  ;;  %v1575_v43 = vadd.f32 %v1543_v12, %v1542_v28  ;;  %v1584_v15 = vadd.f32 %v1551_v58, %v1550_v45 }
 0x2e7   : > { %v3169_v24 = vsub.f32 %v2990_v37, %v3065_v42  ;;  %v1540_v51 = vmul.f32 %v3133_v11, %v3133_v11  ;;  %v1545_v7 = vmul.f32 %v3137_v29, %v3137_v29  ;;  %v1558_v59 = vmul.f32 %v3141_v53, %v3141_v53 }
 0x2e8   : > { %v1569_v1 = vadd.f32 %v1568_v14, %v1538_v63  ;;  %v1559_v20 = vmul.f32 %v3149_v60, %v3149_v60  ;;  %v1576_v18 = vadd.f32 %v1575_v43, %v1544_v4  ;;  %v1585_v22 = vadd.f32 %v1584_v15, %v1552_v31 }
 0x2e9   : > { %v3181_v17 = vsub.f32 %v2997_v46, %v3065_v42  ;;  %v3185_v37 = vsub.f32 %v3010_v61, %v3065_v42  ;;  %v3189_v23 = vsub.f32 %v3024_v30, %v3065_v42  ;;  %v1541_v25 = vmul.f32 %v3145_v54, %v3145_v54 }
 0x2ea   : > { %v1570_v9 = vadd.f32 %v1569_v1, %v1539_v34  ;;  %v1546_v21 = vmul.f32 %v3155_v5, %v3155_v5  ;;  %v1553_v35 = vmul.f32 %v3159_v0, %v3159_v0  ;;  %v1577_v46 = vadd.f32 %v1576_v18, %v1545_v7 }
 0x2eb   : > { %v1547_v55 = vmul.f32 %v3169_v24, %v3169_v24  ;;  %v1593_v49 = vadd.f32 %v1559_v20, %v1558_v59  ;;  %v3201_v30 = vsub.f32 %v3014_v2, %v3065_v42  ;;  %v3205_v57 = vsub.f32 %v3020_v6, %v3065_v42 }
 0x2ec   : > { %v1571_v33 = vadd.f32 %v1570_v9, %v1540_v51  ;;  %v1578_v41 = vadd.f32 %v1577_v46, %v1546_v21  ;;  %v1586_v28 = vadd.f32 %v1585_v22, %v1553_v35  ;;  %v3209_v12 = vsub.f32 %v3034_v32, %v3065_v42 }
 0x2ed   : > { %v1548_v45 = vmul.f32 %v3181_v17, %v3181_v17  ;;  %v1554_v58 = vmul.f32 %v3185_v37, %v3185_v37  ;;  %v1560_v63 = vmul.f32 %v3189_v23, %v3189_v23  ;;  %v3219_v6 = vsub.f32 %v3029_v8, %v3065_v42 }
 0x2ee   : > { %v1572_v61 = vadd.f32 %v1571_v33, %v1541_v25  ;;  %v1579_v2 = vadd.f32 %v1578_v41, %v1547_v55  ;;  %v3223_v32 = vsub.f32 %v3042_v62, %v3065_v42  ;;  %v1555_v1 = vmul.f32 %v3205_v57, %v3205_v57 }
 0x2ef   : > { %v1587_v34 = vadd.f32 %v1586_v28, %v1554_v58  ;;  %v1594_v4 = vadd.f32 %v1593_v49, %v1560_v63  ;;  %v1561_v31 = vmul.f32 %v3209_v12, %v3209_v12  ;;  %v1549_v43 = vmul.f32 %v3201_v30, %v3201_v30 }
 0x2f0   : > { %1573 = vadd.xlane.f32.xlu2 %v1572_v61  ;;  %v1580_v14 = vadd.f32 %v1579_v2, %v1548_v45  ;;  %v3233_v8 = vsub.f32 %v3046_v19, %v3065_v42  ;;  %v3237_v62 = vsub.f32 %v3050_v38, %v3065_v42  ;;  %v1556_v59 = vmul.f32 %v3219_v6, %v3219_v6 }
 0x2f1   : > { %v1588_v51 = vadd.f32 %v1587_v34, %v1555_v1  ;;  %v1595_v7 = vadd.f32 %v1594_v4, %v1561_v31  ;;  %v1562_v9 = vmul.f32 %v3223_v32, %v3223_v32  ;;  %v3245_v22 = vsub.f32 %v3054_v48, %v3065_v42 }
 0x2f2   : > { %v1581_v15 = vadd.f32 %v1580_v14, %v1549_v43  ;;  %v1563_v19 = vmul.f32 %v3237_v62, %v3237_v62  ;;  %v1557_v38 = vmul.f32 %v3233_v8, %v3233_v8  ;;  %v3253_v21 = vsub.f32 %v3059_v52, %v3065_v42 }
 0x2f3   : > { %v1589_v20 = vadd.f32 %v1588_v51, %v1556_v59  ;;  %v1596_v18 = vadd.f32 %v1595_v7, %v1562_v9  ;;  %v1564_v35 = vmul.f32 %v3245_v22, %v3245_v22 }
 0x2f4   : > { %v1565_v48 = vmul.f32 %v3253_v21, %v3253_v21 }
 0x2f5   : > { %v1590_v25 = vadd.f32 %v1589_v20, %v1557_v38  ;;  %v1597_v33 = vadd.f32 %v1596_v18, %v1563_v19 }
 0x2f7   : > { %v1598_v46 = vadd.f32 %v1597_v33, %v1564_v35 }
 0x2f8   : > { %1582 = vadd.xlane.f32.xlu2 %v1581_v15 }
 0x2f9   : > { %v1599_v55 = vadd.f32 %v1598_v46, %v1565_v48 }
 0x300   : > { %1591 = vadd.xlane.f32.xlu2 %v1590_v25 }
 0x308   : > { %1600 = vadd.xlane.f32.xlu2 %v1599_v55 }
 0x363   : > { %v1574_v61 = vpop.xlane.xlu2 %1573 }
 0x36b   : > { %v1583_v41 = vpop.xlane.xlu2 %1582 }
 0x36c   : > { %v1602_v28 = vadd.f32 %v1583_v41, %v1574_v61 }
 0x373   : > { %v1592_v49 = vpop.xlane.xlu2 %1591 }
 0x374   : > { %v1603_v45 = vadd.f32 %v1602_v28, %v1592_v49 }
 0x37b   : > { %v1601_v58 = vpop.xlane.xlu2 %1600 }
 0x37c   : > { %v1604_v63 = vadd.f32 %v1603_v45, %v1601_v58 }
 0x37e   : > { %v1605_v2 = vrot.slane %v1604_v63, 4 }
 0x380   : > { %v1606_v52 = vadd.f32 %v1605_v2, %v1604_v63 }
 0x382   : > { %v1607_v42 = vrot.slane %v1606_v52, 2 }
 0x384   : > { %v1608_v14 = vadd.f32 %v1607_v42, %v1606_v52 }
 0x386   : > { %v1609_v34 = vrot.slane %v1608_v14, 1 }
 0x388   : > { %v1610_v4 = vadd.f32 %v1609_v34, %v1608_v14 }
 0x38a   : > { %v1611_v1 = vmul.f32 %v1610_v4, %v3062_v10 }
 0x38c   : > { %v1612_v31 = vadd.f32 1e-05, %v1611_v1 }
 0x38e   : > { %1911 = vrsqrt.f32 %v1612_v31  ;;  %vm1619_vm2 = vweird.f32 %v1612_v31 }
 0x394   : > { %v1912_v43 = vpop.eup %1911 }
 0x395   : > { %v1614_v15 = vmul.f32 %v1912_v43, %v1612_v31  ;;  %vm1620_vm1 = vweird.f32 %v1912_v43 }
 0x396   : > { %vm1621_vm3 = vmor %vm1619_vm2, %vm1620_vm1 }
 0x397   : > { %v1615_v51 = vmul.f32 %v1912_v43, %v1614_v15 }
 0x399   : > { %v1616_v7 = vmul.f32 0.5, %v1615_v51 }
 0x39b   : > { %v1617_v59 = vsub.f32 1.5, %v1616_v7 }
 0x39d   : > { %v1618_v9 = vmul.f32 %v1912_v43, %v1617_v59 }
 0x39f   : > { %v3260_v20 = vsel %vm1621_vm3, %v1912_v43, %v1618_v9 }
 0x3a0   : > { %v1623_v18 = vmul.f32 %v3260_v20, %v3069_v27  ;;  %v1624_v10 = vmul.f32 %v3260_v20, %v3073_v16  ;;  %v1625_v19 = vmul.f32 %v3260_v20, %v3077_v26  ;;  %v1626_v38 = vmul.f32 %v3260_v20, %v3081_v50 }
 0x3a1   : > { %v1627_v25 = vmul.f32 %v3260_v20, %v3105_v47  ;;  %v1628_v33 = vmul.f32 %v3260_v20, %v3109_v36  ;;  %v1629_v35 = vmul.f32 %v3260_v20, %v3133_v11  ;;  %v1630_v16 = vmul.f32 %v3260_v20, %v3145_v54 }
 0x3a2   : > { %v1655_v46 = vmax.f32 %v1623_v18, 0.0  ;;  %v1656_v27 = vmax.f32 %v1624_v10, 0.0  ;;  %v1657_v48 = vmax.f32 %v1625_v19, 0.0  ;;  %v1658_v55 = vmax.f32 %v1626_v38, 0.0 }
 0x3a3   : > { %v1631_v26 = vmul.f32 %v3260_v20, %v3085_v44  ;;  %v1659_v50 = vmax.f32 %v1627_v25, 0.0  ;;  %v1632_v47 = vmul.f32 %v3260_v20, %v3089_v40  ;;  %v1660_v36 = vmax.f32 %v1628_v33, 0.0 }
 0x3a4   : > { %1687 = vst [vmem:[%s3282_s12] sm:$0xff] %v1655_v46  ;;  %v1633_v11 = vmul.f32 %v3260_v20, %v3115_v56  ;;  %v1661_v44 = vmax.f32 %v1629_v35, 0.0  ;;  %v1634_v54 = vmul.f32 %v3260_v20, %v3137_v29  ;;  %v1662_v61 = vmax.f32 %v1630_v16, 0.0 }
 0x3a5   : > { %1688 = vst [vmem:[%s3282_s12 + $0x8] sm:$0xff] %v1656_v27  ;;  %v1635_v41 = vmul.f32 %v3260_v20, %v3155_v5  ;;  %v1663_v49 = vmax.f32 %v1631_v26, 0.0  ;;  %v1636_v40 = vmul.f32 %v3260_v20, %v3169_v24  ;;  %v1664_v28 = vmax.f32 %v1632_v47, 0.0 }
 0x3a6   : > { %1689 = vst [vmem:[%s3282_s12 + $0x10] sm:$0xff] %v1657_v48  ;;  %v1637_v56 = vmul.f32 %v3260_v20, %v3181_v17  ;;  %v1665_v45 = vmax.f32 %v1633_v11, 0.0  ;;  %v1638_v29 = vmul.f32 %v3260_v20, %v3201_v30  ;;  %v1666_v58 = vmax.f32 %v1634_v54, 0.0 }
 0x3a7   : > { %1690 = vst [vmem:[%s3282_s12 + $0x18] sm:$0xff] %v1658_v55  ;;  %v1639_v5 = vmul.f32 %v3260_v20, %v3093_v3  ;;  %v1667_v63 = vmax.f32 %v1635_v41, 0.0  ;;  %v1640_v24 = vmul.f32 %v3260_v20, %v3097_v39  ;;  %v1668_v2 = vmax.f32 %v1636_v40, 0.0 }
 0x3a8   : > { %1691 = vst [vmem:[%s3282_s12 + $0x20] sm:$0xff] %v1659_v50  ;;  %v1641_v17 = vmul.f32 %v3260_v20, %v3119_v13  ;;  %v1669_v52 = vmax.f32 %v1637_v56, 0.0  ;;  %v1642_v30 = vmul.f32 %v3260_v20, %v3159_v0  ;;  %v1670_v42 = vmax.f32 %v1638_v29, 0.0 }
 0x3a9   : > { %1692 = vst [vmem:[%s3282_s12 + $0x28] sm:$0xff] %v1660_v36  ;;  %v1643_v3 = vmul.f32 %v3260_v20, %v3185_v37  ;;  %v1671_v14 = vmax.f32 %v1639_v5, 0.0  ;;  %v1644_v39 = vmul.f32 %v3260_v20, %v3205_v57  ;;  %v1672_v34 = vmax.f32 %v1640_v24, 0.0 }
 0x3aa   : > { %1693 = vst [vmem:[%s3282_s12 + $0x30] sm:$0xff] %v1661_v44  ;;  %v1645_v13 = vmul.f32 %v3260_v20, %v3219_v6  ;;  %v1673_v4 = vmax.f32 %v1641_v17, 0.0  ;;  %v1646_v0 = vmul.f32 %v3260_v20, %v3233_v8  ;;  %v1674_v1 = vmax.f32 %v1642_v30, 0.0 }
 0x3ab   : > { %1694 = vst [vmem:[%s3282_s12 + $0x38] sm:$0xff] %v1662_v61  ;;  %v1647_v37 = vmul.f32 %v3260_v20, %v3141_v53  ;;  %v1675_v31 = vmax.f32 %v1643_v3, 0.0  ;;  %v1648_v57 = vmul.f32 %v3260_v20, %v3149_v60  ;;  %v1676_v43 = vmax.f32 %v1644_v39, 0.0 }
 0x3ac   : > { %1695 = vst [vmem:[%s3282_s12 + $0x40] sm:$0xff] %v1663_v49  ;;  %v1649_v6 = vmul.f32 %v3260_v20, %v3189_v23  ;;  %v1677_v15 = vmax.f32 %v1645_v13, 0.0  ;;  %v1650_v8 = vmul.f32 %v3260_v20, %v3209_v12  ;;  %v1678_v53 = vmax.f32 %v1646_v0, 0.0 }
 0x3ad   : > { %1696 = vst [vmem:[%s3282_s12 + $0x48] sm:$0xff] %v1664_v28  ;;  %v1651_v51 = vmul.f32 %v3260_v20, %v3223_v32  ;;  %v1679_v60 = vmax.f32 %v1647_v37, 0.0  ;;  %v1652_v7 = vmul.f32 %v3260_v20, %v3237_v62  ;;  %v1680_v23 = vmax.f32 %v1648_v57, 0.0 }
 0x3ae   : > { %1697 = vst [vmem:[%s3282_s12 + $0x50] sm:$0xff] %v1665_v45  ;;  %v1653_v12 = vmul.f32 %v3260_v20, %v3245_v22  ;;  %v1681_v59 = vmax.f32 %v1649_v6, 0.0  ;;  %v1654_v32 = vmul.f32 %v3260_v20, %v3253_v21  ;;  %v1682_v9 = vmax.f32 %v1650_v8, 0.0  ;;  %v1741_v22 = vld [vmem:[%s3282_s12] sm:$0xff] (%p1989_p5)  ;;  %v1743_v21 = vld [vmem:[%s3282_s12 + $0x8] sm:$0xff] (%p1989_p5)  ;;  %v1745_v20 = vld [vmem:[%s3282_s12 + $0x10] sm:$0xff] (%p1989_p5) }
 0x3af   : > { %1698 = vst [vmem:[%s3282_s12 + $0x58] sm:$0xff] %v1666_v58  ;;  %v1683_v18 = vmax.f32 %v1651_v51, 0.0  ;;  %v1684_v62 = vmax.f32 %v1652_v7, 0.0  ;;  %v1747_v38 = vld [vmem:[%s3282_s12 + $0x18] sm:$0xff] (%p1989_p5)  ;;  %v1749_v25 = vld [vmem:[%s3282_s12 + $0x20] sm:$0xff] (%p1989_p5) }
 0x3b0   : > { %1699 = vst [vmem:[%s3282_s12 + $0x60] sm:$0xff] %v1667_v63  ;;  %v1685_v10 = vmax.f32 %v1653_v12, 0.0  ;;  %v1686_v19 = vmax.f32 %v1654_v32, 0.0  ;;  %v1751_v33 = vld [vmem:[%s3282_s12 + $0x28] sm:$0xff] (%p1989_p5) }
 0x3b1   : > { %1700 = vst [vmem:[%s3282_s12 + $0x68] sm:$0xff] %v1668_v2  ;;  %v1753_v35 = vld [vmem:[%s3282_s12 + $0x30] sm:$0xff] (%p1989_p5) }
 0x3b2   : > { %1701 = vst [vmem:[%s3282_s12 + $0x70] sm:$0xff] %v1669_v52  ;;  %v1755_v46 = vld [vmem:[%s3282_s12 + $0x38] sm:$0xff] (%p1989_p5) }
 0x3b3   : > { %1702 = vst [vmem:[%s3282_s12 + $0x78] sm:$0xff] %v1670_v42  ;;  %v1757_v27 = vld [vmem:[%s3282_s12 + $0x40] sm:$0xff] (%p1989_p5) }
 0x3b4   : > { %1703 = vst [vmem:[%s3282_s12 + $0x80] sm:$0xff] %v1671_v14  ;;  %v1759_v48 = vld [vmem:[%s3282_s12 + $0x48] sm:$0xff] (%p1989_p5) }
 0x3b5   : > { %1704 = vst [vmem:[%s3282_s12 + $0x88] sm:$0xff] %v1672_v34  ;;  %v1761_v16 = vld [vmem:[%s3282_s12 + $0x50] sm:$0xff] (%p1989_p5) }
 0x3b6   : > { %1705 = vst [vmem:[%s3282_s12 + $0x90] sm:$0xff] %v1673_v4  ;;  %v1763_v55 = vld [vmem:[%s3282_s12 + $0x58] sm:$0xff] (%p1989_p5) }
 0x3b7   : > { %1706 = vst [vmem:[%s3282_s12 + $0x98] sm:$0xff] %v1674_v1  ;;  %v1765_v26 = vld [vmem:[%s3282_s12 + $0x60] sm:$0xff] (%p1989_p5) }
 0x3b8   : > { %1707 = vst [vmem:[%s3282_s12 + $0xa0] sm:$0xff] %v1675_v31  ;;  %v1767_v50 = vld [vmem:[%s3282_s12 + $0x68] sm:$0xff] (%p1989_p5) }
 0x3b9   : > { %1708 = vst [vmem:[%s3282_s12 + $0xa8] sm:$0xff] %v1676_v43  ;;  %v1769_v47 = vld [vmem:[%s3282_s12 + $0x70] sm:$0xff] (%p1989_p5) }
 0x3ba   : > { %1709 = vst [vmem:[%s3282_s12 + $0xb0] sm:$0xff] %v1677_v15  ;;  %v1771_v36 = vld [vmem:[%s3282_s12 + $0x78] sm:$0xff] (%p1989_p5) }
 0x3bb   : > { %1710 = vst [vmem:[%s3282_s12 + $0xb8] sm:$0xff] %v1678_v53  ;;  %v1773_v11 = vld [vmem:[%s3282_s12 + $0x80] sm:$0xff] (%p1989_p5) }
 0x3bc   : > { %1711 = vst [vmem:[%s3282_s12 + $0xc0] sm:$0xff] %v1679_v60  ;;  %v1775_v44 = vld [vmem:[%s3282_s12 + $0x88] sm:$0xff] (%p1989_p5) }
 0x3bd   : > { %1712 = vst [vmem:[%s3282_s12 + $0xc8] sm:$0xff] %v1680_v23  ;;  %v1777_v54 = vld [vmem:[%s3282_s12 + $0x90] sm:$0xff] (%p1989_p5) }
 0x3be   : > { %1713 = vst [vmem:[%s3282_s12 + $0xd0] sm:$0xff] %v1681_v59  ;;  %v1779_v61 = vld [vmem:[%s3282_s12 + $0x98] sm:$0xff] (%p1989_p5) }
 0x3bf   : > { %1714 = vst [vmem:[%s3282_s12 + $0xd8] sm:$0xff] %v1682_v9  ;;  %1725 = sbr.rel (!%p1989_p5) target bundleno = 996 (0x3e4), region = 59  ;;  %v1781_v41 = vld [vmem:[%s3282_s12 + $0xa0] sm:$0xff] (%p1989_p5) }
 0x3c0   : > { %1715 = vst [vmem:[%s3282_s12 + $0xe0] sm:$0xff] %v1683_v18  ;;  %v1783_v49 = vld [vmem:[%s3282_s12 + $0xa8] sm:$0xff] (%p1989_p5) }
 0x3c1   : > { %1716 = vst [vmem:[%s3282_s12 + $0xe8] sm:$0xff] %v1684_v62  ;;  %v1785_v40 = vld [vmem:[%s3282_s12 + $0xb0] sm:$0xff] (%p1989_p5) }
 0x3c2   : > { %1717 = vst [vmem:[%s3282_s12 + $0xf0] sm:$0xff] %v1685_v10  ;;  %v1787_v28 = vld [vmem:[%s3282_s12 + $0xb8] sm:$0xff] (%p1989_p5) }
 0x3c3   : > { %1718 = vst [vmem:[%s3282_s12 + $0xf8] sm:$0xff] %v1686_v19  ;;  %v1789_v56 = vld [vmem:[%s3282_s12 + $0xc0] sm:$0xff] (%p1989_p5) }
 0x3c4   : > { %1742 = vst [vmem:[%s3371_s20] sm:$0xff] %v1741_v22  ;;  %v1791_v45 = vld [vmem:[%s3282_s12 + $0xc8] sm:$0xff] }
 0x3c5   : > { %1744 = vst [vmem:[%s3371_s20 + $0x8] sm:$0xff] %v1743_v21  ;;  %v1793_v29 = vld [vmem:[%s3282_s12 + $0xd0] sm:$0xff] }
 0x3c6   : > { %1746 = vst [vmem:[%s3371_s20 + $0x10] sm:$0xff] %v1745_v20  ;;  %v1795_v58 = vld [vmem:[%s3282_s12 + $0xd8] sm:$0xff] }
 0x3c7   : > { %1748 = vst [vmem:[%s3371_s20 + $0x18] sm:$0xff] %v1747_v38  ;;  %v1797_v5 = vld [vmem:[%s3282_s12 + $0xe0] sm:$0xff] }
 0x3c8   : > { %1750 = vst [vmem:[%s3371_s20 + $0x20] sm:$0xff] %v1749_v25  ;;  %v1799_v63 = vld [vmem:[%s3282_s12 + $0xe8] sm:$0xff] }
 0x3c9   : > { %1752 = vst [vmem:[%s3371_s20 + $0x28] sm:$0xff] %v1751_v33  ;;  %v1801_v24 = vld [vmem:[%s3282_s12 + $0xf0] sm:$0xff] }
 0x3ca   : > { %1754 = vst [vmem:[%s3371_s20 + $0x30] sm:$0xff] %v1753_v35  ;;  %v1803_v2 = vld [vmem:[%s3282_s12 + $0xf8] sm:$0xff] }
 0x3cb   : > { %1756 = vst [vmem:[%s3371_s20 + $0x38] sm:$0xff] %v1755_v46 }
 0x3cc   : > { %1758 = vst [vmem:[%s3371_s20 + $0x80] sm:$0xff] %v1757_v27 }
 0x3cd   : > { %1760 = vst [vmem:[%s3371_s20 + $0x88] sm:$0xff] %v1759_v48 }
 0x3ce   : > { %1762 = vst [vmem:[%s3371_s20 + $0x90] sm:$0xff] %v1761_v16 }
 0x3cf   : > { %1764 = vst [vmem:[%s3371_s20 + $0x98] sm:$0xff] %v1763_v55 }
 0x3d0   : > { %1766 = vst [vmem:[%s3371_s20 + $0xa0] sm:$0xff] %v1765_v26 }
 0x3d1   : > { %1768 = vst [vmem:[%s3371_s20 + $0xa8] sm:$0xff] %v1767_v50 }
 0x3d2   : > { %1770 = vst [vmem:[%s3371_s20 + $0xb0] sm:$0xff] %v1769_v47 }
 0x3d3   : > { %1772 = vst [vmem:[%s3371_s20 + $0xb8] sm:$0xff] %v1771_v36 }
 0x3d4   : > { %1774 = vst [vmem:[%s3371_s20 + $0x100] sm:$0xff] %v1773_v11 }
 0x3d5   : > { %1776 = vst [vmem:[%s3371_s20 + $0x108] sm:$0xff] %v1775_v44 }
 0x3d6   : > { %1778 = vst [vmem:[%s3371_s20 + $0x110] sm:$0xff] %v1777_v54 }
 0x3d7   : > { %1780 = vst [vmem:[%s3371_s20 + $0x118] sm:$0xff] %v1779_v61 }
 0x3d8   : > { %1782 = vst [vmem:[%s3371_s20 + $0x120] sm:$0xff] %v1781_v41 }
 0x3d9   : > { %1784 = vst [vmem:[%s3371_s20 + $0x128] sm:$0xff] %v1783_v49 }
 0x3da   : > { %1786 = vst [vmem:[%s3371_s20 + $0x130] sm:$0xff] %v1785_v40 }
 0x3db   : > { %1788 = vst [vmem:[%s3371_s20 + $0x138] sm:$0xff] %v1787_v28 }
 0x3dc   : > { %1790 = vst [vmem:[%s3371_s20 + $0x180] sm:$0xff] %v1789_v56 }
 0x3dd   : > { %1792 = vst [vmem:[%s3371_s20 + $0x188] sm:$0xff] %v1791_v45 }
 0x3de   : > { %1794 = vst [vmem:[%s3371_s20 + $0x190] sm:$0xff] %v1793_v29 }
 0x3df   : > { %1796 = vst [vmem:[%s3371_s20 + $0x198] sm:$0xff] %v1795_v58 }
 0x3e0   : > { %1798 = vst [vmem:[%s3371_s20 + $0x1a0] sm:$0xff] %v1797_v5 }
 0x3e1   : > { %1800 = vst [vmem:[%s3371_s20 + $0x1a8] sm:$0xff] %v1799_v63 }
 0x3e2   : > { %1802 = vst [vmem:[%s3371_s20 + $0x1b0] sm:$0xff] %v1801_v24 }
 0x3e3   : > { %1804 = vst [vmem:[%s3371_s20 + $0x1b8] sm:$0xff] %v1803_v2 }
 0x3e4 PF: > { %p10_p10 = scmp.ge.s32.totalorder %s1976_s16, 4   ;;  %s3450_s12 = smov %s1931_s13 }
 0x3e5   : > { %s3451_s13 = smov %s1987_s19  ;;  %s3452_s14 = smov %s1976_s16 }
 0x3e6   :  { %12 = sbr.rel (!%p10_p10) target bundleno = 2 (0x2), region = 113 }

// kernel: discriminator_forward.6
= control target key start
LH: loop header
LB: loop body
LE: loop exit
PB: predicated region body
PF: predicated region fallthrough
CT: control target
= control target key end

     0   :  { %s1360_s12 = smov 0   ;;  %s1362_s13 = smov 0   ;;  %s2247_s0 = inlined_call_operand.vmem [shape: f32[64,512], index: 0, kind: input, shape index: {}]   ;;  %s2248_s1 = inlined_call_operand.vmem [shape: f32[512,512], index: 1, kind: input, shape index: {}]   ;;  %s2249_s2 = inlined_call_operand.vmem [shape: f32[64,1], index: 2, kind: input, shape index: {}]   ;;  %s2250_s3 = inlined_call_operand.vmem [shape: f32[64,512], index: 3, kind: output, shape index: {}]  }
   0x1   :  { %s1364_s14 = smov 0  }
   0x2 LB: > { %s1264_s15 = sadd.s32 4294967295, %s1336_s14   ;;  %s1377_s16 = sadd.s32 1, %s1336_s14   ;;  %s1336_s14 = sphi %s1364_s14, %s2254_s14   ;;  %s1332_s13 = sphi %s1362_s13, %s2253_s13   ;;  %s1328_s12 = sphi %s1360_s12, %s2252_s12  }
   0x3   : > { %s38_s17 = ssub.s32 %s1336_s14, %s1377_s16  ;;  %s41_s18 = sadd.s32 1, %s1332_s13 }
   0x4   : > { %p39_p0 = scmp.eq.s32.totalorder %s38_s17, 0  ;;  %p48_p1 = scmp.ne.s32.totalorder %s1332_s13, %s1328_s12 }
   0x5   : > { %p49_p2 = scmp.eq.s32.totalorder %s1336_s14, 0  ;;  %p99_p3 = scmp.eq.s32.totalorder %s1264_s15, 1 }
   0x6   : > { %s1388_s19 = scalar_select %p39_p0, %s1332_s13, %s41_s18  }
   0x7   : > { %p50_p4 = por %p49_p2, %p48_p1  ;;  %p1390_p5 = por %p99_p3, %p48_p1 }
   0x8   : > { %p1267_p6 = scmp.ge.s32.totalorder %s1336_s14, 2 }
   0xa   : > { %127 = sbr.rel (%p1267_p6) target bundleno = 147 (0x93), region = 24 }
   0xf   : > { %130 = sbr.rel (!%p50_p4) target bundleno = 147 (0x93), region = 28  ;;  %s132_s21 = sand.u32 (%p50_p4), 1, %s1332_s13  }
  0x10   : > { %s1279_s22 = sshll.u32 (%p50_p4), %s1336_s14, 4  ;;  %s1268_s23 = sshll.u32 (%p50_p4), %s132_s21, 10 }
  0x11   : > { %s1400_s26 = scalar_lea.vmem (%p50_p4), %s2248_s1, %s1279_s22  ;;  %s1405_s27 = scalar_lea.vmem (%p50_p4), [#allocation2], %s1268_s23 }
  0x12   : > { %v150_v0 = vld [vmem:[%s1400_s26] sm:$0xff] (%p50_p4)  ;;  %v152_v1 = vld [vmem:[%s1400_s26 + $0x8] sm:$0xff] (%p50_p4) }
  0x13   : > { %v154_v2 = vld [vmem:[%s1400_s26 + $0x20] sm:$0xff] (%p50_p4)  ;;  %151 = vst [vmem:[%s1405_s27] sm:$0xff] (%p50_p4), %v150_v0  ;;  %v156_v3 = vld [vmem:[%s1400_s26 + $0x28] sm:$0xff] (%p50_p4) }
  0x14   : > { %153 = vst [vmem:[%s1405_s27 + $0x8] sm:$0xff] %v152_v1  ;;  %v158_v4 = vld [vmem:[%s1400_s26 + $0x40] sm:$0xff]  ;;  %v160_v5 = vld [vmem:[%s1400_s26 + $0x48] sm:$0xff] }
  0x15   : > { %155 = vst [vmem:[%s1405_s27 + $0x10] sm:$0xff] %v154_v2  ;;  %v162_v6 = vld [vmem:[%s1400_s26 + $0x60] sm:$0xff]  ;;  %v164_v7 = vld [vmem:[%s1400_s26 + $0x68] sm:$0xff] }
  0x16   : > { %157 = vst [vmem:[%s1405_s27 + $0x18] sm:$0xff] %v156_v3  ;;  %v166_v8 = vld [vmem:[%s1400_s26 + $0x80] sm:$0xff]  ;;  %v168_v9 = vld [vmem:[%s1400_s26 + $0x88] sm:$0xff] }
  0x17   : > { %159 = vst [vmem:[%s1405_s27 + $0x20] sm:$0xff] %v158_v4  ;;  %v170_v10 = vld [vmem:[%s1400_s26 + $0xa0] sm:$0xff]  ;;  %v172_v11 = vld [vmem:[%s1400_s26 + $0xa8] sm:$0xff] }
  0x18   : > { %161 = vst [vmem:[%s1405_s27 + $0x28] sm:$0xff] %v160_v5  ;;  %v174_v12 = vld [vmem:[%s1400_s26 + $0xc0] sm:$0xff]  ;;  %v176_v13 = vld [vmem:[%s1400_s26 + $0xc8] sm:$0xff] }
  0x19   : > { %163 = vst [vmem:[%s1405_s27 + $0x30] sm:$0xff] %v162_v6  ;;  %v178_v14 = vld [vmem:[%s1400_s26 + $0xe0] sm:$0xff]  ;;  %v180_v15 = vld [vmem:[%s1400_s26 + $0xe8] sm:$0xff] }
  0x1a   : > { %165 = vst [vmem:[%s1405_s27 + $0x38] sm:$0xff] %v164_v7  ;;  %v182_v16 = vld [vmem:[%s1400_s26 + $0x100] sm:$0xff]  ;;  %v184_v17 = vld [vmem:[%s1400_s26 + $0x108] sm:$0xff] }
  0x1b   : > { %167 = vst [vmem:[%s1405_s27 + $0x40] sm:$0xff] %v166_v8  ;;  %v186_v18 = vld [vmem:[%s1400_s26 + $0x120] sm:$0xff]  ;;  %v188_v19 = vld [vmem:[%s1400_s26 + $0x128] sm:$0xff] }
  0x1c   : > { %169 = vst [vmem:[%s1405_s27 + $0x48] sm:$0xff] %v168_v9  ;;  %v190_v20 = vld [vmem:[%s1400_s26 + $0x140] sm:$0xff]  ;;  %v192_v21 = vld [vmem:[%s1400_s26 + $0x148] sm:$0xff] }
  0x1d   : > { %171 = vst [vmem:[%s1405_s27 + $0x50] sm:$0xff] %v170_v10  ;;  %v194_v22 = vld [vmem:[%s1400_s26 + $0x160] sm:$0xff]  ;;  %v196_v23 = vld [vmem:[%s1400_s26 + $0x168] sm:$0xff] }
  0x1e   : > { %173 = vst [vmem:[%s1405_s27 + $0x58] sm:$0xff] %v172_v11  ;;  %v198_v24 = vld [vmem:[%s1400_s26 + $0x180] sm:$0xff]  ;;  %v200_v25 = vld [vmem:[%s1400_s26 + $0x188] sm:$0xff] }
  0x1f   : > { %175 = vst [vmem:[%s1405_s27 + $0x60] sm:$0xff] %v174_v12  ;;  %v202_v26 = vld [vmem:[%s1400_s26 + $0x1a0] sm:$0xff]  ;;  %v204_v27 = vld [vmem:[%s1400_s26 + $0x1a8] sm:$0xff] }
  0x20   : > { %177 = vst [vmem:[%s1405_s27 + $0x68] sm:$0xff] %v176_v13  ;;  %v206_v28 = vld [vmem:[%s1400_s26 + $0x1c0] sm:$0xff]  ;;  %v208_v29 = vld [vmem:[%s1400_s26 + $0x1c8] sm:$0xff] }
  0x21   : > { %179 = vst [vmem:[%s1405_s27 + $0x70] sm:$0xff] %v178_v14  ;;  %v210_v30 = vld [vmem:[%s1400_s26 + $0x1e0] sm:$0xff]  ;;  %v212_v31 = vld [vmem:[%s1400_s26 + $0x1e8] sm:$0xff] }
  0x22   : > { %181 = vst [vmem:[%s1405_s27 + $0x78] sm:$0xff] %v180_v15  ;;  %v214_v32 = vld [vmem:[%s1400_s26 + $0x200] sm:$0xff]  ;;  %v216_v33 = vld [vmem:[%s1400_s26 + $0x208] sm:$0xff] }
  0x23   : > { %183 = vst [vmem:[%s1405_s27 + $0x80] sm:$0xff] %v182_v16  ;;  %v218_v34 = vld [vmem:[%s1400_s26 + $0x220] sm:$0xff]  ;;  %v220_v35 = vld [vmem:[%s1400_s26 + $0x228] sm:$0xff] }
  0x24   : > { %185 = vst [vmem:[%s1405_s27 + $0x88] sm:$0xff] %v184_v17  ;;  %v222_v36 = vld [vmem:[%s1400_s26 + $0x240] sm:$0xff]  ;;  %v224_v37 = vld [vmem:[%s1400_s26 + $0x248] sm:$0xff] }
  0x25   : > { %187 = vst [vmem:[%s1405_s27 + $0x90] sm:$0xff] %v186_v18  ;;  %v226_v38 = vld [vmem:[%s1400_s26 + $0x260] sm:$0xff]  ;;  %v228_v39 = vld [vmem:[%s1400_s26 + $0x268] sm:$0xff] }
  0x26   : > { %189 = vst [vmem:[%s1405_s27 + $0x98] sm:$0xff] %v188_v19  ;;  %v230_v40 = vld [vmem:[%s1400_s26 + $0x280] sm:$0xff]  ;;  %v232_v41 = vld [vmem:[%s1400_s26 + $0x288] sm:$0xff] }
  0x27   : > { %191 = vst [vmem:[%s1405_s27 + $0xa0] sm:$0xff] %v190_v20  ;;  %v234_v42 = vld [vmem:[%s1400_s26 + $0x2a0] sm:$0xff]  ;;  %v236_v43 = vld [vmem:[%s1400_s26 + $0x2a8] sm:$0xff] }
  0x28   : > { %193 = vst [vmem:[%s1405_s27 + $0xa8] sm:$0xff] %v192_v21  ;;  %v238_v44 = vld [vmem:[%s1400_s26 + $0x2c0] sm:$0xff]  ;;  %v240_v45 = vld [vmem:[%s1400_s26 + $0x2c8] sm:$0xff] }
  0x29   : > { %195 = vst [vmem:[%s1405_s27 + $0xb0] sm:$0xff] %v194_v22  ;;  %v242_v46 = vld [vmem:[%s1400_s26 + $0x2e0] sm:$0xff]  ;;  %v244_v47 = vld [vmem:[%s1400_s26 + $0x2e8] sm:$0xff] }
  0x2a   : > { %197 = vst [vmem:[%s1405_s27 + $0xb8] sm:$0xff] %v196_v23  ;;  %v246_v48 = vld [vmem:[%s1400_s26 + $0x300] sm:$0xff]  ;;  %v248_v49 = vld [vmem:[%s1400_s26 + $0x308] sm:$0xff] }
  0x2b   : > { %199 = vst [vmem:[%s1405_s27 + $0xc0] sm:$0xff] %v198_v24  ;;  %v250_v50 = vld [vmem:[%s1400_s26 + $0x320] sm:$0xff]  ;;  %v252_v51 = vld [vmem:[%s1400_s26 + $0x328] sm:$0xff] }
  0x2c   : > { %201 = vst [vmem:[%s1405_s27 + $0xc8] sm:$0xff] %v200_v25  ;;  %v254_v52 = vld [vmem:[%s1400_s26 + $0x340] sm:$0xff]  ;;  %v256_v53 = vld [vmem:[%s1400_s26 + $0x348] sm:$0xff] }
  0x2d   : > { %203 = vst [vmem:[%s1405_s27 + $0xd0] sm:$0xff] %v202_v26  ;;  %v258_v54 = vld [vmem:[%s1400_s26 + $0x360] sm:$0xff]  ;;  %v260_v55 = vld [vmem:[%s1400_s26 + $0x368] sm:$0xff] }
  0x2e   : > { %205 = vst [vmem:[%s1405_s27 + $0xd8] sm:$0xff] %v204_v27  ;;  %v262_v56 = vld [vmem:[%s1400_s26 + $0x380] sm:$0xff]  ;;  %v264_v57 = vld [vmem:[%s1400_s26 + $0x388] sm:$0xff] }
  0x2f   : > { %207 = vst [vmem:[%s1405_s27 + $0xe0] sm:$0xff] %v206_v28  ;;  %v266_v58 = vld [vmem:[%s1400_s26 + $0x3a0] sm:$0xff]  ;;  %v268_v59 = vld [vmem:[%s1400_s26 + $0x3a8] sm:$0xff] }
  0x30   : > { %209 = vst [vmem:[%s1405_s27 + $0xe8] sm:$0xff] %v208_v29  ;;  %v270_v60 = vld [vmem:[%s1400_s26 + $0x3c0] sm:$0xff]  ;;  %v272_v61 = vld [vmem:[%s1400_s26 + $0x3c8] sm:$0xff] }
  0x31   : > { %211 = vst [vmem:[%s1405_s27 + $0xf0] sm:$0xff] %v210_v30  ;;  %v274_v62 = vld [vmem:[%s1400_s26 + $0x3e0] sm:$0xff]  ;;  %v276_v63 = vld [vmem:[%s1400_s26 + $0x3e8] sm:$0xff] }
  0x32   : > { %213 = vst [vmem:[%s1405_s27 + $0xf8] sm:$0xff] %v212_v31  ;;  %v278_v0 = vld [vmem:[%s1400_s26 + $0x400] sm:$0xff]  ;;  %v280_v1 = vld [vmem:[%s1400_s26 + $0x408] sm:$0xff] }
  0x33   : > { %215 = vst [vmem:[%s1405_s27 + $0x100] sm:$0xff] %v214_v32  ;;  %v282_v2 = vld [vmem:[%s1400_s26 + $0x420] sm:$0xff]  ;;  %v284_v3 = vld [vmem:[%s1400_s26 + $0x428] sm:$0xff] }
  0x34   : > { %217 = vst [vmem:[%s1405_s27 + $0x108] sm:$0xff] %v216_v33  ;;  %v286_v4 = vld [vmem:[%s1400_s26 + $0x440] sm:$0xff]  ;;  %v288_v5 = vld [vmem:[%s1400_s26 + $0x448] sm:$0xff] }
  0x35   : > { %219 = vst [vmem:[%s1405_s27 + $0x110] sm:$0xff] %v218_v34  ;;  %v290_v6 = vld [vmem:[%s1400_s26 + $0x460] sm:$0xff]  ;;  %v292_v7 = vld [vmem:[%s1400_s26 + $0x468] sm:$0xff] }
  0x36   : > { %221 = vst [vmem:[%s1405_s27 + $0x118] sm:$0xff] %v220_v35  ;;  %v294_v8 = vld [vmem:[%s1400_s26 + $0x480] sm:$0xff]  ;;  %v296_v9 = vld [vmem:[%s1400_s26 + $0x488] sm:$0xff] }
  0x37   : > { %223 = vst [vmem:[%s1405_s27 + $0x120] sm:$0xff] %v222_v36  ;;  %v298_v10 = vld [vmem:[%s1400_s26 + $0x4a0] sm:$0xff]  ;;  %v300_v11 = vld [vmem:[%s1400_s26 + $0x4a8] sm:$0xff] }
  0x38   : > { %225 = vst [vmem:[%s1405_s27 + $0x128] sm:$0xff] %v224_v37  ;;  %v302_v12 = vld [vmem:[%s1400_s26 + $0x4c0] sm:$0xff]  ;;  %v304_v13 = vld [vmem:[%s1400_s26 + $0x4c8] sm:$0xff] }
  0x39   : > { %227 = vst [vmem:[%s1405_s27 + $0x130] sm:$0xff] %v226_v38  ;;  %v306_v14 = vld [vmem:[%s1400_s26 + $0x4e0] sm:$0xff]  ;;  %v308_v15 = vld [vmem:[%s1400_s26 + $0x4e8] sm:$0xff] }
  0x3a   : > { %229 = vst [vmem:[%s1405_s27 + $0x138] sm:$0xff] %v228_v39  ;;  %v310_v16 = vld [vmem:[%s1400_s26 + $0x500] sm:$0xff]  ;;  %v312_v17 = vld [vmem:[%s1400_s26 + $0x508] sm:$0xff] }
  0x3b   : > { %231 = vst [vmem:[%s1405_s27 + $0x140] sm:$0xff] %v230_v40  ;;  %v314_v18 = vld [vmem:[%s1400_s26 + $0x520] sm:$0xff]  ;;  %v316_v19 = vld [vmem:[%s1400_s26 + $0x528] sm:$0xff] }
  0x3c   : > { %233 = vst [vmem:[%s1405_s27 + $0x148] sm:$0xff] %v232_v41  ;;  %v318_v20 = vld [vmem:[%s1400_s26 + $0x540] sm:$0xff]  ;;  %v320_v21 = vld [vmem:[%s1400_s26 + $0x548] sm:$0xff] }
  0x3d   : > { %235 = vst [vmem:[%s1405_s27 + $0x150] sm:$0xff] %v234_v42  ;;  %v322_v22 = vld [vmem:[%s1400_s26 + $0x560] sm:$0xff]  ;;  %v324_v23 = vld [vmem:[%s1400_s26 + $0x568] sm:$0xff] }
  0x3e   : > { %237 = vst [vmem:[%s1405_s27 + $0x158] sm:$0xff] %v236_v43  ;;  %v326_v24 = vld [vmem:[%s1400_s26 + $0x580] sm:$0xff]  ;;  %v328_v25 = vld [vmem:[%s1400_s26 + $0x588] sm:$0xff] }
  0x3f   : > { %239 = vst [vmem:[%s1405_s27 + $0x160] sm:$0xff] %v238_v44  ;;  %v330_v26 = vld [vmem:[%s1400_s26 + $0x5a0] sm:$0xff]  ;;  %v332_v27 = vld [vmem:[%s1400_s26 + $0x5a8] sm:$0xff] }
  0x40   : > { %241 = vst [vmem:[%s1405_s27 + $0x168] sm:$0xff] %v240_v45  ;;  %v334_v28 = vld [vmem:[%s1400_s26 + $0x5c0] sm:$0xff]  ;;  %v336_v29 = vld [vmem:[%s1400_s26 + $0x5c8] sm:$0xff] }
  0x41   : > { %243 = vst [vmem:[%s1405_s27 + $0x170] sm:$0xff] %v242_v46  ;;  %v338_v30 = vld [vmem:[%s1400_s26 + $0x5e0] sm:$0xff]  ;;  %v340_v31 = vld [vmem:[%s1400_s26 + $0x5e8] sm:$0xff] }
  0x42   : > { %245 = vst [vmem:[%s1405_s27 + $0x178] sm:$0xff] %v244_v47  ;;  %v342_v32 = vld [vmem:[%s1400_s26 + $0x600] sm:$0xff]  ;;  %v344_v33 = vld [vmem:[%s1400_s26 + $0x608] sm:$0xff] }
  0x43   : > { %247 = vst [vmem:[%s1405_s27 + $0x180] sm:$0xff] %v246_v48  ;;  %v346_v34 = vld [vmem:[%s1400_s26 + $0x620] sm:$0xff]  ;;  %v348_v35 = vld [vmem:[%s1400_s26 + $0x628] sm:$0xff] }
  0x44   : > { %249 = vst [vmem:[%s1405_s27 + $0x188] sm:$0xff] %v248_v49  ;;  %v350_v36 = vld [vmem:[%s1400_s26 + $0x640] sm:$0xff]  ;;  %v352_v37 = vld [vmem:[%s1400_s26 + $0x648] sm:$0xff] }
  0x45   : > { %251 = vst [vmem:[%s1405_s27 + $0x190] sm:$0xff] %v250_v50  ;;  %v354_v38 = vld [vmem:[%s1400_s26 + $0x660] sm:$0xff]  ;;  %v356_v39 = vld [vmem:[%s1400_s26 + $0x668] sm:$0xff] }
  0x46   : > { %253 = vst [vmem:[%s1405_s27 + $0x198] sm:$0xff] %v252_v51  ;;  %v358_v40 = vld [vmem:[%s1400_s26 + $0x680] sm:$0xff]  ;;  %v360_v41 = vld [vmem:[%s1400_s26 + $0x688] sm:$0xff] }
  0x47   : > { %255 = vst [vmem:[%s1405_s27 + $0x1a0] sm:$0xff] %v254_v52  ;;  %v362_v42 = vld [vmem:[%s1400_s26 + $0x6a0] sm:$0xff]  ;;  %v364_v43 = vld [vmem:[%s1400_s26 + $0x6a8] sm:$0xff] }
  0x48   : > { %257 = vst [vmem:[%s1405_s27 + $0x1a8] sm:$0xff] %v256_v53  ;;  %v366_v44 = vld [vmem:[%s1400_s26 + $0x6c0] sm:$0xff]  ;;  %v368_v45 = vld [vmem:[%s1400_s26 + $0x6c8] sm:$0xff] }
  0x49   : > { %259 = vst [vmem:[%s1405_s27 + $0x1b0] sm:$0xff] %v258_v54  ;;  %v370_v46 = vld [vmem:[%s1400_s26 + $0x6e0] sm:$0xff]  ;;  %v372_v47 = vld [vmem:[%s1400_s26 + $0x6e8] sm:$0xff] }
  0x4a   : > { %261 = vst [vmem:[%s1405_s27 + $0x1b8] sm:$0xff] %v260_v55  ;;  %v374_v48 = vld [vmem:[%s1400_s26 + $0x700] sm:$0xff]  ;;  %v376_v49 = vld [vmem:[%s1400_s26 + $0x708] sm:$0xff] }
  0x4b   : > { %263 = vst [vmem:[%s1405_s27 + $0x1c0] sm:$0xff] %v262_v56  ;;  %v378_v50 = vld [vmem:[%s1400_s26 + $0x720] sm:$0xff]  ;;  %v380_v51 = vld [vmem:[%s1400_s26 + $0x728] sm:$0xff] }
  0x4c   : > { %265 = vst [vmem:[%s1405_s27 + $0x1c8] sm:$0xff] %v264_v57  ;;  %v382_v52 = vld [vmem:[%s1400_s26 + $0x740] sm:$0xff]  ;;  %v384_v53 = vld [vmem:[%s1400_s26 + $0x748] sm:$0xff] }
  0x4d   : > { %267 = vst [vmem:[%s1405_s27 + $0x1d0] sm:$0xff] %v266_v58  ;;  %v386_v54 = vld [vmem:[%s1400_s26 + $0x760] sm:$0xff]  ;;  %v388_v55 = vld [vmem:[%s1400_s26 + $0x768] sm:$0xff] }
  0x4e   : > { %269 = vst [vmem:[%s1405_s27 + $0x1d8] sm:$0xff] %v268_v59  ;;  %v390_v56 = vld [vmem:[%s1400_s26 + $0x780] sm:$0xff]  ;;  %v392_v57 = vld [vmem:[%s1400_s26 + $0x788] sm:$0xff] }
  0x4f   : > { %271 = vst [vmem:[%s1405_s27 + $0x1e0] sm:$0xff] %v270_v60  ;;  %v394_v58 = vld [vmem:[%s1400_s26 + $0x7a0] sm:$0xff]  ;;  %v396_v59 = vld [vmem:[%s1400_s26 + $0x7a8] sm:$0xff] }
  0x50   : > { %273 = vst [vmem:[%s1405_s27 + $0x1e8] sm:$0xff] %v272_v61  ;;  %v398_v60 = vld [vmem:[%s1400_s26 + $0x7c0] sm:$0xff]  ;;  %v400_v61 = vld [vmem:[%s1400_s26 + $0x7c8] sm:$0xff] }
  0x51   : > { %275 = vst [vmem:[%s1405_s27 + $0x1f0] sm:$0xff] %v274_v62  ;;  %v402_v62 = vld [vmem:[%s1400_s26 + $0x7e0] sm:$0xff] }
  0x52   : > { %277 = vst [vmem:[%s1405_s27 + $0x1f8] sm:$0xff] %v276_v63  ;;  %v404_v63 = vld [vmem:[%s1400_s26 + $0x7e8] sm:$0xff] }
  0x53   : > { %279 = vst [vmem:[%s1405_s27 + $0x200] sm:$0xff] %v278_v0 }
  0x54   : > { %281 = vst [vmem:[%s1405_s27 + $0x208] sm:$0xff] %v280_v1 }
  0x55   : > { %283 = vst [vmem:[%s1405_s27 + $0x210] sm:$0xff] %v282_v2 }
  0x56   : > { %285 = vst [vmem:[%s1405_s27 + $0x218] sm:$0xff] %v284_v3 }
  0x57   : > { %287 = vst [vmem:[%s1405_s27 + $0x220] sm:$0xff] %v286_v4 }
  0x58   : > { %289 = vst [vmem:[%s1405_s27 + $0x228] sm:$0xff] %v288_v5 }
  0x59   : > { %291 = vst [vmem:[%s1405_s27 + $0x230] sm:$0xff] %v290_v6 }
  0x5a   : > { %293 = vst [vmem:[%s1405_s27 + $0x238] sm:$0xff] %v292_v7 }
  0x5b   : > { %295 = vst [vmem:[%s1405_s27 + $0x240] sm:$0xff] %v294_v8 }
  0x5c   : > { %297 = vst [vmem:[%s1405_s27 + $0x248] sm:$0xff] %v296_v9 }
  0x5d   : > { %299 = vst [vmem:[%s1405_s27 + $0x250] sm:$0xff] %v298_v10 }
  0x5e   : > { %301 = vst [vmem:[%s1405_s27 + $0x258] sm:$0xff] %v300_v11 }
  0x5f   : > { %303 = vst [vmem:[%s1405_s27 + $0x260] sm:$0xff] %v302_v12 }
  0x60   : > { %305 = vst [vmem:[%s1405_s27 + $0x268] sm:$0xff] %v304_v13 }
  0x61   : > { %307 = vst [vmem:[%s1405_s27 + $0x270] sm:$0xff] %v306_v14 }
  0x62   : > { %309 = vst [vmem:[%s1405_s27 + $0x278] sm:$0xff] %v308_v15 }
  0x63   : > { %311 = vst [vmem:[%s1405_s27 + $0x280] sm:$0xff] %v310_v16 }
  0x64   : > { %313 = vst [vmem:[%s1405_s27 + $0x288] sm:$0xff] %v312_v17 }
  0x65   : > { %315 = vst [vmem:[%s1405_s27 + $0x290] sm:$0xff] %v314_v18 }
  0x66   : > { %317 = vst [vmem:[%s1405_s27 + $0x298] sm:$0xff] %v316_v19 }
  0x67   : > { %319 = vst [vmem:[%s1405_s27 + $0x2a0] sm:$0xff] %v318_v20 }
  0x68   : > { %321 = vst [vmem:[%s1405_s27 + $0x2a8] sm:$0xff] %v320_v21 }
  0x69   : > { %323 = vst [vmem:[%s1405_s27 + $0x2b0] sm:$0xff] %v322_v22 }
  0x6a   : > { %325 = vst [vmem:[%s1405_s27 + $0x2b8] sm:$0xff] %v324_v23 }
  0x6b   : > { %327 = vst [vmem:[%s1405_s27 + $0x2c0] sm:$0xff] %v326_v24 }
  0x6c   : > { %329 = vst [vmem:[%s1405_s27 + $0x2c8] sm:$0xff] %v328_v25 }
  0x6d   : > { %331 = vst [vmem:[%s1405_s27 + $0x2d0] sm:$0xff] %v330_v26 }
  0x6e   : > { %333 = vst [vmem:[%s1405_s27 + $0x2d8] sm:$0xff] %v332_v27 }
  0x6f   : > { %335 = vst [vmem:[%s1405_s27 + $0x2e0] sm:$0xff] %v334_v28 }
  0x70   : > { %337 = vst [vmem:[%s1405_s27 + $0x2e8] sm:$0xff] %v336_v29 }
  0x71   : > { %339 = vst [vmem:[%s1405_s27 + $0x2f0] sm:$0xff] %v338_v30 }
  0x72   : > { %341 = vst [vmem:[%s1405_s27 + $0x2f8] sm:$0xff] %v340_v31 }
  0x73   : > { %343 = vst [vmem:[%s1405_s27 + $0x300] sm:$0xff] %v342_v32 }
  0x74   : > { %345 = vst [vmem:[%s1405_s27 + $0x308] sm:$0xff] %v344_v33 }
  0x75   : > { %347 = vst [vmem:[%s1405_s27 + $0x310] sm:$0xff] %v346_v34 }
  0x76   : > { %349 = vst [vmem:[%s1405_s27 + $0x318] sm:$0xff] %v348_v35 }
  0x77   : > { %351 = vst [vmem:[%s1405_s27 + $0x320] sm:$0xff] %v350_v36 }
  0x78   : > { %353 = vst [vmem:[%s1405_s27 + $0x328] sm:$0xff] %v352_v37 }
  0x79   : > { %355 = vst [vmem:[%s1405_s27 + $0x330] sm:$0xff] %v354_v38 }
  0x7a   : > { %357 = vst [vmem:[%s1405_s27 + $0x338] sm:$0xff] %v356_v39 }
  0x7b   : > { %359 = vst [vmem:[%s1405_s27 + $0x340] sm:$0xff] %v358_v40 }
  0x7c   : > { %361 = vst [vmem:[%s1405_s27 + $0x348] sm:$0xff] %v360_v41 }
  0x7d   : > { %363 = vst [vmem:[%s1405_s27 + $0x350] sm:$0xff] %v362_v42 }
  0x7e   : > { %365 = vst [vmem:[%s1405_s27 + $0x358] sm:$0xff] %v364_v43 }
  0x7f   : > { %367 = vst [vmem:[%s1405_s27 + $0x360] sm:$0xff] %v366_v44 }
  0x80   : > { %369 = vst [vmem:[%s1405_s27 + $0x368] sm:$0xff] %v368_v45 }
  0x81   : > { %371 = vst [vmem:[%s1405_s27 + $0x370] sm:$0xff] %v370_v46 }
  0x82   : > { %373 = vst [vmem:[%s1405_s27 + $0x378] sm:$0xff] %v372_v47 }
  0x83   : > { %375 = vst [vmem:[%s1405_s27 + $0x380] sm:$0xff] %v374_v48 }
  0x84   : > { %377 = vst [vmem:[%s1405_s27 + $0x388] sm:$0xff] %v376_v49 }
  0x85   : > { %379 = vst [vmem:[%s1405_s27 + $0x390] sm:$0xff] %v378_v50 }
  0x86   : > { %381 = vst [vmem:[%s1405_s27 + $0x398] sm:$0xff] %v380_v51 }
  0x87   : > { %383 = vst [vmem:[%s1405_s27 + $0x3a0] sm:$0xff] %v382_v52 }
  0x88   : > { %385 = vst [vmem:[%s1405_s27 + $0x3a8] sm:$0xff] %v384_v53 }
  0x89   : > { %387 = vst [vmem:[%s1405_s27 + $0x3b0] sm:$0xff] %v386_v54 }
  0x8a   : > { %389 = vst [vmem:[%s1405_s27 + $0x3b8] sm:$0xff] %v388_v55 }
  0x8b   : > { %391 = vst [vmem:[%s1405_s27 + $0x3c0] sm:$0xff] %v390_v56 }
  0x8c   : > { %393 = vst [vmem:[%s1405_s27 + $0x3c8] sm:$0xff] %v392_v57 }
  0x8d   : > { %395 = vst [vmem:[%s1405_s27 + $0x3d0] sm:$0xff] %v394_v58 }
  0x8e   : > { %397 = vst [vmem:[%s1405_s27 + $0x3d8] sm:$0xff] %v396_v59 }
  0x8f   : > { %399 = vst [vmem:[%s1405_s27 + $0x3e0] sm:$0xff] %v398_v60 }
  0x90   : > { %401 = vst [vmem:[%s1405_s27 + $0x3e8] sm:$0xff] %v400_v61 }
  0x91   : > { %403 = vst [vmem:[%s1405_s27 + $0x3f0] sm:$0xff] %v402_v62 }
  0x92   : > { %405 = vst [vmem:[%s1405_s27 + $0x3f8] sm:$0xff] %v404_v63 }
  0x93 PF: > { %p1271_p7 = scmp.ge.s32.totalorder %s1336_s14, 1  ;;  %p410_p8 = scmp.lt.s32.totalorder %s1336_s14, 3 }
  0x95   : > { %p411_p9 = pnand %p1271_p7, %p410_p8 }
  0x96   : > { %s417_s28 = sand.u32 (!%p411_p9), 1, %s1328_s12  }
  0x97   : > { %414 = sbr.rel (%p411_p9) target bundleno = 793 (0x319), region = 51  ;;  %s1272_s29 = sshll.u32 (!%p411_p9), %s417_s28, 10 }
  0x98   : > { %s1665_s30 = scalar_lea.vmem (!%p411_p9), [#allocation2], %s1272_s29  ;;  %s1273_s11 = sshll.u32 (!%p411_p9), %s417_s28, 7 }
  0x99   : > { %s2189_s12 = scalar_lea.vmem (!%p411_p9), [#allocation3], %s1273_s11 }
  0x9c   : > { %v503_v0 = vld [vmem:[%s1665_s30 + $0xf0] sm:$0xff]  ;;  %v501_v2 = vld [vmem:[%s1665_s30 + $0xe0] sm:$0xff]  ;;  %s1280_s28 = sshll.u32 (%p1390_p5), %s1264_s15, 4 }
  0x9d   : > { %v567_v1 = vld [vmem:[%s1665_s30 + $0x2f0] sm:$0xff]  ;;  %649 = vmatpush.msra.mxu0 %v503_v0  ;;  %v565_v4 = vld [vmem:[%s1665_s30 + $0x2e0] sm:$0xff]  ;;  %v568_v0 = vld [vmem:[%s1665_s30 + $0x2f8] sm:$0xff]  ;;  %s1160_s20 = scalar_lea.vmem (%p1390_p5), %s2250_s3, %s1280_s28 }
  0x9e   : > { %731 = vmatpush.msra.mxu2 %v567_v1  ;;  %v535_v3 = vld [vmem:[%s1665_s30 + $0x1f0] sm:$0xff]  ;;  %v533_v7 = vld [vmem:[%s1665_s30 + $0x1e0] sm:$0xff] }
  0x9f   : > { %v599_v5 = vld [vmem:[%s1665_s30 + $0x3f0] sm:$0xff]  ;;  %690 = vmatpush.msra.mxu1 %v535_v3  ;;  %650 = vmatpush.msra.mxu0 %v501_v2  ;;  %v597_v9 = vld [vmem:[%s1665_s30 + $0x3e0] sm:$0xff]  ;;  %v1745_v3 = vld [vmem:[%s2247_s0 + $0x8] sm:$0xff] }
  0xa0   : > { %772 = vmatpush.msra.mxu3 %v599_v5  ;;  %v499_v6 = vld [vmem:[%s1665_s30 + $0xd0] sm:$0xff]  ;;  %732 = vmatpush.msra.mxu2 %v565_v4  ;;  %v497_v11 = vld [vmem:[%s1665_s30 + $0xc0] sm:$0xff]  ;;  %v1752_v4 = vld [vmem:[%s2247_s0 + $0x18] sm:$0xff] }
  0xa1   : > { %v563_v8 = vld [vmem:[%s1665_s30 + $0x2d0] sm:$0xff]  ;;  %691 = vmatpush.msra.mxu1 %v533_v7  ;;  %v561_v12 = vld [vmem:[%s1665_s30 + $0x2c0] sm:$0xff]  ;;  %651 = vmatpush.msra.mxu0 %v499_v6  ;;  %v504_v5 = vld [vmem:[%s1665_s30 + $0xf8] sm:$0xff] }
  0xa2   : > { %v531_v10 = vld [vmem:[%s1665_s30 + $0x1d0] sm:$0xff]  ;;  %773 = vmatpush.msra.mxu3 %v597_v9  ;;  %733 = vmatpush.msra.mxu2 %v563_v8  ;;  %v529_v14 = vld [vmem:[%s1665_s30 + $0x1c0] sm:$0xff]  ;;  %v600_v6 = vld [vmem:[%s1665_s30 + $0x3f8] sm:$0xff] }
  0xa3   : > { %v595_v13 = vld [vmem:[%s1665_s30 + $0x3d0] sm:$0xff]  ;;  %v593_v15 = vld [vmem:[%s1665_s30 + $0x3c0] sm:$0xff]  ;;  %692 = vmatpush.msra.mxu1 %v531_v10  ;;  %652 = vmatpush.msra.mxu0 %v497_v11  ;;  %v536_v7 = vld [vmem:[%s1665_s30 + $0x1f8] sm:$0xff] }
  0xa4   : > { %774 = vmatpush.msra.mxu3 %v595_v13  ;;  %v495_v16 = vld [vmem:[%s1665_s30 + $0xb0] sm:$0xff]  ;;  %734 = vmatpush.msra.mxu2 %v561_v12  ;;  %v493_v20 = vld [vmem:[%s1665_s30 + $0xa0] sm:$0xff]  ;;  %v566_v8 = vld [vmem:[%s1665_s30 + $0x2e8] sm:$0xff] }
  0xa5   : > { %v559_v17 = vld [vmem:[%s1665_s30 + $0x2b0] sm:$0xff]  ;;  %693 = vmatpush.msra.mxu1 %v529_v14  ;;  %v557_v21 = vld [vmem:[%s1665_s30 + $0x2a0] sm:$0xff]  ;;  %653 = vmatpush.msra.mxu0 %v495_v16  ;;  %v502_v9 = vld [vmem:[%s1665_s30 + $0xe8] sm:$0xff] }
  0xa6   : > { %v527_v18 = vld [vmem:[%s1665_s30 + $0x1b0] sm:$0xff]  ;;  %775 = vmatpush.msra.mxu3 %v593_v15  ;;  %735 = vmatpush.msra.mxu2 %v559_v17  ;;  %v525_v22 = vld [vmem:[%s1665_s30 + $0x1a0] sm:$0xff]  ;;  %v598_v10 = vld [vmem:[%s1665_s30 + $0x3e8] sm:$0xff] }
  0xa7   : > { %v591_v19 = vld [vmem:[%s1665_s30 + $0x3b0] sm:$0xff]  ;;  %v589_v23 = vld [vmem:[%s1665_s30 + $0x3a0] sm:$0xff]  ;;  %694 = vmatpush.msra.mxu1 %v527_v18  ;;  %654 = vmatpush.msra.mxu0 %v493_v20  ;;  %v534_v11 = vld [vmem:[%s1665_s30 + $0x1e8] sm:$0xff] }
  0xa8   : > { %776 = vmatpush.msra.mxu3 %v591_v19  ;;  %v491_v24 = vld [vmem:[%s1665_s30 + $0x90] sm:$0xff]  ;;  %736 = vmatpush.msra.mxu2 %v557_v21  ;;  %v489_v28 = vld [vmem:[%s1665_s30 + $0x80] sm:$0xff]  ;;  %v564_v12 = vld [vmem:[%s1665_s30 + $0x2d8] sm:$0xff]  ;;  %v1338_v21 = vmov 0  }
  0xa9   : > { %v555_v25 = vld [vmem:[%s1665_s30 + $0x290] sm:$0xff]  ;;  %695 = vmatpush.msra.mxu1 %v525_v22  ;;  %v553_v29 = vld [vmem:[%s1665_s30 + $0x280] sm:$0xff]  ;;  %655 = vmatpush.msra.mxu0 %v491_v24  ;;  %v500_v13 = vld [vmem:[%s1665_s30 + $0xd8] sm:$0xff] }
  0xaa   : > { %v523_v26 = vld [vmem:[%s1665_s30 + $0x190] sm:$0xff]  ;;  %777 = vmatpush.msra.mxu3 %v589_v23  ;;  %737 = vmatpush.msra.mxu2 %v555_v25  ;;  %v521_v30 = vld [vmem:[%s1665_s30 + $0x180] sm:$0xff]  ;;  %v596_v16 = vld [vmem:[%s1665_s30 + $0x3d8] sm:$0xff] }
  0xab   : > { %v587_v27 = vld [vmem:[%s1665_s30 + $0x390] sm:$0xff]  ;;  %v585_v31 = vld [vmem:[%s1665_s30 + $0x380] sm:$0xff]  ;;  %696 = vmatpush.msra.mxu1 %v523_v26  ;;  %656 = vmatpush.msra.mxu0 %v489_v28  ;;  %v1779_v17 = vld [vmem:[%s2247_s0 + $0x28] sm:$0xff] }
  0xac   : > { %778 = vmatpush.msra.mxu3 %v587_v27  ;;  %v487_v32 = vld [vmem:[%s1665_s30 + $0x70] sm:$0xff]  ;;  %738 = vmatpush.msra.mxu2 %v553_v29  ;;  %v485_v36 = vld [vmem:[%s1665_s30 + $0x60] sm:$0xff]  ;;  %v562_v18 = vld [vmem:[%s1665_s30 + $0x2c8] sm:$0xff] }
  0xad   : > { %v551_v33 = vld [vmem:[%s1665_s30 + $0x270] sm:$0xff]  ;;  %697 = vmatpush.msra.mxu1 %v521_v30  ;;  %v549_v37 = vld [vmem:[%s1665_s30 + $0x260] sm:$0xff]  ;;  %657 = vmatpush.msra.mxu0 %v487_v32  ;;  %v1787_v19 = vld [vmem:[%s2247_s0 + $0x38] sm:$0xff] }
  0xae   : > { %v519_v34 = vld [vmem:[%s1665_s30 + $0x170] sm:$0xff]  ;;  %779 = vmatpush.msra.mxu3 %v585_v31  ;;  %739 = vmatpush.msra.mxu2 %v551_v33  ;;  %v517_v38 = vld [vmem:[%s1665_s30 + $0x160] sm:$0xff]  ;;  %v532_v20 = vld [vmem:[%s1665_s30 + $0x1d8] sm:$0xff] }
  0xaf   : > { %v583_v35 = vld [vmem:[%s1665_s30 + $0x370] sm:$0xff]  ;;  %v581_v39 = vld [vmem:[%s1665_s30 + $0x360] sm:$0xff]  ;;  %698 = vmatpush.msra.mxu1 %v519_v34  ;;  %658 = vmatpush.msra.mxu0 %v485_v36  ;;  %v498_v23 = vld [vmem:[%s1665_s30 + $0xc8] sm:$0xff] }
  0xb0   : > { %780 = vmatpush.msra.mxu3 %v583_v35  ;;  %v483_v40 = vld [vmem:[%s1665_s30 + $0x50] sm:$0xff]  ;;  %740 = vmatpush.msra.mxu2 %v549_v37  ;;  %v481_v44 = vld [vmem:[%s1665_s30 + $0x40] sm:$0xff]  ;;  %v594_v24 = vld [vmem:[%s1665_s30 + $0x3c8] sm:$0xff] }
  0xb1   : > { %v547_v41 = vld [vmem:[%s1665_s30 + $0x250] sm:$0xff]  ;;  %699 = vmatpush.msra.mxu1 %v517_v38  ;;  %v545_v45 = vld [vmem:[%s1665_s30 + $0x240] sm:$0xff]  ;;  %659 = vmatpush.msra.mxu0 %v483_v40  ;;  %v530_v25 = vld [vmem:[%s1665_s30 + $0x1c8] sm:$0xff] }
  0xb2   : > { %v515_v42 = vld [vmem:[%s1665_s30 + $0x150] sm:$0xff]  ;;  %781 = vmatpush.msra.mxu3 %v581_v39  ;;  %741 = vmatpush.msra.mxu2 %v547_v41  ;;  %v513_v46 = vld [vmem:[%s1665_s30 + $0x140] sm:$0xff]  ;;  %v560_v26 = vld [vmem:[%s1665_s30 + $0x2b8] sm:$0xff] }
  0xb3   : > { %v579_v43 = vld [vmem:[%s1665_s30 + $0x350] sm:$0xff]  ;;  %v577_v47 = vld [vmem:[%s1665_s30 + $0x340] sm:$0xff]  ;;  %700 = vmatpush.msra.mxu1 %v515_v42  ;;  %660 = vmatpush.msra.mxu0 %v481_v44  ;;  %v496_v27 = vld [vmem:[%s1665_s30 + $0xb8] sm:$0xff] }
  0xb4   : > { %782 = vmatpush.msra.mxu3 %v579_v43  ;;  %v479_v48 = vld [vmem:[%s1665_s30 + $0x30] sm:$0xff]  ;;  %742 = vmatpush.msra.mxu2 %v545_v45  ;;  %v477_v52 = vld [vmem:[%s1665_s30 + $0x20] sm:$0xff]  ;;  %v592_v28 = vld [vmem:[%s1665_s30 + $0x3b8] sm:$0xff] }
  0xb5   : > { %v543_v49 = vld [vmem:[%s1665_s30 + $0x230] sm:$0xff]  ;;  %701 = vmatpush.msra.mxu1 %v513_v46  ;;  %v541_v53 = vld [vmem:[%s1665_s30 + $0x220] sm:$0xff]  ;;  %661 = vmatpush.msra.mxu0 %v479_v48  ;;  %v528_v29 = vld [vmem:[%s1665_s30 + $0x1b8] sm:$0xff] }
  0xb6   : > { %v511_v50 = vld [vmem:[%s1665_s30 + $0x130] sm:$0xff]  ;;  %783 = vmatpush.msra.mxu3 %v577_v47  ;;  %743 = vmatpush.msra.mxu2 %v543_v49  ;;  %v509_v54 = vld [vmem:[%s1665_s30 + $0x120] sm:$0xff]  ;;  %v558_v32 = vld [vmem:[%s1665_s30 + $0x2a8] sm:$0xff] }
  0xb7   : > { %v575_v51 = vld [vmem:[%s1665_s30 + $0x330] sm:$0xff]  ;;  %v573_v55 = vld [vmem:[%s1665_s30 + $0x320] sm:$0xff]  ;;  %702 = vmatpush.msra.mxu1 %v511_v50  ;;  %662 = vmatpush.msra.mxu0 %v477_v52  ;;  %v494_v33 = vld [vmem:[%s1665_s30 + $0xa8] sm:$0xff] }
  0xb8   : > { %784 = vmatpush.msra.mxu3 %v575_v51  ;;  %v475_v56 = vld [vmem:[%s1665_s30 + $0x10] sm:$0xff]  ;;  %744 = vmatpush.msra.mxu2 %v541_v53  ;;  %v473_v60 = vld [vmem:[%s1665_s30] sm:$0xff]  ;;  %v1818_v34 = vld [vmem:[%s2247_s0 + $0x48] sm:$0xff] }
  0xb9   : > { %v539_v57 = vld [vmem:[%s1665_s30 + $0x210] sm:$0xff]  ;;  %703 = vmatpush.msra.mxu1 %v509_v54  ;;  %v537_v61 = vld [vmem:[%s1665_s30 + $0x200] sm:$0xff]  ;;  %663 = vmatpush.msra.mxu0 %v475_v56  ;;  %v590_v35 = vld [vmem:[%s1665_s30 + $0x3a8] sm:$0xff] }
  0xba   : > { %v507_v58 = vld [vmem:[%s1665_s30 + $0x110] sm:$0xff]  ;;  %785 = vmatpush.msra.mxu3 %v573_v55  ;;  %745 = vmatpush.msra.mxu2 %v539_v57  ;;  %v1732_v62 = vld [vmem:[%s2247_s0] sm:$0xff]  ;;  %v1826_v36 = vld [vmem:[%s2247_s0 + $0x58] sm:$0xff] }
  0xbb   : > { %v571_v59 = vld [vmem:[%s1665_s30 + $0x310] sm:$0xff]  ;;  %704 = vmatpush.msra.mxu1 %v507_v58  ;;  %v505_v1 = vld [vmem:[%s1665_s30 + $0x100] sm:$0xff]  ;;  %664 = vmatpush.msra.mxu0 %v473_v60  ;;  %v526_v37 = vld [vmem:[%s1665_s30 + $0x1a8] sm:$0xff] }
  0xbc   : > { %v1737_v63 = vld [vmem:[%s2247_s0 + $0x10] sm:$0xff]  ;;  %786 = vmatpush.msra.mxu3 %v571_v59  ;;  %746 = vmatpush.msra.mxu2 %v537_v61  ;;  %v569_v2 = vld [vmem:[%s1665_s30 + $0x300] sm:$0xff]  ;;  %v602_v38 = vld [vmem:[%s2249_s2 + $0x8] sm:$0xff] }
  0xbd   : > { %665 = vmatmul.f32.vlgmr.msra.gmra.mxu0 %v1732_v62  ;;  %747 = vmatmul.f32.vlgmr.msra.gmra.mxu2 %v1737_v63  ;;  %v1768_v14 = vld [vmem:[%s2247_s0 + $0x20] sm:$0xff]  ;;  %v1773_v15 = vld [vmem:[%s2247_s0 + $0x30] sm:$0xff]  ;;  %v556_v39 = vld [vmem:[%s1665_s30 + $0x298] sm:$0xff] }
  0xbe   : > { %895 = vmatpush.msrb.mxu2 %v568_v0  ;;  %705 = vmatpush.msra.mxu1 %v505_v1  ;;  %v601_v22 = vld [vmem:[%s2249_s2] sm:$0xff]  ;;  %v1811_v31 = vld [vmem:[%s2247_s0 + $0x50] sm:$0xff]  ;;  %v492_v40 = vld [vmem:[%s1665_s30 + $0x98] sm:$0xff] }
  0xbf   : > { %787 = vmatpush.msra.mxu3 %v569_v2  ;;  %706 = vmatmul.f32.vlgmr.msra.gmra.mxu1 %v1745_v3  ;;  %v1806_v30 = vld [vmem:[%s2247_s0 + $0x40] sm:$0xff]  ;;  %v588_v41 = vld [vmem:[%s1665_s30 + $0x398] sm:$0xff]  ;;  %v554_v43 = vld [vmem:[%s1665_s30 + $0x288] sm:$0xff] }
  0xc0   : > { %788 = vmatmul.f32.vlgmr.msra.gmra.mxu3 %v1752_v4  ;;  %813 = vmatpush.msrb.mxu0 %v504_v5  ;;  %v524_v42 = vld [vmem:[%s1665_s30 + $0x198] sm:$0xff]  ;;  %v603_v44 = vld [vmem:[%s2249_s2 + $0x10] sm:$0xff]  ;;  %v1845_v45 = vld [vmem:[%s2247_s0 + $0x60] sm:$0xff] }
  0xc1   : > { %936 = vmatpush.msrb.mxu3 %v600_v6  ;;  %854 = vmatpush.msrb.mxu1 %v536_v7  ;;  %v1850_v46 = vld [vmem:[%s2247_s0 + $0x70] sm:$0xff]  ;;  %v490_v47 = vld [vmem:[%s1665_s30 + $0x88] sm:$0xff]  ;;  %v552_v50 = vld [vmem:[%s1665_s30 + $0x278] sm:$0xff] }
  0xc2   : > { %896 = vmatpush.msrb.mxu2 %v566_v8  ;;  %814 = vmatpush.msrb.mxu0 %v502_v9  ;;  %v586_v48 = vld [vmem:[%s1665_s30 + $0x388] sm:$0xff]  ;;  %v1866_v51 = vld [vmem:[%s2247_s0 + $0x78] sm:$0xff]  ;;  %v1884_v61 = vld [vmem:[%s2247_s0 + $0x80] sm:$0xff] }
  0xc3   : > { %937 = vmatpush.msrb.mxu3 %v598_v10  ;;  %855 = vmatpush.msrb.mxu1 %v534_v11  ;;  %v1858_v49 = vld [vmem:[%s2247_s0 + $0x68] sm:$0xff]  ;;  %v488_v53 = vld [vmem:[%s1665_s30 + $0x78] sm:$0xff]  ;;  %v1889_v0 = vld [vmem:[%s2247_s0 + $0x90] sm:$0xff] }
  0xc4   : > { %897 = vmatpush.msrb.mxu2 %v564_v12  ;;  %815 = vmatpush.msrb.mxu0 %v500_v13  ;;  %v522_v52 = vld [vmem:[%s1665_s30 + $0x188] sm:$0xff]  ;;  %v584_v54 = vld [vmem:[%s1665_s30 + $0x378] sm:$0xff] }
  0xc5   : > { %668 = vmatmul.f32.gmra.mxu0 %v1768_v14  ;;  %750 = vmatmul.f32.gmra.mxu2 %v1773_v15  ;;  %v520_v55 = vld [vmem:[%s1665_s30 + $0x178] sm:$0xff]  ;;  %v550_v56 = vld [vmem:[%s1665_s30 + $0x268] sm:$0xff] }
  0xc6   : > { %938 = vmatpush.msrb.mxu3 %v596_v16  ;;  %1307 = vset.pattern.permute.xlu0 %v1338_v21  ;;  %v486_v57 = vld [vmem:[%s1665_s30 + $0x68] sm:$0xff]  ;;  %v604_v59 = vld [vmem:[%s2249_s2 + $0x18] sm:$0xff] }
  0xc7   : > { %709 = vmatmul.f32.gmra.mxu1 %v1779_v17  ;;  %898 = vmatpush.msrb.mxu2 %v562_v18  ;;  %v582_v58 = vld [vmem:[%s1665_s30 + $0x368] sm:$0xff]  ;;  %v548_v1 = vld [vmem:[%s1665_s30 + $0x258] sm:$0xff] }
  0xc8   : > { %791 = vmatmul.f32.gmra.mxu3 %v1787_v19  ;;  %856 = vmatpush.msrb.mxu1 %v532_v20  ;;  %v518_v60 = vld [vmem:[%s1665_s30 + $0x168] sm:$0xff]  ;;  %v484_v2 = vld [vmem:[%s1665_s30 + $0x58] sm:$0xff] }
  0xc9   : > { %611 = vperm.xlu0 %1307, %v601_v22   ;;  %816 = vmatpush.msrb.mxu0 %v498_v23  ;;  %v1896_v5 = vld [vmem:[%s2247_s0 + $0x88] sm:$0xff]  ;;  %v580_v6 = vld [vmem:[%s1665_s30 + $0x358] sm:$0xff]  ;;  %v1920_v22 = vld [vmem:[%s2247_s0 + $0xa0] sm:$0xff] }
  0xca   : > { %939 = vmatpush.msrb.mxu3 %v594_v24  ;;  %857 = vmatpush.msrb.mxu1 %v530_v25  ;;  %v1904_v7 = vld [vmem:[%s2247_s0 + $0x98] sm:$0xff]  ;;  %v546_v9 = vld [vmem:[%s1665_s30 + $0x248] sm:$0xff]  ;;  %v1925_v23 = vld [vmem:[%s2247_s0 + $0xb0] sm:$0xff] }
  0xcb   : > { %899 = vmatpush.msrb.mxu2 %v560_v26  ;;  %817 = vmatpush.msrb.mxu0 %v496_v27  ;;  %v516_v8 = vld [vmem:[%s1665_s30 + $0x158] sm:$0xff]  ;;  %v482_v10 = vld [vmem:[%s1665_s30 + $0x48] sm:$0xff] }
  0xcc   : > { %940 = vmatpush.msrb.mxu3 %v592_v28  ;;  %858 = vmatpush.msrb.mxu1 %v528_v29  ;;  %v578_v11 = vld [vmem:[%s1665_s30 + $0x348] sm:$0xff]  ;;  %v544_v13 = vld [vmem:[%s1665_s30 + $0x238] sm:$0xff] }
  0xcd   : > { %671 = vmatmul.f32.gmra.mxu0 %v1806_v30  ;;  %753 = vmatmul.f32.gmra.mxu2 %v1811_v31  ;;  %v514_v12 = vld [vmem:[%s1665_s30 + $0x148] sm:$0xff]  ;;  %v480_v16 = vld [vmem:[%s1665_s30 + $0x38] sm:$0xff] }
  0xce   : > { %900 = vmatpush.msrb.mxu2 %v558_v32  ;;  %818 = vmatpush.msrb.mxu0 %v494_v33  ;;  %v576_v18 = vld [vmem:[%s1665_s30 + $0x338] sm:$0xff]  ;;  %v542_v24 = vld [vmem:[%s1665_s30 + $0x228] sm:$0xff] }
  0xcf   : > { %712 = vmatmul.f32.gmra.mxu1 %v1818_v34  ;;  %941 = vmatpush.msrb.mxu3 %v590_v35  ;;  %v512_v20 = vld [vmem:[%s1665_s30 + $0x138] sm:$0xff]  ;;  %v478_v25 = vld [vmem:[%s1665_s30 + $0x28] sm:$0xff] }
  0xd0   : > { %794 = vmatmul.f32.gmra.mxu3 %v1826_v36  ;;  %859 = vmatpush.msrb.mxu1 %v526_v37  ;;  %v1932_v26 = vld [vmem:[%s2247_s0 + $0xa8] sm:$0xff]  ;;  %v1940_v28 = vld [vmem:[%s2247_s0 + $0xb8] sm:$0xff] }
  0xd1   : > { %616 = vperm.xlu0 %1307, %v602_v38   ;;  %901 = vmatpush.msrb.mxu2 %v556_v39  ;;  %v574_v27 = vld [vmem:[%s1665_s30 + $0x328] sm:$0xff]  ;;  %v540_v32 = vld [vmem:[%s1665_s30 + $0x218] sm:$0xff]  ;;  %v607_v39 = vld [vmem:[%s2249_s2 + $0x30] sm:$0xff] }
  0xd2   : > { %819 = vmatpush.msrb.mxu0 %v492_v40  ;;  %942 = vmatpush.msrb.mxu3 %v588_v41  ;;  %v510_v29 = vld [vmem:[%s1665_s30 + $0x128] sm:$0xff]  ;;  %v476_v33 = vld [vmem:[%s1665_s30 + $0x18] sm:$0xff] }
  0xd3   : > { %1308 = vset.pattern.permute.xlu1 %v1338_v21  ;;  %860 = vmatpush.msrb.mxu1 %v524_v42  ;;  %v572_v35 = vld [vmem:[%s1665_s30 + $0x318] sm:$0xff]  ;;  %v538_v38 = vld [vmem:[%s1665_s30 + $0x208] sm:$0xff]  ;;  %v465_v42 = vld [vmem:[%s2247_s0 + $0xc0] sm:$0xff] }
  0xd4   : > { %902 = vmatpush.msrb.mxu2 %v554_v43  ;;  %621 = vperm.xlu1 %1308, %v603_v44   ;;  %v508_v37 = vld [vmem:[%s1665_s30 + $0x118] sm:$0xff]  ;;  %v474_v40 = vld [vmem:[%s1665_s30 + $0x8] sm:$0xff]  ;;  %v467_v43 = vld [vmem:[%s2247_s0 + $0xd0] sm:$0xff] }
  0xd5   : > { %674 = vmatmul.f32.gmra.mxu0 %v1845_v45  ;;  %756 = vmatmul.f32.gmra.mxu2 %v1850_v46  ;;  %v570_v41 = vld [vmem:[%s1665_s30 + $0x308] sm:$0xff] }
  0xd6   : > { %820 = vmatpush.msrb.mxu0 %v490_v47  ;;  %943 = vmatpush.msrb.mxu3 %v586_v48  ;;  %v506_v44 = vld [vmem:[%s1665_s30 + $0x108] sm:$0xff]  ;;  %v605_v48 = vld [vmem:[%s2249_s2 + $0x20] sm:$0xff] }
  0xd7   : > { %715 = vmatmul.f32.gmra.mxu1 %v1858_v49  ;;  %903 = vmatpush.msrb.mxu2 %v552_v50  ;;  %v466_v47 = vld [vmem:[%s2247_s0 + $0xc8] sm:$0xff]  ;;  %v468_v50 = vld [vmem:[%s2247_s0 + $0xd8] sm:$0xff] }
  0xd8   : > { %797 = vmatmul.f32.gmra.mxu3 %v1866_v51  ;;  %861 = vmatpush.msrb.mxu1 %v522_v52  ;;  %v608_v52 = vld [vmem:[%s2249_s2 + $0x38] sm:$0xff] }
  0xd9   : > { %821 = vmatpush.msrb.mxu0 %v488_v53  ;;  %944 = vmatpush.msrb.mxu3 %v584_v54  ;;  %v469_v53 = vld [vmem:[%s2247_s0 + $0xe0] sm:$0xff]  ;;  %v471_v54 = vld [vmem:[%s2247_s0 + $0xf0] sm:$0xff] }
  0xda   : > { %862 = vmatpush.msrb.mxu1 %v520_v55  ;;  %904 = vmatpush.msrb.mxu2 %v550_v56  ;;  %v470_v55 = vld [vmem:[%s2247_s0 + $0xe8] sm:$0xff]  ;;  %v472_v56 = vld [vmem:[%s2247_s0 + $0xf8] sm:$0xff] }
  0xdb   : > { %822 = vmatpush.msrb.mxu0 %v486_v57  ;;  %945 = vmatpush.msrb.mxu3 %v582_v58 }
  0xdc   : > { %626 = vperm.xlu1 %1308, %v604_v59   ;;  %863 = vmatpush.msrb.mxu1 %v518_v60 }
  0xdd   : > { %677 = vmatmul.f32.gmra.mxu0 %v1884_v61  ;;  %759 = vmatmul.f32.gmra.mxu2 %v1889_v0 }
  0xde   : > { %905 = vmatpush.msrb.mxu2 %v548_v1  ;;  %823 = vmatpush.msrb.mxu0 %v484_v2 }
  0xdf   : > { %718 = vmatmul.f32.gmra.mxu1 %v1896_v5  ;;  %946 = vmatpush.msrb.mxu3 %v580_v6 }
  0xe0   : > { %800 = vmatmul.f32.gmra.mxu3 %v1904_v7  ;;  %864 = vmatpush.msrb.mxu1 %v516_v8 }
  0xe1   : > { %906 = vmatpush.msrb.mxu2 %v546_v9  ;;  %824 = vmatpush.msrb.mxu0 %v482_v10 }
  0xe2   : > { %947 = vmatpush.msrb.mxu3 %v578_v11  ;;  %865 = vmatpush.msrb.mxu1 %v514_v12 }
  0xe3   : > { %907 = vmatpush.msrb.mxu2 %v544_v13  ;;  %825 = vmatpush.msrb.mxu0 %v480_v16 }
  0xe4   : > { %948 = vmatpush.msrb.mxu3 %v576_v18  ;;  %866 = vmatpush.msrb.mxu1 %v512_v20 }
  0xe5   : > { %680 = vmatmul.f32.gmra.mxu0 %v1920_v22  ;;  %762 = vmatmul.f32.gmra.mxu2 %v1925_v23 }
  0xe6   : > { %908 = vmatpush.msrb.mxu2 %v542_v24  ;;  %826 = vmatpush.msrb.mxu0 %v478_v25 }
  0xe7   : > { %721 = vmatmul.f32.gmra.mxu1 %v1932_v26  ;;  %949 = vmatpush.msrb.mxu3 %v574_v27 }
  0xe8   : > { %803 = vmatmul.f32.gmra.mxu3 %v1940_v28  ;;  %867 = vmatpush.msrb.mxu1 %v510_v29 }
  0xe9   : > { %909 = vmatpush.msrb.mxu2 %v540_v32  ;;  %827 = vmatpush.msrb.mxu0 %v476_v33 }
  0xea   : > { %950 = vmatpush.msrb.mxu3 %v572_v35  ;;  %868 = vmatpush.msrb.mxu1 %v508_v37 }
  0xeb   : > { %910 = vmatpush.msrb.mxu2 %v538_v38  ;;  %641 = vperm.xlu0 %1307, %v607_v39  }
  0xec   : > { %828 = vmatpush.msrb.mxu0 %v474_v40  ;;  %951 = vmatpush.msrb.mxu3 %v570_v41 }
  0xed   : > { %683 = vmatmul.f32.gmra.mxu0 %v465_v42  ;;  %765 = vmatmul.f32.gmra.mxu2 %v467_v43 }
  0xee   : > { %869 = vmatpush.msrb.mxu1 %v506_v44  ;;  %1309 = vset.pattern.permute.xlu2 %v1338_v21  ;;  %v606_v21 = vld [vmem:[%s2249_s2 + $0x28] sm:$0xff] }
  0xef   : > { %724 = vmatmul.f32.gmra.mxu1 %v466_v47  ;;  %631 = vperm.xlu2 %1309, %v605_v48  }
  0xf0   : > { %806 = vmatmul.f32.gmra.mxu3 %v468_v50  ;;  %646 = vperm.xlu1 %1308, %v608_v52  }
  0xf5   : > { %686 = vmatmul.f32.gmra.mxu0 %v469_v53  ;;  %768 = vmatmul.f32.gmra.mxu2 %v471_v54 }
  0xf7   : > { %727 = vmatmul.f32.gmra.mxu1 %v470_v55  ;;  %636 = vperm.xlu2 %1309, %v606_v21  }
  0xf8   : > { %809 = vmatmul.f32.gmra.mxu3 %v472_v56 }
  0xfd   : > { %829 = vmatmul.f32.vlgmr.msrb.gmra.mxu0 %v1732_v62  ;;  %911 = vmatmul.f32.vlgmr.msrb.gmra.mxu2 %v1737_v63 }
  0xff   : > { %870 = vmatmul.f32.vlgmr.msrb.gmra.mxu1 %v1745_v3 }
 0x100   : > { %952 = vmatmul.f32.vlgmr.msrb.gmra.mxu3 %v1752_v4 }
 0x105   : > { %832 = vmatmul.f32.gmra.mxu0 %v1768_v14  ;;  %914 = vmatmul.f32.gmra.mxu2 %v1773_v15 }
 0x107   : > { %873 = vmatmul.f32.gmra.mxu1 %v1779_v17 }
 0x108   : > { %955 = vmatmul.f32.gmra.mxu3 %v1787_v19 }
 0x10d   : > { %835 = vmatmul.f32.gmra.mxu0 %v1806_v30  ;;  %917 = vmatmul.f32.gmra.mxu2 %v1811_v31 }
 0x10f   : > { %876 = vmatmul.f32.gmra.mxu1 %v1818_v34 }
 0x110   : > { %958 = vmatmul.f32.gmra.mxu3 %v1826_v36 }
 0x115   : > { %838 = vmatmul.f32.gmra.mxu0 %v1845_v45  ;;  %920 = vmatmul.f32.gmra.mxu2 %v1850_v46 }
 0x117   : > { %879 = vmatmul.f32.gmra.mxu1 %v1858_v49 }
 0x118   : > { %961 = vmatmul.f32.gmra.mxu3 %v1866_v51 }
 0x11d   : > { %841 = vmatmul.f32.gmra.mxu0 %v1884_v61  ;;  %923 = vmatmul.f32.gmra.mxu2 %v1889_v0 }
 0x11f   : > { %882 = vmatmul.f32.gmra.mxu1 %v1896_v5 }
 0x120   : > { %964 = vmatmul.f32.gmra.mxu3 %v1904_v7 }
 0x125   : > { %844 = vmatmul.f32.gmra.mxu0 %v1920_v22  ;;  %926 = vmatmul.f32.gmra.mxu2 %v1925_v23 }
 0x127   : > { %885 = vmatmul.f32.gmra.mxu1 %v1932_v26 }
 0x128   : > { %967 = vmatmul.f32.gmra.mxu3 %v1940_v28 }
 0x12d   : > { %847 = vmatmul.f32.gmra.mxu0 %v465_v42  ;;  %929 = vmatmul.f32.gmra.mxu2 %v467_v43 }
 0x12f   : > { %888 = vmatmul.f32.gmra.mxu1 %v466_v47 }
 0x130   : > { %970 = vmatmul.f32.gmra.mxu3 %v468_v50 }
 0x135   : > { %850 = vmatmul.f32.gmra.mxu0 %v469_v53  ;;  %932 = vmatmul.f32.gmra.mxu2 %v471_v54 }
 0x137   : > { %891 = vmatmul.f32.gmra.mxu1 %v470_v55 }
 0x138   : > { %973 = vmatmul.f32.gmra.mxu3 %v472_v56 }
 0x13a   : > { %v666_v62 = vpop.f32.mrf.mxu0 }
 0x13b   : > { %v2014_v63 = vpop.permute.xlu0 %611 }
 0x13c   : > { %v667_v3 = vadd.f32 %v666_v62, %v2014_v63  ;;  %v707_v4 = vpop.f32.mrf.mxu1 }
 0x13e   : > { %v708_v14 = vadd.f32 %v707_v4, %v667_v3 }
 0x140   : > { %v748_v15 = vpop.f32.mrf.mxu2 }
 0x141   : > { %v749_v17 = vadd.f32 %v748_v15, %v708_v14 }
 0x142   : > { %v669_v19 = vpop.f32.mrf.mxu0 }
 0x143   : > { %v789_v30 = vpop.f32.mrf.mxu3  ;;  %v2017_v31 = vpop.permute.xlu0 %616 }
 0x144   : > { %v2019_v34 = vadd.f32 %v789_v30, %v749_v17  ;;  %v670_v36 = vadd.f32 %v669_v19, %v2017_v31  ;;  %v710_v45 = vpop.f32.mrf.mxu1 }
 0x146   : > { %v711_v46 = vadd.f32 %v710_v45, %v670_v36  ;;  %v2022_v49 = vpop.permute.xlu1 %621 }
 0x148   : > { %v751_v51 = vpop.f32.mrf.mxu2 }
 0x149   : > { %v752_v57 = vadd.f32 %v751_v51, %v711_v46  ;;  %v2032_v13 = vpop.permute.xlu2 %631 }
 0x14a   : > { %v672_v58 = vpop.f32.mrf.mxu0 }
 0x14b   : > { %v792_v59 = vpop.f32.mrf.mxu3  ;;  %v673_v60 = vadd.f32 %v672_v58, %v2022_v49 }
 0x14c   : > { %v2025_v61 = vadd.f32 %v792_v59, %v752_v57  ;;  %v713_v0 = vpop.f32.mrf.mxu1 }
 0x14d   : > { %v714_v1 = vadd.f32 %v713_v0, %v673_v60 }
 0x14e   : > { %v2027_v5 = vpop.permute.xlu1 %626 }
 0x150   : > { %v754_v2 = vpop.f32.mrf.mxu2 }
 0x151   : > { %v755_v6 = vadd.f32 %v754_v2, %v714_v1  ;;  %v2037_v28 = vpop.permute.xlu2 %636 }
 0x152   : > { %v675_v7 = vpop.f32.mrf.mxu0 }
 0x153   : > { %v795_v8 = vpop.f32.mrf.mxu3  ;;  %v676_v9 = vadd.f32 %v675_v7, %v2027_v5 }
 0x154   : > { %v2030_v10 = vadd.f32 %v795_v8, %v755_v6  ;;  %v716_v11 = vpop.f32.mrf.mxu1 }
 0x155   : > { %v717_v12 = vadd.f32 %v716_v11, %v676_v9 }
 0x158   : > { %v757_v16 = vpop.f32.mrf.mxu2 }
 0x159   : > { %v758_v18 = vadd.f32 %v757_v16, %v717_v12 }
 0x15a   : > { %v678_v20 = vpop.f32.mrf.mxu0 }
 0x15b   : > { %v798_v22 = vpop.f32.mrf.mxu3  ;;  %v679_v23 = vadd.f32 %v678_v20, %v2032_v13 }
 0x15c   : > { %v2035_v24 = vadd.f32 %v798_v22, %v758_v18  ;;  %v719_v25 = vpop.f32.mrf.mxu1 }
 0x15d   : > { %v720_v26 = vadd.f32 %v719_v25, %v679_v23  ;;  %v2042_v41 = vpop.permute.xlu0 %641 }
 0x160   : > { %v760_v27 = vpop.f32.mrf.mxu2 }
 0x161   : > { %v761_v29 = vadd.f32 %v760_v27, %v720_v26 }
 0x162   : > { %v681_v32 = vpop.f32.mrf.mxu0  ;;  %v2047_v54 = vpop.permute.xlu1 %646 }
 0x163   : > { %v801_v33 = vpop.f32.mrf.mxu3  ;;  %v682_v35 = vadd.f32 %v681_v32, %v2037_v28 }
 0x164   : > { %v2040_v37 = vadd.f32 %v801_v33, %v761_v29  ;;  %v722_v38 = vpop.f32.mrf.mxu1 }
 0x165   : > { %v723_v39 = vadd.f32 %v722_v38, %v682_v35 }
 0x168   : > { %v763_v40 = vpop.f32.mrf.mxu2 }
 0x169   : > { %v764_v42 = vadd.f32 %v763_v40, %v723_v39 }
 0x16a   : > { %v684_v43 = vpop.f32.mrf.mxu0 }
 0x16b   : > { %v804_v44 = vpop.f32.mrf.mxu3  ;;  %v685_v47 = vadd.f32 %v684_v43, %v2042_v41 }
 0x16c   : > { %v2045_v48 = vadd.f32 %v804_v44, %v764_v42  ;;  %v725_v50 = vpop.f32.mrf.mxu1 }
 0x16d   : > { %v726_v52 = vadd.f32 %v725_v50, %v685_v47 }
 0x170   : > { %v766_v53 = vpop.f32.mrf.mxu2 }
 0x171   : > { %v767_v55 = vadd.f32 %v766_v53, %v726_v52 }
 0x172   : > { %v687_v21 = vpop.f32.mrf.mxu0 }
 0x173   : > { %v807_v56 = vpop.f32.mrf.mxu3  ;;  %v688_v62 = vadd.f32 %v687_v21, %v2047_v54 }
 0x174   : > { %v2050_v3 = vadd.f32 %v807_v56, %v767_v55  ;;  %v728_v4 = vpop.f32.mrf.mxu1 }
 0x175   : > { %v729_v14 = vadd.f32 %v728_v4, %v688_v62 }
 0x178   : > { %v769_v15 = vpop.f32.mrf.mxu2 }
 0x179   : > { %v770_v17 = vadd.f32 %v769_v15, %v729_v14 }
 0x17a   : > { %v830_v19 = vpop.f32.mrf.mxu0 }
 0x17b   : > { %v810_v30 = vpop.f32.mrf.mxu3  ;;  %v831_v36 = vadd.f32 %v830_v19, %v2014_v63 }
 0x17c   : > { %v2053_v45 = vadd.f32 %v810_v30, %v770_v17  ;;  %v871_v46 = vpop.f32.mrf.mxu1 }
 0x17d   : > { %v872_v51 = vadd.f32 %v871_v46, %v831_v36 }
 0x180   : > { %v912_v57 = vpop.f32.mrf.mxu2 }
 0x181   : > { %v913_v58 = vadd.f32 %v912_v57, %v872_v51 }
 0x182   : > { %v833_v59 = vpop.f32.mrf.mxu0 }
 0x183   : > { %v834_v60 = vadd.f32 %v833_v59, %v2017_v31  ;;  %v953_v0 = vpop.f32.mrf.mxu3 }
 0x184   : > { %v2056_v1 = vadd.f32 %v953_v0, %v913_v58  ;;  %v874_v2 = vpop.f32.mrf.mxu1 }
 0x185   : > { %v875_v6 = vadd.f32 %v874_v2, %v834_v60 }
 0x186   : > { %v977_v7 = vadd.f32 %v2056_v1, %v2019_v34 }
 0x188   : > { %978 = vadd.xlane.f32.xlu2 %v977_v7  ;;  %v915_v8 = vpop.f32.mrf.mxu2 }
 0x189   : > { %v916_v63 = vadd.f32 %v915_v8, %v875_v6 }
 0x18a   : > { %v836_v9 = vpop.f32.mrf.mxu0 }
 0x18b   : > { %v837_v11 = vadd.f32 %v836_v9, %v2022_v49  ;;  %v956_v12 = vpop.f32.mrf.mxu3 }
 0x18c   : > { %v2061_v16 = vadd.f32 %v956_v12, %v916_v63  ;;  %v877_v18 = vpop.f32.mrf.mxu1 }
 0x18d   : > { %v878_v20 = vadd.f32 %v877_v18, %v837_v11 }
 0x18e   : > { %v980_v31 = vadd.f32 %v2061_v16, %v2025_v61 }
 0x190   : > { %981 = vadd.xlane.f32.xlu0 %v980_v31  ;;  %v918_v22 = vpop.f32.mrf.mxu2  ;;  %v1339_v31 = vmov 16384.0  }
 0x191   : > { %v919_v23 = vadd.f32 %v918_v22, %v878_v20  ;;  %1310 = vrcp.f32 %v1339_v31 }
 0x192   : > { %v839_v25 = vpop.f32.mrf.mxu0 }
 0x193   : > { %v840_v26 = vadd.f32 %v839_v25, %v2027_v5  ;;  %v959_v27 = vpop.f32.mrf.mxu3 }
 0x194   : > { %v2066_v29 = vadd.f32 %v959_v27, %v919_v23  ;;  %v880_v32 = vpop.f32.mrf.mxu1 }
 0x195   : > { %v881_v33 = vadd.f32 %v880_v32, %v840_v26 }
 0x196   : > { %v983_v49 = vadd.f32 %v2066_v29, %v2030_v10 }
 0x197   : > { %v1311_v27 = vpop.eup %1310 }
 0x198   : > { %984 = vadd.xlane.f32.xlu1 %v983_v49  ;;  %v921_v35 = vpop.f32.mrf.mxu2  ;;  %vm1019_vm0 = vweird.f32 %v1311_v27 }
 0x199   : > { %v922_v38 = vadd.f32 %v921_v35, %v881_v33 }
 0x19a   : > { %v842_v39 = vpop.f32.mrf.mxu0 }
 0x19b   : > { %v843_v40 = vadd.f32 %v842_v39, %v2032_v13  ;;  %v962_v42 = vpop.f32.mrf.mxu3 }
 0x19c   : > { %v2071_v43 = vadd.f32 %v962_v42, %v922_v38  ;;  %v883_v44 = vpop.f32.mrf.mxu1  ;;  %v1015_v38 = vmul.f32 16384.0, %v1311_v27 }
 0x19d   : > { %v884_v47 = vadd.f32 %v883_v44, %v843_v40 }
 0x19e   : > { %v986_v5 = vadd.f32 %v2071_v43, %v2035_v24  ;;  %v1016_v42 = vsub.f32 1.0, %v1015_v38 }
 0x1a0   : > { %987 = vadd.xlane.f32.xlu2 %v986_v5  ;;  %v924_v50 = vpop.f32.mrf.mxu2 }
 0x1a1   : > { %v925_v52 = vadd.f32 %v924_v50, %v884_v47  ;;  %v1017_v50 = vmul.f32 %v1311_v27, %v1016_v42 }
 0x1a2   : > { %v845_v53 = vpop.f32.mrf.mxu0 }
 0x1a3   : > { %v846_v55 = vadd.f32 %v845_v53, %v2037_v28  ;;  %v965_v21 = vpop.f32.mrf.mxu3 }
 0x1a4   : > { %v2076_v56 = vadd.f32 %v965_v21, %v925_v52  ;;  %v886_v62 = vpop.f32.mrf.mxu1 }
 0x1a5   : > { %v887_v4 = vadd.f32 %v886_v62, %v846_v55  ;;  %v1018_v55 = vadd.f32 %v1311_v27, %v1017_v50 }
 0x1a6   : > { %v989_v13 = vadd.f32 %v2076_v56, %v2040_v37 }
 0x1a8   : > { %990 = vadd.xlane.f32.xlu2 %v989_v13  ;;  %v927_v14 = vpop.f32.mrf.mxu2 }
 0x1a9   : > { %v928_v15 = vadd.f32 %v927_v14, %v887_v4  ;;  %v2094_v4 = vsel %vm1019_vm0, %v1311_v27, %v1018_v55 }
 0x1aa   : > { %v848_v17 = vpop.f32.mrf.mxu0 }
 0x1ab   : > { %v849_v19 = vadd.f32 %v848_v17, %v2042_v41  ;;  %v968_v30 = vpop.f32.mrf.mxu3 }
 0x1ac   : > { %v2081_v36 = vadd.f32 %v968_v30, %v928_v15  ;;  %v889_v46 = vpop.f32.mrf.mxu1 }
 0x1ad   : > { %v890_v51 = vadd.f32 %v889_v46, %v849_v19 }
 0x1ae   : > { %v992_v28 = vadd.f32 %v2081_v36, %v2045_v48 }
 0x1b0   : > { %993 = vadd.xlane.f32.xlu0 %v992_v28  ;;  %v930_v57 = vpop.f32.mrf.mxu2 }
 0x1b1   : > { %v931_v58 = vadd.f32 %v930_v57, %v890_v51 }
 0x1b2   : > { %v851_v59 = vpop.f32.mrf.mxu0 }
 0x1b3   : > { %v852_v60 = vadd.f32 %v851_v59, %v2047_v54  ;;  %v971_v0 = vpop.f32.mrf.mxu3 }
 0x1b4   : > { %v2086_v2 = vadd.f32 %v971_v0, %v931_v58  ;;  %v892_v6 = vpop.f32.mrf.mxu1 }
 0x1b5   : > { %v893_v7 = vadd.f32 %v892_v6, %v852_v60 }
 0x1b6   : > { %v995_v41 = vadd.f32 %v2086_v2, %v2050_v3 }
 0x1b8   : > { %996 = vadd.xlane.f32.xlu1 %v995_v41  ;;  %v933_v8 = vpop.f32.mrf.mxu2 }
 0x1b9   : > { %v934_v63 = vadd.f32 %v933_v8, %v893_v7 }
 0x1bb   : > { %v974_v9 = vpop.f32.mrf.mxu3 }
 0x1bc   : > { %v2090_v11 = vadd.f32 %v974_v9, %v934_v63 }
 0x1be   : > { %v998_v12 = vadd.f32 %v2090_v11, %v2053_v45 }
 0x1c0   : > { %999 = vadd.xlane.f32.xlu2 %v998_v12 }
 0x1fb   : > { %v979_v18 = vpop.xlane.xlu2 %978 }
 0x203   : > { %v982_v20 = vpop.xlane.xlu0 %981 }
 0x204   : > { %v1001_v23 = vadd.f32 %v982_v20, %v979_v18 }
 0x20b   : > { %v985_v22 = vpop.xlane.xlu1 %984 }
 0x20c   : > { %v1002_v25 = vadd.f32 %v1001_v23, %v985_v22 }
 0x213   : > { %v988_v54 = vpop.xlane.xlu2 %987 }
 0x214   : > { %v1003_v32 = vadd.f32 %v1002_v25, %v988_v54 }
 0x21b   : > { %v991_v26 = vpop.xlane.xlu2 %990 }
 0x21c   : > { %v1004_v49 = vadd.f32 %v1003_v32, %v991_v26 }
 0x223   : > { %v994_v33 = vpop.xlane.xlu0 %993 }
 0x224   : > { %v1005_v39 = vadd.f32 %v1004_v49, %v994_v33 }
 0x22b   : > { %v997_v35 = vpop.xlane.xlu1 %996 }
 0x22c   : > { %v1006_v40 = vadd.f32 %v1005_v39, %v997_v35 }
 0x233   : > { %v1000_v44 = vpop.xlane.xlu2 %999 }
 0x234   : > { %v1007_v47 = vadd.f32 %v1006_v40, %v1000_v44 }
 0x236   : > { %v1008_v5 = vrot.slane %v1007_v47, 4 }
 0x238   : > { %v1009_v52 = vadd.f32 %v1008_v5, %v1007_v47 }
 0x23a   : > { %v1010_v53 = vrot.slane %v1009_v52, 2 }
 0x23c   : > { %v1011_v21 = vadd.f32 %v1010_v53, %v1009_v52 }
 0x23e   : > { %v1012_v62 = vrot.slane %v1011_v21, 1 }
 0x240   : > { %v1013_v13 = vadd.f32 %v1012_v62, %v1011_v21 }
 0x242   : > { %v1021_v14 = vmul.f32 %v2094_v4, %v1013_v13 }
 0x244   : > { %v2098_v15 = vsub.f32 %v2030_v10, %v1021_v14  ;;  %v2101_v17 = vsub.f32 %v2066_v29, %v1021_v14  ;;  %v2104_v19 = vsub.f32 %v2025_v61, %v1021_v14  ;;  %v2107_v30 = vsub.f32 %v2061_v16, %v1021_v14 }
 0x245   : > { %v2110_v46 = vsub.f32 %v2019_v34, %v1021_v14  ;;  %v2113_v28 = vsub.f32 %v2056_v1, %v1021_v14  ;;  %v2128_v1 = vsub.f32 %v2045_v48, %v1021_v14  ;;  %v2131_v57 = vsub.f32 %v2081_v36, %v1021_v14 }
 0x246   : > { %v1042_v51 = vmul.f32 %v2098_v15, %v2098_v15  ;;  %v1043_v10 = vmul.f32 %v2101_v17, %v2101_v17  ;;  %v1040_v29 = vmul.f32 %v2104_v19, %v2104_v19  ;;  %v1041_v61 = vmul.f32 %v2107_v30, %v2107_v30 }
 0x247   : > { %v1038_v16 = vmul.f32 %v2110_v46, %v2110_v46  ;;  %v1039_v34 = vmul.f32 %v2113_v28, %v2113_v28  ;;  %v2134_v60 = vsub.f32 %v2040_v37, %v1021_v14  ;;  %v2137_v0 = vsub.f32 %v2076_v56, %v1021_v14 }
 0x248   : > { %v1060_v58 = vadd.f32 %v1043_v10, %v1042_v51  ;;  %v1057_v59 = vadd.f32 %v1041_v61, %v1040_v29  ;;  %v2140_v41 = vsub.f32 %v2035_v24, %v1021_v14  ;;  %v2143_v7 = vsub.f32 %v2071_v43, %v1021_v14 }
 0x249   : > { %v1054_v6 = vadd.f32 %v1039_v34, %v1038_v16  ;;  %v1048_v48 = vmul.f32 %v2128_v1, %v2128_v1  ;;  %v1049_v37 = vmul.f32 %v2131_v57, %v2131_v57  ;;  %v1046_v56 = vmul.f32 %v2134_v60, %v2134_v60 }
 0x24a   : > { %1061 = vadd.xlane.f32.xlu2 %v1060_v58  ;;  %1058 = vadd.xlane.f32.xlu1 %v1057_v59  ;;  %v1047_v36 = vmul.f32 %v2137_v0, %v2137_v0  ;;  %v1044_v24 = vmul.f32 %v2140_v41, %v2140_v41  ;;  %v1045_v43 = vmul.f32 %v2143_v7, %v2143_v7 }
 0x24b   : > { %1055 = vadd.xlane.f32.xlu0 %v1054_v6  ;;  %v1069_v8 = vadd.f32 %v1049_v37, %v1048_v48  ;;  %v2158_v9 = vsub.f32 %v2053_v45, %v1021_v14  ;;  %v2161_v12 = vsub.f32 %v2090_v11, %v1021_v14  ;;  %v2164_v54 = vsub.f32 %v2050_v3, %v1021_v14 }
 0x24c   : > { %v1066_v63 = vadd.f32 %v1047_v36, %v1046_v56  ;;  %v1063_v18 = vadd.f32 %v1045_v43, %v1044_v24  ;;  %v2167_v20 = vsub.f32 %v2086_v2, %v1021_v14 }
 0x24d   : > { %v1052_v31 = vmul.f32 %v2158_v9, %v2158_v9  ;;  %v1053_v45 = vmul.f32 %v2161_v12, %v2161_v12  ;;  %v1050_v11 = vmul.f32 %v2164_v54, %v2164_v54 }
 0x24e   : > { %v1051_v22 = vmul.f32 %v2167_v20, %v2167_v20 }
 0x24f   : > { %v1075_v3 = vadd.f32 %v1053_v45, %v1052_v31 }
 0x250   : > { %v1072_v23 = vadd.f32 %v1051_v22, %v1050_v11 }
 0x252   : > { %1070 = vadd.xlane.f32.xlu2 %v1069_v8  ;;  %1067 = vadd.xlane.f32.xlu1 %v1066_v63 }
 0x253   : > { %1064 = vadd.xlane.f32.xlu0 %v1063_v18 }
 0x25a   : > { %1076 = vadd.xlane.f32.xlu1 %v1075_v3 }
 0x25b   : > { %1073 = vadd.xlane.f32.xlu0 %v1072_v23 }
 0x2bd   : > { %v1059_v2 = vpop.xlane.xlu1 %1058  ;;  %v1062_v27 = vpop.xlane.xlu2 %1061 }
 0x2be   : > { %v1056_v25 = vpop.xlane.xlu0 %1055 }
 0x2bf   : > { %v1078_v26 = vadd.f32 %v1059_v2, %v1056_v25 }
 0x2c1   : > { %v1079_v32 = vadd.f32 %v1078_v26, %v1062_v27 }
 0x2c5   : > { %v1068_v33 = vpop.xlane.xlu1 %1067  ;;  %v1071_v39 = vpop.xlane.xlu2 %1070 }
 0x2c6   : > { %v1065_v49 = vpop.xlane.xlu0 %1064 }
 0x2c7   : > { %v1080_v35 = vadd.f32 %v1079_v32, %v1065_v49 }
 0x2c9   : > { %v1081_v38 = vadd.f32 %v1080_v35, %v1068_v33 }
 0x2cb   : > { %v1082_v40 = vadd.f32 %v1081_v38, %v1071_v39 }
 0x2cd   : > { %v1077_v47 = vpop.xlane.xlu1 %1076 }
 0x2ce   : > { %v1074_v42 = vpop.xlane.xlu0 %1073 }
 0x2cf   : > { %v1083_v44 = vadd.f32 %v1082_v40, %v1074_v42 }
 0x2d1   : > { %v1084_v5 = vadd.f32 %v1083_v44, %v1077_v47 }
 0x2d3   : > { %v1085_v50 = vrot.slane %v1084_v5, 4 }
 0x2d5   : > { %v1086_v52 = vadd.f32 %v1085_v50, %v1084_v5 }
 0x2d7   : > { %v1087_v53 = vrot.slane %v1086_v52, 2 }
 0x2d9   : > { %v1088_v55 = vadd.f32 %v1087_v53, %v1086_v52 }
 0x2db   : > { %v1089_v21 = vrot.slane %v1088_v55, 1 }
 0x2dd   : > { %v1090_v62 = vadd.f32 %v1089_v21, %v1088_v55 }
 0x2df   : > { %v1091_v13 = vmul.f32 %v1090_v62, %v2094_v4 }
 0x2e1   : > { %v1092_v14 = vadd.f32 1e-05, %v1091_v13 }
 0x2e3   : > { %1312 = vrsqrt.f32 %v1092_v14  ;;  %vm1099_vm2 = vweird.f32 %v1092_v14 }
 0x2e9   : > { %v1313_v51 = vpop.eup %1312 }
 0x2ea   : > { %v1094_v10 = vmul.f32 %v1313_v51, %v1092_v14  ;;  %vm1100_vm1 = vweird.f32 %v1313_v51 }
 0x2eb   : > { %vm1101_vm3 = vmor %vm1099_vm2, %vm1100_vm1 }
 0x2ec   : > { %v1095_v29 = vmul.f32 %v1313_v51, %v1094_v10 }
 0x2ee   : > { %v1096_v61 = vmul.f32 0.5, %v1095_v29 }
 0x2f0   : > { %v1097_v16 = vsub.f32 1.5, %v1096_v61 }
 0x2f2   : > { %v1098_v34 = vmul.f32 %v1313_v51, %v1097_v16 }
 0x2f4   : > { %v1102_v58 = vsel %vm1101_vm3, %v1313_v51, %v1098_v34 }
 0x2f5   : > { %v1103_v59 = vmul.f32 %v1102_v58, %v2110_v46  ;;  %v1104_v6 = vmul.f32 %v1102_v58, %v2113_v28  ;;  %v1105_v4 = vmul.f32 %v1102_v58, %v2104_v19  ;;  %v1106_v48 = vmul.f32 %v1102_v58, %v2107_v30 }
 0x2f6   : > { %v1107_v37 = vmul.f32 %v1102_v58, %v2098_v15  ;;  %v1108_v56 = vmul.f32 %v1102_v58, %v2101_v17  ;;  %v1109_v36 = vmul.f32 %v1102_v58, %v2140_v41  ;;  %v1110_v63 = vmul.f32 %v1102_v58, %v2143_v7 }
 0x2f7   : > { %v1119_v24 = vmax.f32 %v1103_v59, 0.0  ;;  %v1120_v43 = vmax.f32 %v1104_v6, 0.0  ;;  %v1121_v8 = vmax.f32 %v1105_v4, 0.0  ;;  %v1122_v18 = vmax.f32 %v1106_v48, 0.0 }
 0x2f8   : > { %v1111_v46 = vmul.f32 %v1102_v58, %v2134_v60  ;;  %v1123_v31 = vmax.f32 %v1107_v37, 0.0  ;;  %v1112_v15 = vmul.f32 %v1102_v58, %v2137_v0  ;;  %v1124_v17 = vmax.f32 %v1108_v56, 0.0 }
 0x2f9   : > { %1135 = vst [vmem:[%s2189_s12] sm:$0xff] %v1119_v24  ;;  %v1113_v19 = vmul.f32 %v1102_v58, %v2128_v1  ;;  %v1125_v30 = vmax.f32 %v1109_v36, 0.0  ;;  %v1114_v28 = vmul.f32 %v1102_v58, %v2131_v57  ;;  %v1126_v60 = vmax.f32 %v1110_v63, 0.0 }
 0x2fa   : > { %1136 = vst [vmem:[%s2189_s12 + $0x8] sm:$0xff] %v1120_v43  ;;  %v1115_v41 = vmul.f32 %v1102_v58, %v2164_v54  ;;  %v1127_v7 = vmax.f32 %v1111_v46, 0.0  ;;  %v1116_v0 = vmul.f32 %v1102_v58, %v2167_v20  ;;  %v1128_v45 = vmax.f32 %v1112_v15, 0.0 }
 0x2fb   : > { %1137 = vst [vmem:[%s2189_s12 + $0x10] sm:$0xff] %v1121_v8  ;;  %v1117_v1 = vmul.f32 %v1102_v58, %v2158_v9  ;;  %v1129_v57 = vmax.f32 %v1113_v19, 0.0  ;;  %v1118_v11 = vmul.f32 %v1102_v58, %v2161_v12  ;;  %v1130_v22 = vmax.f32 %v1114_v28, 0.0 }
 0x2fc   : > { %1138 = vst [vmem:[%s2189_s12 + $0x18] sm:$0xff] %v1122_v18  ;;  %v1131_v54 = vmax.f32 %v1115_v41, 0.0  ;;  %v1132_v3 = vmax.f32 %v1116_v0, 0.0 }
 0x2fd   : > { %1139 = vst [vmem:[%s2189_s12 + $0x20] sm:$0xff] %v1123_v31  ;;  %v1133_v20 = vmax.f32 %v1117_v1, 0.0  ;;  %v1134_v23 = vmax.f32 %v1118_v11, 0.0 }
 0x2fe   : > { %1140 = vst [vmem:[%s2189_s12 + $0x28] sm:$0xff] %v1124_v17 }
 0x2ff   : > { %1141 = vst [vmem:[%s2189_s12 + $0x30] sm:$0xff] %v1125_v30 }
 0x300   : > { %1142 = vst [vmem:[%s2189_s12 + $0x38] sm:$0xff] %v1126_v60  ;;  %v1173_v9 = vld [vmem:[%s2189_s12] sm:$0xff] (%p1390_p5) }
 0x301   : > { %1143 = vst [vmem:[%s2189_s12 + $0x40] sm:$0xff] %v1127_v7  ;;  %v1175_v12 = vld [vmem:[%s2189_s12 + $0x8] sm:$0xff] (%p1390_p5) }
 0x302   : > { %1144 = vst [vmem:[%s2189_s12 + $0x48] sm:$0xff] %v1128_v45  ;;  %v1177_v2 = vld [vmem:[%s2189_s12 + $0x10] sm:$0xff] (%p1390_p5) }
 0x303   : > { %1145 = vst [vmem:[%s2189_s12 + $0x50] sm:$0xff] %v1129_v57  ;;  %v1179_v25 = vld [vmem:[%s2189_s12 + $0x18] sm:$0xff] (%p1390_p5) }
 0x304   : > { %1146 = vst [vmem:[%s2189_s12 + $0x58] sm:$0xff] %v1130_v22  ;;  %1157 = sbr.rel (!%p1390_p5) target bundleno = 793 (0x319), region = 59  ;;  %v1181_v26 = vld [vmem:[%s2189_s12 + $0x20] sm:$0xff] (%p1390_p5) }
 0x305   : > { %1147 = vst [vmem:[%s2189_s12 + $0x60] sm:$0xff] %v1131_v54  ;;  %v1183_v27 = vld [vmem:[%s2189_s12 + $0x28] sm:$0xff] (%p1390_p5) }
 0x306   : > { %1148 = vst [vmem:[%s2189_s12 + $0x68] sm:$0xff] %v1132_v3  ;;  %v1185_v32 = vld [vmem:[%s2189_s12 + $0x30] sm:$0xff] (%p1390_p5) }
 0x307   : > { %1149 = vst [vmem:[%s2189_s12 + $0x70] sm:$0xff] %v1133_v20  ;;  %v1187_v33 = vld [vmem:[%s2189_s12 + $0x38] sm:$0xff] (%p1390_p5) }
 0x308   : > { %1150 = vst [vmem:[%s2189_s12 + $0x78] sm:$0xff] %v1134_v23  ;;  %v1189_v49 = vld [vmem:[%s2189_s12 + $0x40] sm:$0xff] (%p1390_p5) }
 0x309   : > { %1174 = vst [vmem:[%s1160_s20] sm:$0xff] %v1173_v9  ;;  %v1191_v35 = vld [vmem:[%s2189_s12 + $0x48] sm:$0xff] }
 0x30a   : > { %1176 = vst [vmem:[%s1160_s20 + $0x8] sm:$0xff] %v1175_v12  ;;  %v1193_v38 = vld [vmem:[%s2189_s12 + $0x50] sm:$0xff] }
 0x30b   : > { %1178 = vst [vmem:[%s1160_s20 + $0x20] sm:$0xff] %v1177_v2  ;;  %v1195_v39 = vld [vmem:[%s2189_s12 + $0x58] sm:$0xff] }
 0x30c   : > { %1180 = vst [vmem:[%s1160_s20 + $0x28] sm:$0xff] %v1179_v25  ;;  %v1197_v40 = vld [vmem:[%s2189_s12 + $0x60] sm:$0xff] }
 0x30d   : > { %1182 = vst [vmem:[%s1160_s20 + $0x40] sm:$0xff] %v1181_v26  ;;  %v1199_v42 = vld [vmem:[%s2189_s12 + $0x68] sm:$0xff] }
 0x30e   : > { %1184 = vst [vmem:[%s1160_s20 + $0x48] sm:$0xff] %v1183_v27  ;;  %v1201_v44 = vld [vmem:[%s2189_s12 + $0x70] sm:$0xff] }
 0x30f   : > { %1186 = vst [vmem:[%s1160_s20 + $0x60] sm:$0xff] %v1185_v32  ;;  %v1203_v47 = vld [vmem:[%s2189_s12 + $0x78] sm:$0xff] }
 0x310   : > { %1188 = vst [vmem:[%s1160_s20 + $0x68] sm:$0xff] %v1187_v33 }
 0x311   : > { %1190 = vst [vmem:[%s1160_s20 + $0x80] sm:$0xff] %v1189_v49 }
 0x312   : > { %1192 = vst [vmem:[%s1160_s20 + $0x88] sm:$0xff] %v1191_v35 }
 0x313   : > { %1194 = vst [vmem:[%s1160_s20 + $0xa0] sm:$0xff] %v1193_v38 }
 0x314   : > { %1196 = vst [vmem:[%s1160_s20 + $0xa8] sm:$0xff] %v1195_v39 }
 0x315   : > { %1198 = vst [vmem:[%s1160_s20 + $0xc0] sm:$0xff] %v1197_v40 }
 0x316   : > { %1200 = vst [vmem:[%s1160_s20 + $0xc8] sm:$0xff] %v1199_v42 }
 0x317   : > { %1202 = vst [vmem:[%s1160_s20 + $0xe0] sm:$0xff] %v1201_v44 }
 0x318   : > { %1204 = vst [vmem:[%s1160_s20 + $0xe8] sm:$0xff] %v1203_v47 }
 0x319 PF: > { %p10_p10 = scmp.ge.s32.totalorder %s1377_s16, 4   ;;  %s2252_s12 = smov %s1332_s13 }
 0x31a   : > { %s2253_s13 = smov %s1388_s19  ;;  %s2254_s14 = smov %s1377_s16 }
 0x31b   :  { %12 = sbr.rel (!%p10_p10) target bundleno = 2 (0x2), region = 113 }

// kernel: discriminator_forward.7
= control target key start
LH: loop header
LB: loop body
LE: loop exit
PB: predicated region body
PF: predicated region fallthrough
CT: control target
= control target key end

     0   :  { %s760_s1 = inlined_call_operand.vmem [shape: f32[1024,128], index: 1, kind: input, shape index: {}]   ;;  %s761_s2 = inlined_call_operand.<no memory space> [shape: f32[1,1], index: 2, kind: input, shape index: {}]   ;;  %s762_s0 = inlined_call_operand.vmem [shape: f32[1,1024], index: 0, kind: input, shape index: {}]   ;;  %s763_s3 = inlined_call_operand.vmem [shape: f32[1,128], index: 3, kind: output, shape index: {}]  }
   0x1   :  { %v64_v0 = vld [vmem:[%s760_s1 + $0x178] sm:$0xff]  ;;  %v63_v2 = vld [vmem:[%s760_s1 + $0x170] sm:$0xff]  ;;  %v62_v6 = vld [vmem:[%s760_s1 + $0x168] sm:$0xff]  ;;  %v8_v62 = vstv %s761_s2 }
   0x2   :  { %v32_v1 = vld [vmem:[%s760_s1 + $0x78] sm:$0xff]  ;;  %209 = vmatpush.msra.mxu2 %v64_v0  ;;  %v31_v4 = vld [vmem:[%s760_s1 + $0x70] sm:$0xff]  ;;  %v30_v8 = vld [vmem:[%s760_s1 + $0x68] sm:$0xff]  ;;  %9 = vst [vmem:[#allocation2] sm:$0x1] %v8_v62 }
   0x3   :  { %169 = vmatpush.msra.mxu0 %v32_v1  ;;  %v80_v3 = vld [vmem:[%s760_s1 + $0x1f8] sm:$0xff]  ;;  %v79_v7 = vld [vmem:[%s760_s1 + $0x1f0] sm:$0xff]  ;;  %v78_v10 = vld [vmem:[%s760_s1 + $0x1e8] sm:$0xff] }
   0x4   :  { %v48_v5 = vld [vmem:[%s760_s1 + $0xf8] sm:$0xff]  ;;  %229 = vmatpush.msra.mxu3 %v80_v3  ;;  %210 = vmatpush.msra.mxu2 %v63_v2  ;;  %v47_v9 = vld [vmem:[%s760_s1 + $0xf0] sm:$0xff]  ;;  %v61_v11 = vld [vmem:[%s760_s1 + $0x160] sm:$0xff] }
   0x5   :  { %189 = vmatpush.msra.mxu1 %v48_v5  ;;  %170 = vmatpush.msra.mxu0 %v31_v4  ;;  %v29_v12 = vld [vmem:[%s760_s1 + $0x60] sm:$0xff]  ;;  %v46_v13 = vld [vmem:[%s760_s1 + $0xe8] sm:$0xff]  ;;  %v60_v16 = vld [vmem:[%s760_s1 + $0x158] sm:$0xff] }
   0x6   :  { %230 = vmatpush.msra.mxu3 %v79_v7  ;;  %211 = vmatpush.msra.mxu2 %v62_v6  ;;  %v77_v14 = vld [vmem:[%s760_s1 + $0x1e0] sm:$0xff]  ;;  %v28_v17 = vld [vmem:[%s760_s1 + $0x58] sm:$0xff]  ;;  %v59_v20 = vld [vmem:[%s760_s1 + $0x150] sm:$0xff] }
   0x7   :  { %190 = vmatpush.msra.mxu1 %v47_v9  ;;  %171 = vmatpush.msra.mxu0 %v30_v8  ;;  %v45_v15 = vld [vmem:[%s760_s1 + $0xe0] sm:$0xff]  ;;  %v76_v18 = vld [vmem:[%s760_s1 + $0x1d8] sm:$0xff]  ;;  %v27_v21 = vld [vmem:[%s760_s1 + $0x50] sm:$0xff] }
   0x8   :  { %231 = vmatpush.msra.mxu3 %v78_v10  ;;  %212 = vmatpush.msra.mxu2 %v61_v11  ;;  %v44_v19 = vld [vmem:[%s760_s1 + $0xd8] sm:$0xff]  ;;  %v75_v22 = vld [vmem:[%s760_s1 + $0x1d0] sm:$0xff]  ;;  %v58_v24 = vld [vmem:[%s760_s1 + $0x148] sm:$0xff] }
   0x9   :  { %191 = vmatpush.msra.mxu1 %v46_v13  ;;  %172 = vmatpush.msra.mxu0 %v29_v12  ;;  %v43_v23 = vld [vmem:[%s760_s1 + $0xd0] sm:$0xff]  ;;  %v26_v25 = vld [vmem:[%s760_s1 + $0x48] sm:$0xff]  ;;  %v57_v28 = vld [vmem:[%s760_s1 + $0x140] sm:$0xff] }
   0xa   :  { %232 = vmatpush.msra.mxu3 %v77_v14  ;;  %213 = vmatpush.msra.mxu2 %v60_v16  ;;  %v74_v26 = vld [vmem:[%s760_s1 + $0x1c8] sm:$0xff]  ;;  %v25_v29 = vld [vmem:[%s760_s1 + $0x40] sm:$0xff]  ;;  %v56_v32 = vld [vmem:[%s760_s1 + $0x138] sm:$0xff] }
   0xb   :  { %192 = vmatpush.msra.mxu1 %v45_v15  ;;  %173 = vmatpush.msra.mxu0 %v28_v17  ;;  %v42_v27 = vld [vmem:[%s760_s1 + $0xc8] sm:$0xff]  ;;  %v73_v30 = vld [vmem:[%s760_s1 + $0x1c0] sm:$0xff]  ;;  %v24_v33 = vld [vmem:[%s760_s1 + $0x38] sm:$0xff] }
   0xc   :  { %233 = vmatpush.msra.mxu3 %v76_v18  ;;  %214 = vmatpush.msra.mxu2 %v59_v20  ;;  %v41_v31 = vld [vmem:[%s760_s1 + $0xc0] sm:$0xff]  ;;  %v72_v34 = vld [vmem:[%s760_s1 + $0x1b8] sm:$0xff]  ;;  %v55_v36 = vld [vmem:[%s760_s1 + $0x130] sm:$0xff] }
   0xd   :  { %193 = vmatpush.msra.mxu1 %v44_v19  ;;  %174 = vmatpush.msra.mxu0 %v27_v21  ;;  %v40_v35 = vld [vmem:[%s760_s1 + $0xb8] sm:$0xff]  ;;  %v23_v37 = vld [vmem:[%s760_s1 + $0x30] sm:$0xff]  ;;  %v54_v40 = vld [vmem:[%s760_s1 + $0x128] sm:$0xff] }
   0xe   :  { %234 = vmatpush.msra.mxu3 %v75_v22  ;;  %215 = vmatpush.msra.mxu2 %v58_v24  ;;  %v71_v38 = vld [vmem:[%s760_s1 + $0x1b0] sm:$0xff]  ;;  %v22_v41 = vld [vmem:[%s760_s1 + $0x28] sm:$0xff]  ;;  %v53_v44 = vld [vmem:[%s760_s1 + $0x120] sm:$0xff] }
   0xf   :  { %194 = vmatpush.msra.mxu1 %v43_v23  ;;  %175 = vmatpush.msra.mxu0 %v26_v25  ;;  %v39_v39 = vld [vmem:[%s760_s1 + $0xb0] sm:$0xff]  ;;  %v70_v42 = vld [vmem:[%s760_s1 + $0x1a8] sm:$0xff]  ;;  %v21_v45 = vld [vmem:[%s760_s1 + $0x20] sm:$0xff] }
  0x10   :  { %235 = vmatpush.msra.mxu3 %v74_v26  ;;  %216 = vmatpush.msra.mxu2 %v57_v28  ;;  %v38_v43 = vld [vmem:[%s760_s1 + $0xa8] sm:$0xff]  ;;  %v69_v46 = vld [vmem:[%s760_s1 + $0x1a0] sm:$0xff]  ;;  %v52_v48 = vld [vmem:[%s760_s1 + $0x118] sm:$0xff] }
  0x11   :  { %195 = vmatpush.msra.mxu1 %v42_v27  ;;  %176 = vmatpush.msra.mxu0 %v25_v29  ;;  %v37_v47 = vld [vmem:[%s760_s1 + $0xa0] sm:$0xff]  ;;  %v20_v49 = vld [vmem:[%s760_s1 + $0x18] sm:$0xff]  ;;  %v51_v52 = vld [vmem:[%s760_s1 + $0x110] sm:$0xff] }
  0x12   :  { %236 = vmatpush.msra.mxu3 %v73_v30  ;;  %217 = vmatpush.msra.mxu2 %v56_v32  ;;  %v68_v50 = vld [vmem:[%s760_s1 + $0x198] sm:$0xff]  ;;  %v19_v53 = vld [vmem:[%s760_s1 + $0x10] sm:$0xff]  ;;  %v50_v56 = vld [vmem:[%s760_s1 + $0x108] sm:$0xff] }
  0x13   :  { %196 = vmatpush.msra.mxu1 %v41_v31  ;;  %177 = vmatpush.msra.mxu0 %v24_v33  ;;  %v36_v51 = vld [vmem:[%s760_s1 + $0x98] sm:$0xff]  ;;  %v67_v54 = vld [vmem:[%s760_s1 + $0x190] sm:$0xff]  ;;  %v18_v57 = vld [vmem:[%s760_s1 + $0x8] sm:$0xff] }
  0x14   :  { %237 = vmatpush.msra.mxu3 %v72_v34  ;;  %218 = vmatpush.msra.mxu2 %v55_v36  ;;  %v35_v55 = vld [vmem:[%s760_s1 + $0x90] sm:$0xff]  ;;  %v66_v58 = vld [vmem:[%s760_s1 + $0x188] sm:$0xff]  ;;  %v49_v60 = vld [vmem:[%s760_s1 + $0x100] sm:$0xff] }
  0x15   :  { %197 = vmatpush.msra.mxu1 %v40_v35  ;;  %178 = vmatpush.msra.mxu0 %v23_v37  ;;  %v34_v59 = vld [vmem:[%s760_s1 + $0x88] sm:$0xff]  ;;  %v17_v61 = vld [vmem:[%s760_s1] sm:$0xff]  ;;  %v128_v63 = vld [vmem:[%s760_s1 + $0x378] sm:$0xff] }
  0x16   :  { %238 = vmatpush.msra.mxu3 %v71_v38  ;;  %219 = vmatpush.msra.mxu2 %v54_v40  ;;  %v65_v0 = vld [vmem:[%s760_s1 + $0x180] sm:$0xff]  ;;  %v96_v1 = vld [vmem:[%s760_s1 + $0x278] sm:$0xff]  ;;  %v127_v3 = vld [vmem:[%s760_s1 + $0x370] sm:$0xff] }
  0x17   :  { %198 = vmatpush.msra.mxu1 %v39_v39  ;;  %179 = vmatpush.msra.mxu0 %v22_v41  ;;  %v144_v2 = vld [vmem:[%s760_s1 + $0x3f8] sm:$0xff]  ;;  %v33_v4 = vld [vmem:[%s760_s1 + $0x80] sm:$0xff]  ;;  %v95_v5 = vld [vmem:[%s760_s1 + $0x270] sm:$0xff] }
  0x18   :  { %239 = vmatpush.msra.mxu3 %v70_v42  ;;  %220 = vmatpush.msra.mxu2 %v53_v44  ;;  %v112_v6 = vld [vmem:[%s760_s1 + $0x2f8] sm:$0xff]  ;;  %v126_v7 = vld [vmem:[%s760_s1 + $0x368] sm:$0xff]  ;;  %v143_v8 = vld [vmem:[%s760_s1 + $0x3f0] sm:$0xff] }
  0x19   :  { %199 = vmatpush.msra.mxu1 %v38_v43  ;;  %180 = vmatpush.msra.mxu0 %v21_v45  ;;  %v94_v9 = vld [vmem:[%s760_s1 + $0x268] sm:$0xff]  ;;  %v111_v10 = vld [vmem:[%s760_s1 + $0x2f0] sm:$0xff]  ;;  %v125_v11 = vld [vmem:[%s760_s1 + $0x360] sm:$0xff] }
  0x1a   :  { %240 = vmatpush.msra.mxu3 %v69_v46  ;;  %221 = vmatpush.msra.mxu2 %v52_v48  ;;  %v142_v12 = vld [vmem:[%s760_s1 + $0x3e8] sm:$0xff]  ;;  %v93_v13 = vld [vmem:[%s760_s1 + $0x260] sm:$0xff]  ;;  %v124_v15 = vld [vmem:[%s760_s1 + $0x358] sm:$0xff] }
  0x1b   :  { %200 = vmatpush.msra.mxu1 %v37_v47  ;;  %181 = vmatpush.msra.mxu0 %v20_v49  ;;  %v110_v14 = vld [vmem:[%s760_s1 + $0x2e8] sm:$0xff]  ;;  %v141_v16 = vld [vmem:[%s760_s1 + $0x3e0] sm:$0xff]  ;;  %v92_v17 = vld [vmem:[%s760_s1 + $0x258] sm:$0xff] }
  0x1c   :  { %241 = vmatpush.msra.mxu3 %v68_v50  ;;  %222 = vmatpush.msra.mxu2 %v51_v52  ;;  %v109_v18 = vld [vmem:[%s760_s1 + $0x2e0] sm:$0xff]  ;;  %v123_v19 = vld [vmem:[%s760_s1 + $0x350] sm:$0xff]  ;;  %v140_v20 = vld [vmem:[%s760_s1 + $0x3d8] sm:$0xff] }
  0x1d   :  { %201 = vmatpush.msra.mxu1 %v36_v51  ;;  %182 = vmatpush.msra.mxu0 %v19_v53  ;;  %v91_v21 = vld [vmem:[%s760_s1 + $0x250] sm:$0xff]  ;;  %v108_v22 = vld [vmem:[%s760_s1 + $0x2d8] sm:$0xff]  ;;  %v122_v23 = vld [vmem:[%s760_s1 + $0x348] sm:$0xff] }
  0x1e   :  { %242 = vmatpush.msra.mxu3 %v67_v54  ;;  %223 = vmatpush.msra.mxu2 %v50_v56  ;;  %v139_v24 = vld [vmem:[%s760_s1 + $0x3d0] sm:$0xff]  ;;  %v90_v25 = vld [vmem:[%s760_s1 + $0x248] sm:$0xff]  ;;  %v121_v27 = vld [vmem:[%s760_s1 + $0x340] sm:$0xff] }
  0x1f   :  { %202 = vmatpush.msra.mxu1 %v35_v55  ;;  %183 = vmatpush.msra.mxu0 %v18_v57  ;;  %v107_v26 = vld [vmem:[%s760_s1 + $0x2d0] sm:$0xff]  ;;  %v138_v28 = vld [vmem:[%s760_s1 + $0x3c8] sm:$0xff]  ;;  %v89_v29 = vld [vmem:[%s760_s1 + $0x240] sm:$0xff] }
  0x20   :  { %243 = vmatpush.msra.mxu3 %v66_v58  ;;  %224 = vmatpush.msra.mxu2 %v49_v60  ;;  %v106_v30 = vld [vmem:[%s760_s1 + $0x2c8] sm:$0xff]  ;;  %v120_v31 = vld [vmem:[%s760_s1 + $0x338] sm:$0xff]  ;;  %v137_v32 = vld [vmem:[%s760_s1 + $0x3c0] sm:$0xff] }
  0x21   :  { %203 = vmatpush.msra.mxu1 %v34_v59  ;;  %184 = vmatpush.msra.mxu0 %v17_v61  ;;  %v88_v33 = vld [vmem:[%s760_s1 + $0x238] sm:$0xff]  ;;  %v105_v34 = vld [vmem:[%s760_s1 + $0x2c0] sm:$0xff]  ;;  %v119_v35 = vld [vmem:[%s760_s1 + $0x330] sm:$0xff] }
  0x22   :  { %289 = vmatpush.msrb.mxu2 %v128_v63  ;;  %244 = vmatpush.msra.mxu3 %v65_v0  ;;  %v136_v36 = vld [vmem:[%s760_s1 + $0x3b8] sm:$0xff]  ;;  %v87_v37 = vld [vmem:[%s760_s1 + $0x230] sm:$0xff]  ;;  %v669_v39 = vld [vmem:[%s762_s0] sm:$0xff] }
  0x23   :  { %249 = vmatpush.msrb.mxu0 %v96_v1  ;;  %204 = vmatpush.msra.mxu1 %v33_v4  ;;  %v104_v38 = vld [vmem:[%s760_s1 + $0x2b8] sm:$0xff]  ;;  %v118_v40 = vld [vmem:[%s760_s1 + $0x328] sm:$0xff]  ;;  %v135_v41 = vld [vmem:[%s760_s1 + $0x3b0] sm:$0xff]  ;;  %v155_v46 = vperm.slane %v669_v39, 2  ;;  %v153_v50 = vperm.slane %v669_v39, 0  ;;  %v156_v52 = vperm.slane %v669_v39, 3 }
  0x24   :  { %309 = vmatpush.msrb.mxu3 %v144_v2  ;;  %290 = vmatpush.msrb.mxu2 %v127_v3  ;;  %v86_v42 = vld [vmem:[%s760_s1 + $0x228] sm:$0xff]  ;;  %v103_v43 = vld [vmem:[%s760_s1 + $0x2b0] sm:$0xff]  ;;  %v117_v44 = vld [vmem:[%s760_s1 + $0x320] sm:$0xff]  ;;  %v154_v56 = vperm.slane %v669_v39, 1  ;;  %v159_v2 = vperm.slane %v669_v39, 6 }
  0x25   :  { %250 = vmatpush.msrb.mxu0 %v95_v5  ;;  %269 = vmatpush.msrb.mxu1 %v112_v6  ;;  %v134_v45 = vld [vmem:[%s760_s1 + $0x3a8] sm:$0xff]  ;;  %v85_v47 = vld [vmem:[%s760_s1 + $0x220] sm:$0xff]  ;;  %v116_v49 = vld [vmem:[%s760_s1 + $0x318] sm:$0xff]  ;;  %v157_v6 = vperm.slane %v669_v39, 4 }
  0x26   :  { %291 = vmatpush.msrb.mxu2 %v126_v7  ;;  %310 = vmatpush.msrb.mxu3 %v143_v8  ;;  %v102_v48 = vld [vmem:[%s760_s1 + $0x2a8] sm:$0xff]  ;;  %v133_v51 = vld [vmem:[%s760_s1 + $0x3a0] sm:$0xff]  ;;  %v84_v53 = vld [vmem:[%s760_s1 + $0x218] sm:$0xff]  ;;  %v160_v7 = vperm.slane %v669_v39, 7 }
  0x27   :  { %251 = vmatpush.msrb.mxu0 %v94_v9  ;;  %270 = vmatpush.msrb.mxu1 %v111_v10  ;;  %v101_v54 = vld [vmem:[%s760_s1 + $0x2a0] sm:$0xff]  ;;  %v115_v55 = vld [vmem:[%s760_s1 + $0x310] sm:$0xff]  ;;  %v132_v57 = vld [vmem:[%s760_s1 + $0x398] sm:$0xff]  ;;  %v158_v10 = vperm.slane %v669_v39, 5 }
  0x28   :  { %292 = vmatpush.msrb.mxu2 %v125_v11  ;;  %311 = vmatpush.msrb.mxu3 %v142_v12  ;;  %v83_v58 = vld [vmem:[%s760_s1 + $0x210] sm:$0xff]  ;;  %v100_v59 = vld [vmem:[%s760_s1 + $0x298] sm:$0xff]  ;;  %v114_v60 = vld [vmem:[%s760_s1 + $0x308] sm:$0xff]  ;;  %v336_v11 = vmov 0  }
  0x29   :  { %252 = vmatpush.msrb.mxu0 %v93_v13  ;;  %271 = vmatpush.msrb.mxu1 %v110_v14  ;;  %v131_v61 = vld [vmem:[%s760_s1 + $0x390] sm:$0xff]  ;;  %v82_v62 = vld [vmem:[%s760_s1 + $0x208] sm:$0xff]  ;;  %v113_v0 = vld [vmem:[%s760_s1 + $0x300] sm:$0xff] }
  0x2a   :  { %293 = vmatpush.msrb.mxu2 %v124_v15  ;;  %312 = vmatpush.msrb.mxu3 %v141_v16  ;;  %v99_v63 = vld [vmem:[%s760_s1 + $0x290] sm:$0xff]  ;;  %v130_v1 = vld [vmem:[%s760_s1 + $0x388] sm:$0xff]  ;;  %v81_v3 = vld [vmem:[%s760_s1 + $0x200] sm:$0xff] }
  0x2b   :  { %253 = vmatpush.msrb.mxu0 %v92_v17  ;;  %272 = vmatpush.msrb.mxu1 %v109_v18  ;;  %v98_v4 = vld [vmem:[%s760_s1 + $0x288] sm:$0xff]  ;;  %v129_v5 = vld [vmem:[%s760_s1 + $0x380] sm:$0xff] }
  0x2c   :  { %294 = vmatpush.msrb.mxu2 %v123_v19  ;;  %313 = vmatpush.msrb.mxu3 %v140_v20  ;;  %v145_v8 = vld [vmem:[#allocation2] sm:$0x1] }
  0x2d   :  { %254 = vmatpush.msrb.mxu0 %v91_v21  ;;  %273 = vmatpush.msrb.mxu1 %v108_v22  ;;  %v97_v9 = vld [vmem:[%s760_s1 + $0x280] sm:$0xff] }
  0x2e   :  { %295 = vmatpush.msrb.mxu2 %v122_v23  ;;  %314 = vmatpush.msrb.mxu3 %v139_v24 }
  0x2f   :  { %255 = vmatpush.msrb.mxu0 %v90_v25  ;;  %274 = vmatpush.msrb.mxu1 %v107_v26 }
  0x30   :  { %296 = vmatpush.msrb.mxu2 %v121_v27  ;;  %315 = vmatpush.msrb.mxu3 %v138_v28 }
  0x31   :  { %256 = vmatpush.msrb.mxu0 %v89_v29  ;;  %275 = vmatpush.msrb.mxu1 %v106_v30 }
  0x32   :  { %297 = vmatpush.msrb.mxu2 %v120_v31  ;;  %316 = vmatpush.msrb.mxu3 %v137_v32 }
  0x33   :  { %257 = vmatpush.msrb.mxu0 %v88_v33  ;;  %276 = vmatpush.msrb.mxu1 %v105_v34 }
  0x34   :  { %298 = vmatpush.msrb.mxu2 %v119_v35  ;;  %317 = vmatpush.msrb.mxu3 %v136_v36 }
  0x35   :  { %258 = vmatpush.msrb.mxu0 %v87_v37  ;;  %277 = vmatpush.msrb.mxu1 %v104_v38 }
  0x36   :  { %299 = vmatpush.msrb.mxu2 %v118_v40  ;;  %318 = vmatpush.msrb.mxu3 %v135_v41 }
  0x37   :  { %259 = vmatpush.msrb.mxu0 %v86_v42  ;;  %278 = vmatpush.msrb.mxu1 %v103_v43 }
  0x38   :  { %300 = vmatpush.msrb.mxu2 %v117_v44  ;;  %319 = vmatpush.msrb.mxu3 %v134_v45 }
  0x39   :  { %225 = vmatmul.f32.vlgmr.msra.gmra.mxu2 %v155_v46  ;;  %260 = vmatpush.msrb.mxu0 %v85_v47 }
  0x3a   :  { %279 = vmatpush.msrb.mxu1 %v102_v48  ;;  %301 = vmatpush.msrb.mxu2 %v116_v49 }
  0x3b   :  { %320 = vmatpush.msrb.mxu3 %v133_v51  ;;  %185 = vmatmul.f32.vlgmr.msra.gmra.mxu0 %v153_v50 }
  0x3c   :  { %245 = vmatmul.f32.vlgmr.msra.gmra.mxu3 %v156_v52  ;;  %261 = vmatpush.msrb.mxu0 %v84_v53 }
  0x3d   :  { %280 = vmatpush.msrb.mxu1 %v101_v54  ;;  %302 = vmatpush.msrb.mxu2 %v115_v55 }
  0x3e   :  { %321 = vmatpush.msrb.mxu3 %v132_v57  ;;  %205 = vmatmul.f32.vlgmr.msra.gmra.mxu1 %v154_v56 }
  0x3f   :  { %262 = vmatpush.msrb.mxu0 %v83_v58  ;;  %281 = vmatpush.msrb.mxu1 %v100_v59 }
  0x40   :  { %303 = vmatpush.msrb.mxu2 %v114_v60  ;;  %322 = vmatpush.msrb.mxu3 %v131_v61 }
  0x41   :  { %263 = vmatpush.msrb.mxu0 %v82_v62  ;;  %282 = vmatpush.msrb.mxu1 %v99_v63 }
  0x42   :  { %304 = vmatpush.msrb.mxu2 %v113_v0  ;;  %323 = vmatpush.msrb.mxu3 %v130_v1 }
  0x43   :  { %305 = vmatmul.f32.vlgmr.msrb.gmra.mxu2 %v159_v2  ;;  %264 = vmatpush.msrb.mxu0 %v81_v3 }
  0x44   :  { %283 = vmatpush.msrb.mxu1 %v98_v4  ;;  %324 = vmatpush.msrb.mxu3 %v129_v5 }
  0x45   :  { %335 = vset.pattern.permute.xlu0 %v336_v11  ;;  %265 = vmatmul.f32.vlgmr.msrb.gmra.mxu0 %v157_v6 }
  0x46   :  { %325 = vmatmul.f32.vlgmr.msrb.gmra.mxu3 %v160_v7  ;;  %148 = vperm.xlu0 %335, %v145_v8  }
  0x47   :  { %284 = vmatpush.msrb.mxu1 %v97_v9 }
  0x48   :  { %285 = vmatmul.f32.vlgmr.msrb.gmra.mxu1 %v158_v10 }
  0xb8   :  { %v149_v12 = vpop.permute.xlu0 %148  ;;  %v186_v13 = vpop.f32.mrf.mxu0 }
  0xb9   :  { %v151_v14 = vperm.slane %v149_v12, 0 }
  0xbb   :  { %v187_v15 = vadd.f32 %v186_v13, %v151_v14  ;;  %v206_v16 = vpop.f32.mrf.mxu1 }
  0xbc   :  { %v226_v17 = vpop.f32.mrf.mxu2 }
  0xbd   :  { %v207_v18 = vadd.f32 %v206_v16, %v187_v15 }
  0xbf   :  { %v227_v19 = vadd.f32 %v226_v17, %v207_v18  ;;  %v246_v20 = vpop.f32.mrf.mxu3 }
  0xc1   :  { %v247_v21 = vadd.f32 %v246_v20, %v227_v19 }
  0xc2   :  { %v266_v22 = vpop.f32.mrf.mxu0 }
  0xc3   :  { %v267_v23 = vadd.f32 %v266_v22, %v247_v21 }
  0xc5   :  { %v286_v24 = vpop.f32.mrf.mxu1 }
  0xc6   :  { %v287_v25 = vadd.f32 %v286_v24, %v267_v23  ;;  %v306_v26 = vpop.f32.mrf.mxu2 }
  0xc8   :  { %v307_v27 = vadd.f32 %v306_v26, %v287_v25 }
  0xc9   :  { %v326_v28 = vpop.f32.mrf.mxu3 }
  0xca   :  { %v327_v29 = vadd.f32 %v326_v28, %v307_v27 }
  0xcc   :  { %329 = vst [vmem:[%s763_s3] sm:$0x1] %v327_v29 }

</bundles_post_ra>
